<compile_context>
chip_gen: v6e
topology: v6e:2x2x1
jax: 0.10.0
libtpu: 0.0.40
codegen_flags: <defaults>
</compile_context>

<pallas_src>
import functools
import numpy as np
import jax
import jax.numpy as jnp
from jax import lax
from jax.experimental import pallas as pl
from jax.experimental.pallas import tpu as pltpu

# ----------------------------------------------------------------------------
# Module constants (SMPLify.__init__ defaults) and SMPL-X -> openpose137 tables
# ----------------------------------------------------------------------------
KP_WEIGHT = 100.0
PRESERVE_WEIGHT = 60.0
SMOOTH_WEIGHT = 10000.0
SIGMA = 100.0
NUM_KP = 137

KSUB = 144          # keypoints padded to a multiple of 8 (sublane axis)
MAX_TILE_N = 512    # frames per grid step (lane axis; multiple of 128)
DPAD = 8            # preserve feature padding (sublane axis)

# kp_mask buffer from prepare_smplx_to_openpose137: ones except a fixed set.
_KP_MASK_ZEROS = [25, 46] + list(range(84, 94)) + [135, 136]
KP_MASK = np.ones(NUM_KP, np.float32)
KP_MASK[_KP_MASK_ZEROS] = 0.0

SRC_INDS = np.array(
    [55, 12, 17, 19, 21, 16, 18, 20, 0, 2, 5, 8, 1, 4, 7]
    + list(range(56, 66))
    + [37, 38, 39, 66, 25, 26, 27, 67, 28, 29, 30, 68,
       34, 35, 36, 69, 31, 32, 33, 70, 52, 53, 54, 71,
       40, 41, 42, 72, 43, 44, 45, 73, 49, 50, 51, 74,
       46, 47, 48, 75]
    + list(range(127, 144)) + list(range(86, 127)), dtype=np.int32)
DST_INDS = np.array(
    list(range(0, 25)) + list(range(26, 46)) + list(range(47, 84))
    + list(range(94, 135)), dtype=np.int32)
assert SRC_INDS.shape == (123,) and DST_INDS.shape == (123,)

SMOOTH_KEYS = ("body_pose", "global_orient", "left_hand_pose", "right_hand_pose")


def _round_up(x, m):
    return (x + m - 1) // m * m


# ----------------------------------------------------------------------------
# SMPL-X 144 joints -> openpose 137
# ----------------------------------------------------------------------------
def convert_kps(kps):
    """Frame-major version (N,137,3) -- used by the pure-JAX reference."""
    n = kps.shape[0]
    new = jnp.zeros((n, NUM_KP, 3), kps.dtype)
    new = new.at[:, DST_INDS].set(kps[:, SRC_INDS])
    new = new.at[:, 8].set(0.5 * (new[:, 9] + new[:, 12]))
    a = new[:, np.array([9, 12]), :2]
    b = new[:, np.array([12, 9]), :2]
    upd = a + 0.25 * (a - b) + 0.5 * (new[:, 8:9, :2] - 0.5 * (a + b))
    new = new.at[:, np.array([9, 12]), :2].set(upd)
    return new


def convert_kps_t(kps):
    """Gather directly into the kernel layout (3, 137, N): coord, kp, frame."""
    n = kps.shape[0]
    kt = jnp.transpose(kps, (2, 1, 0))                       # (3, 144, N)
    new = jnp.zeros((3, NUM_KP, n), kps.dtype)
    new = new.at[:, DST_INDS].set(kt[:, SRC_INDS])
    new = new.at[:, 8].set(0.5 * (new[:, 9] + new[:, 12]))
    idx = np.array([9, 12])
    idx_r = np.array([12, 9])
    a = new[:2, idx]                                         # (2, 2, N)
    b = new[:2, idx_r]
    upd = a + 0.25 * (a - b) + 0.5 * (new[:2, 8:9] - 0.5 * (a + b))
    new = new.at[:2, idx].set(upd)
    return new


# ----------------------------------------------------------------------------
# In-kernel building blocks
# ----------------------------------------------------------------------------
def _kp_tile(coeff_ref, pts_ref, tgt_ref, conf_ref):
    """Geman-McClure reprojection partial sum for one frame tile.

    Layout: keypoints on sublanes (KSUB=144), frames on lanes (TILE_N).
    coeff_ref : (16, TILE_N)  rows 0-8: scaled (Ks@w2c)[:, :3] flattened,
                              rows 9-11: scaled translation, rows 12-15: pad.
    pts_ref   : (3, KSUB, TILE_N)  joint xyz.
    tgt_ref   : (2, KSUB, TILE_N)  targets pre-scaled by 200/scale.
    conf_ref  : (1, KSUB, TILE_N)  confidence * kp_mask (0 on all padding).
    """
    x = pts_ref[0]
    y = pts_ref[1]
    z = pts_ref[2]
    conf = conf_ref[0]

    def proj_row(r):
        # (1, TILE_N) coefficient rows -> cheap stride-0 sublane broadcasts.
        return (coeff_ref[3 * r + 0:3 * r + 1, :] * x
                + coeff_ref[3 * r + 1:3 * r + 2, :] * y
                + coeff_ref[3 * r + 2:3 * r + 3, :] * z
                + coeff_ref[9 + r:10 + r, :])

    px = proj_row(0)
    py = proj_row(1)
    pz = proj_row(2)                       # unscaled row -> matches clamp(min=1e-5)
    inv_z = 1.0 / jnp.maximum(pz, 1e-5)    # exact (tolerance-critical)
    dx = px * inv_z - tgt_ref[0]           # 200/scale already folded in
    dy = py * inv_z - tgt_ref[1]
    s2 = jnp.float32(SIGMA * SIGMA)
    x2 = dx * dx
    y2 = dy * dy
    # gmof via EUP approx reciprocals (denominators >= sigma^2, safe).
    gx = x2 * (s2 * pl.reciprocal(s2 + x2, approx=True))
    gy = y2 * (s2 * pl.reciprocal(s2 + y2, approx=True))
    total = (gx + gy) * conf
    part = jnp.sum(jnp.sum(total, axis=1, keepdims=True), axis=0, keepdims=True)
    return part                            # (1, 1)


def _ps_compute(p_ref, q_ref, w_ref, x_ref, ws_ref, pres_ref, sm_ref, *, num_t):
    """Preserve loss (lane-dense) + smooth loss (time on lanes, roll + arccos)."""
    # ---- preserve: features on sublanes (8), rows on lanes ----
    d = p_ref[...] - q_ref[...]                                   # (DPAD, RPAD)
    nrm = jnp.sqrt(jnp.sum(d * d, axis=0, keepdims=True))         # (1, RPAD)
    pres_ref[...] = jnp.sum(nrm * w_ref[...], axis=1, keepdims=True)

    # ---- smooth: 6D -> rotation rows, trace(R_{t+1} R_t^T) -> angle^2 ----
    jsub, t_pad = x_ref.shape[1], x_ref.shape[2]
    c = [x_ref[k] for k in range(6)]                              # each (JSUB, T_pad)
    eps2 = jnp.float32(1e-24)                                     # F.normalize eps^2
    inv1 = lax.rsqrt(jnp.maximum(c[0] * c[0] + c[1] * c[1] + c[2] * c[2], eps2))
    b1 = [c[k] * inv1 for k in range(3)]
    dot = b1[0] * c[3] + b1[1] * c[4] + b1[2] * c[5]
    u = [c[3 + k] - dot * b1[k] for k in range(3)]
    inv2 = lax.rsqrt(jnp.maximum(u[0] * u[0] + u[1] * u[1] + u[2] * u[2], eps2))
    b2 = [u[k] * inv2 for k in range(3)]
    b3 = [b1[1] * b2[2] - b1[2] * b2[1],
          b1[2] * b2[0] - b1[0] * b2[2],
          b1[0] * b2[1] - b1[1] * b2[0]]
    comps = b1 + b2 + b3

    # Temporal neighbour product via a single lane roll per component (XLU).
    # T_pad > num_t guarantees the wrap row pairs a valid lane with a padded
    # lane, so the pair-validity mask below is correct regardless of the roll
    # direction convention.
    shift = t_pad - 1                                             # == roll by -1
    tr = comps[0] * pltpu.roll(comps[0], shift=shift, axis=1)
    for comp in comps[1:]:
        tr = tr + comp * pltpu.roll(comp, shift=shift, axis=1)
    cosv = jnp.clip((tr - 1.0) * 0.5, -1.0, 1.0)

    # arccos(x)^2 via Abramowitz & Stegun 4.4.45 polynomial (|err| < 7e-5).
    ax = jnp.abs(cosv)
    poly = 1.5707288 + ax * (-0.2121144 + ax * (0.0742610 - 0.0187293 * ax))
    acos_abs = jnp.sqrt(jnp.maximum(1.0 - ax, 0.0)) * poly
    ang = jnp.where(cosv >= 0.0, acos_abs, jnp.float32(np.pi) - acos_abs)
    ang2 = ang * ang

    lane_id = lax.broadcasted_iota(jnp.int32, (jsub, t_pad), 1)
    vmask = (lane_id < num_t).astype(jnp.float32)
    pair_valid = vmask * pltpu.roll(vmask, shift=shift, axis=1)

    sm = ang2 * pair_valid * ws_ref[...]                          # ws: (JSUB, 1)
    sm_ref[...] = jnp.sum(jnp.sum(sm, axis=1, keepdims=True), axis=0, keepdims=True)


# ----------------------------------------------------------------------------
# Kernels
# ----------------------------------------------------------------------------
def _fused_kernel(coeff_ref, pts_ref, tgt_ref, conf_ref,
                  p_ref, q_ref, w_ref, x_ref, ws_ref,
                  kp_ref, pres_ref, sm_ref, *, num_t):
    kp_ref[...] = _kp_tile(coeff_ref, pts_ref, tgt_ref, conf_ref)
    _ps_compute(p_ref, q_ref, w_ref, x_ref, ws_ref, pres_ref, sm_ref, num_t=num_t)


def _kp_kernel(coeff_ref, pts_ref, tgt_ref, conf_ref, kp_ref):
    kp_ref[...] = _kp_tile(coeff_ref, pts_ref, tgt_ref, conf_ref)


def _ps_kernel(p_ref, q_ref, w_ref, x_ref, ws_ref, pres_ref, sm_ref, *, num_t):
    _ps_compute(p_ref, q_ref, w_ref, x_ref, ws_ref, pres_ref, sm_ref, num_t=num_t)


# ----------------------------------------------------------------------------
# Target / camera packing that is constant across an SMPLify fitting loop.
# ----------------------------------------------------------------------------
def precompute_smplify_targets(Ks, w2c, img_wh, target_kps, target_scales,
                               ignore_hands=False, min_grid_steps=1,
                               max_tile_n=MAX_TILE_N):
    f32 = jnp.float32
    n = int(target_kps.shape[0])

    # Frames on lanes -> tile must be a multiple of 128.  min_grid_steps > 1
    # forces >= that many grid steps so v7x's two TensorCores can split them.
    tile_n = _round_up(pl.cdiv(n, max(int(min_grid_steps), 1)), 128)
    tile_n = min(tile_n, max(_round_up(max_tile_n, 128), 128))
    n_pad = _round_up(n, tile_n)
    g = n_pad // tile_n

    s = 200.0 / target_scales.astype(f32)                          # (N,)
    # M = Ks @ w2c[:3] with 200/scale folded into rows 0-1 (x, y).
    M = jnp.einsum("nij,jk->nik", Ks.astype(f32), w2c[:3].astype(f32))
    row_scale = jnp.stack([s, s, jnp.ones_like(s)], axis=1)[..., None]
    M = M * row_scale
    coeff = jnp.concatenate([M[:, :, :3].reshape(n, 9), M[:, :, 3]], axis=1)
    coeff = jnp.pad(coeff.T, ((0, 16 - 12), (0, n_pad - n)))       # (16, N_pad)

    tgt = target_kps[..., :2].astype(f32) * jnp.asarray(img_wh, f32)
    tgt = tgt * s[:, None, None]                                   # fold 200/scale
    tgt = jnp.transpose(tgt, (2, 1, 0))                            # (2, 137, N)
    tgt = jnp.pad(tgt, ((0, 0), (0, KSUB - NUM_KP), (0, n_pad - n)))

    conf = target_kps[..., 2].astype(f32) * jnp.asarray(KP_MASK)[None, :]
    if ignore_hands:
        conf = conf.at[:, 25:-70].set(0.0)
    conf = jnp.pad(conf.T, ((0, KSUB - NUM_KP), (0, n_pad - n)))[None]  # (1,KSUB,N_pad)

    return dict(n=n, tile_n=tile_n, n_pad=n_pad, g=g,
                coeff=coeff, tgt=tgt, conf=conf)


# ----------------------------------------------------------------------------
# Forward wrapper
# ----------------------------------------------------------------------------
def smplify_forward_pallas(joints144, body_params, Ks, w2c, img_wh, target_kps,
                           target_scales, init_params, ignore_hands=False,
                           precomputed=None, min_grid_steps=1):
    """Pallas version of SMPLify.forward (body_output.joints passed directly).

    `precomputed` (from precompute_smplify_targets) lets a fitting loop hoist
    the camera/target packing out of the per-step forward.
    """
    f32 = jnp.float32
    if precomputed is None:
        precomputed = precompute_smplify_targets(
            Ks, w2c, img_wh, target_kps, target_scales,
            ignore_hands=ignore_hands, min_grid_steps=min_grid_steps)
    n = precomputed["n"]
    tile_n = precomputed["tile_n"]
    n_pad = precomputed["n_pad"]
    g = precomputed["g"]
    coeff = precomputed["coeff"]
    tgt = precomputed["tgt"]
    conf = precomputed["conf"]

    # ---------------- kp packing: (3, KSUB, N_pad), frames on lanes ----------
    pred_t = convert_kps_t(joints144.astype(f32))                  # (3, 137, N)
    pts = jnp.pad(pred_t, ((0, 0), (0, KSUB - NUM_KP), (0, n_pad - n)))

    # ---------------- preserve packing (dpad = 8, lane-dense) ----------------
    # TODO(synk): Q (init_params packing) is also fitting-loop invariant and
    # could be hoisted alongside precompute_smplify_targets.
    pres_extra = jnp.float32(0.0)
    cols_p, cols_q, wcols = [], [], []
    for k in body_params.keys():
        v = body_params[k].astype(f32)
        q = init_params[k].astype(f32)
        d = int(v.shape[-1])
        if d > DPAD:
            # Wide features (e.g. betas, dim 10) stay in plain JAX: a single
            # tiny row is not worth doubling dpad for.
            pres_extra = pres_extra + jnp.mean(
                jnp.sqrt(jnp.sum((v - q) ** 2, axis=-1)))
            continue
        p2 = v.reshape(-1, d).T                                    # (d, rows)
        q2 = q.reshape(-1, d).T
        rows = p2.shape[1]
        cols_p.append(jnp.pad(p2, ((0, DPAD - d), (0, 0))))
        cols_q.append(jnp.pad(q2, ((0, DPAD - d), (0, 0))))
        wcols.append(jnp.full((1, rows), 1.0 / rows, f32))
    if cols_p:
        P = jnp.concatenate(cols_p, axis=1)
        Q = jnp.concatenate(cols_q, axis=1)
        W = jnp.concatenate(wcols, axis=1)
    else:
        P = jnp.zeros((DPAD, 1), f32)
        Q = jnp.zeros((DPAD, 1), f32)
        W = jnp.zeros((1, 1), f32)
    r_total = P.shape[1]
    rpad = _round_up(r_total, 128)
    P = jnp.pad(P, ((0, 0), (0, rpad - r_total)))
    Q = jnp.pad(Q, ((0, 0), (0, rpad - r_total)))
    W = jnp.pad(W, ((0, 0), (0, rpad - r_total)))

    # ---------------- smooth packing: joints on sublanes, time on lanes ------
    parts = [body_params[k].astype(f32) for k in SMOOTH_KEYS]
    js = [int(p.shape[1]) for p in parts]
    pose6 = jnp.concatenate(parts, axis=1)                         # (T, Jtot, 6)
    t, jtot, _ = pose6.shape
    jsub = _round_up(jtot, 8)
    t_pad = _round_up(t + 1, 128)          # strictly > t so the roll wrap is masked
    X = jnp.transpose(pose6, (2, 1, 0))                            # (6, Jtot, T)
    X = jnp.pad(X, ((0, 0), (0, jsub - jtot), (0, t_pad - t)))
    denom = float(max(t - 1, 1))
    ws_np = np.zeros((jsub, 1), np.float32)
    off = 0
    for j in js:                            # per-key mean folded into weights
        ws_np[off:off + j, 0] = 1.0 / (denom * j)
        off += j
    WS = jnp.asarray(ws_np)

    # ---------------- specs ----------------
    kp_in_specs = [
        pl.BlockSpec((16, tile_n), lambda i: (0, i)),
        pl.BlockSpec((3, KSUB, tile_n), lambda i: (0, 0, i)),
        pl.BlockSpec((2, KSUB, tile_n), lambda i: (0, 0, i)),
        pl.BlockSpec((1, KSUB, tile_n), lambda i: (0, 0, i)),
    ]
    kp_out_shape = jax.ShapeDtypeStruct((g, 1, 1), f32)
    kp_out_spec = pl.BlockSpec((None, 1, 1), lambda i: (i, 0, 0))
    ps_in_specs = [
        pl.BlockSpec((DPAD, rpad), lambda i: (0, 0)),
        pl.BlockSpec((DPAD, rpad), lambda i: (0, 0)),
        pl.BlockSpec((1, rpad), lambda i: (0, 0)),
        pl.BlockSpec((6, jsub, t_pad), lambda i: (0, 0, 0)),
        pl.BlockSpec((jsub, 1), lambda i: (0, 0)),
    ]
    ps_out_shapes = (jax.ShapeDtypeStruct((1, 1), f32),
                     jax.ShapeDtypeStruct((1, 1), f32))
    ps_out_specs = (pl.BlockSpec((1, 1), lambda i: (0, 0)),
                    pl.BlockSpec((1, 1), lambda i: (0, 0)))

    seq_params = pltpu.CompilerParams(
        dimension_semantics=("arbitrary",),
        vmem_limit_bytes=48 * 1024 * 1024)

    if g == 1:
        # Common case: one fused pallas_call, three scalar outputs.
        kp_parts, pres, sm = pl.pallas_call(
            functools.partial(_fused_kernel, num_t=t),
            out_shape=(kp_out_shape,) + ps_out_shapes,
            grid=(1,),
            in_specs=kp_in_specs + ps_in_specs,
            out_specs=(kp_out_spec,) + ps_out_specs,
            compiler_params=seq_params,
        )(coeff, pts, tgt, conf, P, Q, W, X, WS)
    else:
        # Many frames: tile the frame axis with per-tile partial sums so the
        # grid can be "parallel" (v7x megacore sharding).  preserve+smooth are
        # revisited/constant-index outputs, so they live in a second sequential
        # call rather than being fused under parallel semantics.
        kp_parts = pl.pallas_call(
            _kp_kernel,
            out_shape=kp_out_shape,
            grid=(g,),
            in_specs=kp_in_specs,
            out_specs=kp_out_spec,
            compiler_params=pltpu.CompilerParams(
                dimension_semantics=("parallel",),
                vmem_limit_bytes=48 * 1024 * 1024),
        )(coeff, pts, tgt, conf)
        pres, sm = pl.pallas_call(
            functools.partial(_ps_kernel, num_t=t),
            out_shape=ps_out_shapes,
            grid=(1,),
            in_specs=ps_in_specs,
            out_specs=ps_out_specs,
            compiler_params=seq_params,
        )(P, Q, W, X, WS)

    kp = jnp.sum(kp_parts) / (n * NUM_KP * 2)          # mean over (N, 137, 2)
    preserve = pres[0, 0] + pres_extra
    smooth = sm[0, 0]
    return {"kp": KP_WEIGHT * kp,
            "preserve": PRESERVE_WEIGHT * preserve,
            "smooth": SMOOTH_WEIGHT * smooth}


# ----------------------------------------------------------------------------
# Pure-JAX reference (mirrors the PyTorch forward op-for-op) for validation.
# ----------------------------------------------------------------------------
def _gmof(x, sigma):
    x2 = x ** 2
    s2 = sigma ** 2
    return s2 * x2 / (s2 + x2)


def _rotation_6d_to_matrix(d6):
    a1, a2 = d6[..., :3], d6[..., 3:]
    b1 = a1 / jnp.maximum(jnp.linalg.norm(a1, axis=-1, keepdims=True), 1e-12)
    b2 = a2 - jnp.sum(b1 * a2, axis=-1, keepdims=True) * b1
    b2 = b2 / jnp.maximum(jnp.linalg.norm(b2, axis=-1, keepdims=True), 1e-12)
    b3 = jnp.cross(b1, b2)
    return jnp.stack((b1, b2, b3), axis=-2)


def _compute_smooth_loss(x):
    R = _rotation_6d_to_matrix(x)
    R12 = R[1:] @ jnp.swapaxes(R[:-1], -2, -1)
    tr = jnp.einsum("...ii->...", R12)
    ang = jnp.arccos(jnp.clip((tr - 1.0) * 0.5, -1.0, 1.0))
    return jnp.mean(ang ** 2)            # ||rotvec||^2 == angle^2


def smplify_forward_reference(joints144, body_params, Ks, w2c, img_wh,
                              target_kps, target_scales, init_params,
                              ignore_hands=False):
    pred = convert_kps(joints144)
    pred_h = jnp.concatenate([pred, jnp.ones_like(pred[..., :1])], axis=-1)
    pred_c = jnp.einsum("ij,nkj->nki", w2c[:3], pred_h)
    pk = jnp.einsum("nij,nkj->nki", Ks, pred_c)
    pk = pk[..., :2] / jnp.maximum(pk[..., 2:], 1e-5)
    tgt = jnp.concatenate(
        [target_kps[..., :-1] * jnp.asarray(img_wh, jnp.float32),
         target_kps[..., -1:]], axis=-1)
    conf = tgt[..., -1:] * jnp.asarray(KP_MASK)[:, None]
    if ignore_hands:
        conf = conf.at[:, 25:-70].set(0.0)
    r = (pk - tgt[..., :-1]) / target_scales[:, None, None] * 200.0
    kp = jnp.mean(_gmof(r, SIGMA) * conf)
    preserve = jnp.float32(0.0)
    for k in body_params.keys():
        preserve = preserve + jnp.mean(
            jnp.linalg.norm(body_params[k] - init_params[k], axis=-1))
    smooth = jnp.float32(0.0)
    for k in SMOOTH_KEYS:
        smooth = smooth + _compute_smooth_loss(body_params[k])
    return {"kp": KP_WEIGHT * kp,
            "preserve": PRESERVE_WEIGHT * preserve,
            "smooth": SMOOTH_WEIGHT * smooth}


if __name__ == "__main__":
    key = jax.random.PRNGKey(0)
    ks = jax.random.split(key, 40)
    img_wh = (64, 48)

    def make_inputs(n, koff):
        joints144 = jax.random.normal(ks[koff], (n, 144, 3), jnp.float32) * 0.5

        def make_params(o):
            return {
                "betas": 0.1 * jax.random.normal(ks[o + 0], (1, 10), jnp.float32),
                "body_pose": jax.random.normal(ks[o + 1], (n, 21, 6), jnp.float32),
                "global_orient": jax.random.normal(ks[o + 2], (n, 1, 6), jnp.float32),
                "left_hand_pose": jax.random.normal(ks[o + 3], (n, 15, 6), jnp.float32),
                "right_hand_pose": jax.random.normal(ks[o + 4], (n, 15, 6), jnp.float32),
                "transl": 0.1 * jax.random.normal(ks[o + 5], (n, 3), jnp.float32),
            }

        body_params = make_params(koff + 1)
        init_params = make_params(koff + 7)
        K0 = jnp.array([[50.0, 0.0, 32.0], [0.0, 50.0, 24.0], [0.0, 0.0, 1.0]],
                       jnp.float32)
        Ks_mat = jnp.tile(K0[None], (n, 1, 1))
        w2c = jnp.array([[1.0, 0.0, 0.0, 0.1],
                         [0.0, 1.0, 0.0, -0.05],
                         [0.0, 0.0, 1.0, 3.0],
                         [0.0, 0.0, 0.0, 1.0]], jnp.float32)
        target_xy = jax.random.uniform(ks[koff + 13], (n, NUM_KP, 2), jnp.float32)
        target_conf = jax.random.uniform(ks[koff + 14], (n, NUM_KP, 1), jnp.float32)
        target_kps = jnp.concatenate([target_xy, target_conf], axis=-1)
        target_scales = jax.random.uniform(ks[koff + 15], (n,), jnp.float32,
                                           minval=40.0, maxval=60.0)
        return (joints144, body_params, Ks_mat, w2c, target_kps,
                target_scales, init_params)

    # --- test 1: small N -> single fused pallas_call (g == 1), with the
    #     fitting-loop-invariant packing hoisted via precompute. ---
    (joints144, body_params, Ks_mat, w2c, target_kps,
     target_scales, init_params) = make_inputs(8, 0)
    pre = precompute_smplify_targets(Ks_mat, w2c, img_wh, target_kps,
                                     target_scales)
    losses = smplify_forward_pallas(joints144, body_params, Ks_mat, w2c, img_wh,
                                    target_kps, target_scales, init_params,
                                    ignore_hands=False, precomputed=pre)
    losses = jax.tree_util.tree_map(jax.block_until_ready, losses)
    ref = smplify_forward_reference(joints144, body_params, Ks_mat, w2c, img_wh,
                                    target_kps, target_scales, init_params)
    for name in ("kp", "preserve", "smooth"):
        got, want = float(losses[name]), float(ref[name])
        assert np.isfinite(got), name
        assert np.allclose(got, want, rtol=5e-3, atol=1e-2), (name, got, want)

    # --- test 2: larger N with min_grid_steps=2 -> tiled "parallel" kp call
    #     (v7x megacore path) + one preserve/smooth call. ---
    (joints144, body_params, Ks_mat, w2c, target_kps,
     target_scales, init_params) = make_inputs(200, 20)
    losses2 = smplify_forward_pallas(joints144, body_params, Ks_mat, w2c, img_wh,
                                     target_kps, target_scales, init_params,
                                     ignore_hands=False, min_grid_steps=2)
    losses2 = jax.tree_util.tree_map(jax.block_until_ready, losses2)
    ref2 = smplify_forward_reference(joints144, body_params, Ks_mat, w2c, img_wh,
                                     target_kps, target_scales, init_params)
    for name in ("kp", "preserve", "smooth"):
        got, want = float(losses2[name]), float(ref2[name])
        assert np.isfinite(got), name
        assert np.allclose(got, want, rtol=5e-3, atol=1e-2), (name, got, want)

    print("KERNEL_OK")
</pallas_src>

<mosaic_0001>
module attributes {stable_mosaic.version = 11 : i64} {
  func.func @_fused_kernel(%arg0: i32, %arg1: memref<16x128xf32, #tpu.memory_space<vmem>>, %arg2: memref<3x144x128xf32, #tpu.memory_space<vmem>>, %arg3: memref<2x144x128xf32, #tpu.memory_space<vmem>>, %arg4: memref<1x144x128xf32, #tpu.memory_space<vmem>>, %arg5: memref<8x512xf32, #tpu.memory_space<vmem>>, %arg6: memref<8x512xf32, #tpu.memory_space<vmem>>, %arg7: memref<1x512xf32, #tpu.memory_space<vmem>>, %arg8: memref<6x56x128xf32, #tpu.memory_space<vmem>>, %arg9: memref<56x1xf32, #tpu.memory_space<vmem>>, %arg10: memref<1x1x1xf32, #tpu.memory_space<vmem>>, %arg11: memref<1x1xf32, #tpu.memory_space<vmem>>, %arg12: memref<1x1xf32, #tpu.memory_space<vmem>>) attributes {dimension_semantics = [#tpu.dimension_semantics<arbitrary>], iteration_bounds = array<i64: 1>, scalar_prefetch = 0 : i64, scratch_operands = 0 : i64, tpu.core_type = #tpu.core_type<tc>, window_params = [{transform_indices = @transform_0, window_bounds = array<i64: 16, 128>}, {transform_indices = @transform_1, window_bounds = array<i64: 3, 144, 128>}, {transform_indices = @transform_2, window_bounds = array<i64: 2, 144, 128>}, {transform_indices = @transform_3, window_bounds = array<i64: 1, 144, 128>}, {pipeline_mode = #tpu.pipeline_mode<synchronous>, transform_indices = @transform_4, window_bounds = array<i64: 8, 512>}, {pipeline_mode = #tpu.pipeline_mode<synchronous>, transform_indices = @transform_5, window_bounds = array<i64: 8, 512>}, {pipeline_mode = #tpu.pipeline_mode<synchronous>, transform_indices = @transform_6, window_bounds = array<i64: 1, 512>}, {pipeline_mode = #tpu.pipeline_mode<synchronous>, transform_indices = @transform_7, window_bounds = array<i64: 6, 56, 128>}, {pipeline_mode = #tpu.pipeline_mode<synchronous>, transform_indices = @transform_8, window_bounds = array<i64: 56, 1>}, {transform_indices = @transform_9, window_bounds = array<i64: 1, 1, 1>}, {pipeline_mode = #tpu.pipeline_mode<synchronous>, transform_indices = @transform_10, window_bounds = array<i64: 1, 1>}, {pipeline_mode = #tpu.pipeline_mode<synchronous>, transform_indices = @transform_11, window_bounds = array<i64: 1, 1>}]} {
    %c0 = arith.constant 0 : index
    %c0_0 = arith.constant 0 : index
    %c0_1 = arith.constant 0 : index
    %0 = vector.load %arg2[%c0, %c0_0, %c0_1] : memref<3x144x128xf32, #tpu.memory_space<vmem>>, vector<1x144x128xf32>
    %1 = vector.shape_cast %0 : vector<1x144x128xf32> to vector<144x128xf32>
    %c1 = arith.constant 1 : index
    %c0_2 = arith.constant 0 : index
    %c0_3 = arith.constant 0 : index
    %2 = vector.load %arg2[%c1, %c0_2, %c0_3] : memref<3x144x128xf32, #tpu.memory_space<vmem>>, vector<1x144x128xf32>
    %3 = vector.shape_cast %2 : vector<1x144x128xf32> to vector<144x128xf32>
    %c2 = arith.constant 2 : index
    %c0_4 = arith.constant 0 : index
    %c0_5 = arith.constant 0 : index
    %4 = vector.load %arg2[%c2, %c0_4, %c0_5] : memref<3x144x128xf32, #tpu.memory_space<vmem>>, vector<1x144x128xf32>
    %5 = vector.shape_cast %4 : vector<1x144x128xf32> to vector<144x128xf32>
    %c0_6 = arith.constant 0 : index
    %c0_7 = arith.constant 0 : index
    %c0_8 = arith.constant 0 : index
    %6 = vector.load %arg4[%c0_6, %c0_7, %c0_8] : memref<1x144x128xf32, #tpu.memory_space<vmem>>, vector<1x144x128xf32>
    %7 = vector.shape_cast %6 : vector<1x144x128xf32> to vector<144x128xf32>
    %c0_9 = arith.constant 0 : index
    %c0_10 = arith.constant 0 : index
    %8 = vector.load %arg1[%c0_9, %c0_10] : memref<16x128xf32, #tpu.memory_space<vmem>>, vector<1x128xf32>
    %9 = vector.broadcast %8 : vector<1x128xf32> to vector<144x128xf32>
    %10 = arith.mulf %9, %1 : vector<144x128xf32>
    %c1_11 = arith.constant 1 : index
    %c0_12 = arith.constant 0 : index
    %11 = vector.load %arg1[%c1_11, %c0_12] : memref<16x128xf32, #tpu.memory_space<vmem>>, vector<1x128xf32>
    %12 = vector.broadcast %11 : vector<1x128xf32> to vector<144x128xf32>
    %13 = arith.mulf %12, %3 : vector<144x128xf32>
    %14 = arith.addf %10, %13 : vector<144x128xf32>
    %c2_13 = arith.constant 2 : index
    %c0_14 = arith.constant 0 : index
    %15 = vector.load %arg1[%c2_13, %c0_14] : memref<16x128xf32, #tpu.memory_space<vmem>>, vector<1x128xf32>
    %16 = vector.broadcast %15 : vector<1x128xf32> to vector<144x128xf32>
    %17 = arith.mulf %16, %5 : vector<144x128xf32>
    %18 = arith.addf %14, %17 : vector<144x128xf32>
    %c9 = arith.constant 9 : index
    %c0_15 = arith.constant 0 : index
    %19 = vector.load %arg1[%c9, %c0_15] : memref<16x128xf32, #tpu.memory_space<vmem>>, vector<1x128xf32>
    %20 = vector.broadcast %19 : vector<1x128xf32> to vector<144x128xf32>
    %21 = arith.addf %18, %20 : vector<144x128xf32>
    %c3 = arith.constant 3 : index
    %c0_16 = arith.constant 0 : index
    %22 = vector.load %arg1[%c3, %c0_16] : memref<16x128xf32, #tpu.memory_space<vmem>>, vector<1x128xf32>
    %23 = vector.broadcast %22 : vector<1x128xf32> to vector<144x128xf32>
    %24 = arith.mulf %23, %1 : vector<144x128xf32>
    %c4 = arith.constant 4 : index
    %c0_17 = arith.constant 0 : index
    %25 = vector.load %arg1[%c4, %c0_17] : memref<16x128xf32, #tpu.memory_space<vmem>>, vector<1x128xf32>
    %26 = vector.broadcast %25 : vector<1x128xf32> to vector<144x128xf32>
    %27 = arith.mulf %26, %3 : vector<144x128xf32>
    %28 = arith.addf %24, %27 : vector<144x128xf32>
    %c5 = arith.constant 5 : index
    %c0_18 = arith.constant 0 : index
    %29 = vector.load %arg1[%c5, %c0_18] : memref<16x128xf32, #tpu.memory_space<vmem>>, vector<1x128xf32>
    %30 = vector.broadcast %29 : vector<1x128xf32> to vector<144x128xf32>
    %31 = arith.mulf %30, %5 : vector<144x128xf32>
    %32 = arith.addf %28, %31 : vector<144x128xf32>
    %c10 = arith.constant 10 : index
    %c0_19 = arith.constant 0 : index
    %33 = vector.load %arg1[%c10, %c0_19] : memref<16x128xf32, #tpu.memory_space<vmem>>, vector<1x128xf32>
    %34 = vector.broadcast %33 : vector<1x128xf32> to vector<144x128xf32>
    %35 = arith.addf %32, %34 : vector<144x128xf32>
    %c6 = arith.constant 6 : index
    %c0_20 = arith.constant 0 : index
    %36 = vector.load %arg1[%c6, %c0_20] : memref<16x128xf32, #tpu.memory_space<vmem>>, vector<1x128xf32>
    %37 = vector.broadcast %36 : vector<1x128xf32> to vector<144x128xf32>
    %38 = arith.mulf %37, %1 : vector<144x128xf32>
    %c7 = arith.constant 7 : index
    %c0_21 = arith.constant 0 : index
    %39 = vector.load %arg1[%c7, %c0_21] : memref<16x128xf32, #tpu.memory_space<vmem>>, vector<1x128xf32>
    %40 = vector.broadcast %39 : vector<1x128xf32> to vector<144x128xf32>
    %41 = arith.mulf %40, %3 : vector<144x128xf32>
    %42 = arith.addf %38, %41 : vector<144x128xf32>
    %c8 = arith.constant 8 : index
    %c0_22 = arith.constant 0 : index
    %43 = vector.load %arg1[%c8, %c0_22] : memref<16x128xf32, #tpu.memory_space<vmem>>, vector<1x128xf32>
    %44 = vector.broadcast %43 : vector<1x128xf32> to vector<144x128xf32>
    %45 = arith.mulf %44, %5 : vector<144x128xf32>
    %46 = arith.addf %42, %45 : vector<144x128xf32>
    %c11 = arith.constant 11 : index
    %c0_23 = arith.constant 0 : index
    %47 = vector.load %arg1[%c11, %c0_23] : memref<16x128xf32, #tpu.memory_space<vmem>>, vector<1x128xf32>
    %48 = vector.broadcast %47 : vector<1x128xf32> to vector<144x128xf32>
    %49 = arith.addf %46, %48 : vector<144x128xf32>
    %cst = arith.constant 9.99999974E-6 : f32
    %50 = vector.broadcast %cst : f32 to vector<144x128xf32>
    %51 = arith.maximumf %49, %50 : vector<144x128xf32>
    %cst_24 = arith.constant 1.000000e+00 : f32
    %52 = vector.broadcast %cst_24 : f32 to vector<144x128xf32>
    %53 = arith.divf %52, %51 : vector<144x128xf32>
    %54 = arith.mulf %21, %53 : vector<144x128xf32>
    %c0_25 = arith.constant 0 : index
    %c0_26 = arith.constant 0 : index
    %c0_27 = arith.constant 0 : index
    %55 = vector.load %arg3[%c0_25, %c0_26, %c0_27] : memref<2x144x128xf32, #tpu.memory_space<vmem>>, vector<1x144x128xf32>
    %56 = vector.shape_cast %55 : vector<1x144x128xf32> to vector<144x128xf32>
    %57 = arith.subf %54, %56 : vector<144x128xf32>
    %58 = arith.mulf %35, %53 : vector<144x128xf32>
    %c1_28 = arith.constant 1 : index
    %c0_29 = arith.constant 0 : index
    %c0_30 = arith.constant 0 : index
    %59 = vector.load %arg3[%c1_28, %c0_29, %c0_30] : memref<2x144x128xf32, #tpu.memory_space<vmem>>, vector<1x144x128xf32>
    %60 = vector.shape_cast %59 : vector<1x144x128xf32> to vector<144x128xf32>
    %61 = arith.subf %58, %60 : vector<144x128xf32>
    %62 = arith.mulf %57, %57 : vector<144x128xf32>
    %63 = arith.mulf %61, %61 : vector<144x128xf32>
    %cst_31 = arith.constant 1.000000e+04 : f32
    %64 = vector.broadcast %cst_31 : f32 to vector<144x128xf32>
    %65 = arith.addf %64, %62 : vector<144x128xf32>
    %66 = tpu.reciprocal %65 {approx = true} : vector<144x128xf32> -> vector<144x128xf32>
    %cst_32 = arith.constant 1.000000e+04 : f32
    %67 = vector.broadcast %cst_32 : f32 to vector<144x128xf32>
    %68 = arith.mulf %67, %66 : vector<144x128xf32>
    %69 = arith.mulf %62, %68 : vector<144x128xf32>
    %cst_33 = arith.constant 1.000000e+04 : f32
    %70 = vector.broadcast %cst_33 : f32 to vector<144x128xf32>
    %71 = arith.addf %70, %63 : vector<144x128xf32>
    %72 = tpu.reciprocal %71 {approx = true} : vector<144x128xf32> -> vector<144x128xf32>
    %cst_34 = arith.constant 1.000000e+04 : f32
    %73 = vector.broadcast %cst_34 : f32 to vector<144x128xf32>
    %74 = arith.mulf %73, %72 : vector<144x128xf32>
    %75 = arith.mulf %63, %74 : vector<144x128xf32>
    %76 = arith.addf %69, %75 : vector<144x128xf32>
    %77 = arith.mulf %76, %7 : vector<144x128xf32>
    %cst_35 = arith.constant dense<0.000000e+00> : vector<144xf32>
    %78 = vector.multi_reduction <add>, %77, %cst_35 [1] : vector<144x128xf32> to vector<144xf32>
    %79 = vector.shape_cast %78 : vector<144xf32> to vector<144x1xf32>
    %cst_36 = arith.constant dense<0.000000e+00> : vector<1xf32>
    %80 = vector.multi_reduction <add>, %79, %cst_36 [0] : vector<144x1xf32> to vector<1xf32>
    %81 = vector.shape_cast %80 : vector<1xf32> to vector<1x1xf32>
    %c0_37 = arith.constant 0 : index
    %c0_38 = arith.constant 0 : index
    %c0_39 = arith.constant 0 : index
    %82 = vector.load %arg10[%c0_37, %c0_38, %c0_39] : memref<1x1x1xf32, #tpu.memory_space<vmem>>, vector<1x1x1xf32>
    %83 = vector.shape_cast %82 : vector<1x1x1xf32> to vector<1x1xf32>
    %84 = vector.shape_cast %81 : vector<1x1xf32> to vector<1x1x1xf32>
    tpu.vector_store %arg10[%c0_37, %c0_38, %c0_39], %84 {strides = array<i32>} : memref<1x1x1xf32, #tpu.memory_space<vmem>>, vector<1x1x1xf32>,
    %c0_40 = arith.constant 0 : index
    %c0_41 = arith.constant 0 : index
    %85 = vector.load %arg5[%c0_40, %c0_41] : memref<8x512xf32, #tpu.memory_space<vmem>>, vector<8x512xf32>
    %c0_42 = arith.constant 0 : index
    %c0_43 = arith.constant 0 : index
    %86 = vector.load %arg6[%c0_42, %c0_43] : memref<8x512xf32, #tpu.memory_space<vmem>>, vector<8x512xf32>
    %87 = arith.subf %85, %86 : vector<8x512xf32>
    %88 = arith.mulf %87, %87 : vector<8x512xf32>
    %cst_44 = arith.constant dense<0.000000e+00> : vector<512xf32>
    %89 = vector.multi_reduction <add>, %88, %cst_44 [0] : vector<8x512xf32> to vector<512xf32>
    %90 = vector.shape_cast %89 : vector<512xf32> to vector<1x512xf32>
    %91 = math.sqrt %90 : vector<1x512xf32>
    %c0_45 = arith.constant 0 : index
    %c0_46 = arith.constant 0 : index
    %92 = vector.load %arg7[%c0_45, %c0_46] : memref<1x512xf32, #tpu.memory_space<vmem>>, vector<1x512xf32>
    %93 = arith.mulf %91, %92 : vector<1x512xf32>
    %cst_47 = arith.constant dense<0.000000e+00> : vector<1xf32>
    %94 = vector.multi_reduction <add>, %93, %cst_47 [1] : vector<1x512xf32> to vector<1xf32>
    %95 = vector.shape_cast %94 : vector<1xf32> to vector<1x1xf32>
    %c0_48 = arith.constant 0 : index
    %c0_49 = arith.constant 0 : index
    %96 = vector.load %arg11[%c0_48, %c0_49] : memref<1x1xf32, #tpu.memory_space<vmem>>, vector<1x1xf32>
    tpu.vector_store %arg11[%c0_48, %c0_49], %95 {strides = array<i32>} : memref<1x1xf32, #tpu.memory_space<vmem>>, vector<1x1xf32>,
    %c0_50 = arith.constant 0 : index
    %c0_51 = arith.constant 0 : index
    %c0_52 = arith.constant 0 : index
    %97 = vector.load %arg8[%c0_50, %c0_51, %c0_52] : memref<6x56x128xf32, #tpu.memory_space<vmem>>, vector<1x56x128xf32>
    %98 = vector.shape_cast %97 : vector<1x56x128xf32> to vector<56x128xf32>
    %c1_53 = arith.constant 1 : index
    %c0_54 = arith.constant 0 : index
    %c0_55 = arith.constant 0 : index
    %99 = vector.load %arg8[%c1_53, %c0_54, %c0_55] : memref<6x56x128xf32, #tpu.memory_space<vmem>>, vector<1x56x128xf32>
    %100 = vector.shape_cast %99 : vector<1x56x128xf32> to vector<56x128xf32>
    %c2_56 = arith.constant 2 : index
    %c0_57 = arith.constant 0 : index
    %c0_58 = arith.constant 0 : index
    %101 = vector.load %arg8[%c2_56, %c0_57, %c0_58] : memref<6x56x128xf32, #tpu.memory_space<vmem>>, vector<1x56x128xf32>
    %102 = vector.shape_cast %101 : vector<1x56x128xf32> to vector<56x128xf32>
    %c3_59 = arith.constant 3 : index
    %c0_60 = arith.constant 0 : index
    %c0_61 = arith.constant 0 : index
    %103 = vector.load %arg8[%c3_59, %c0_60, %c0_61] : memref<6x56x128xf32, #tpu.memory_space<vmem>>, vector<1x56x128xf32>
    %104 = vector.shape_cast %103 : vector<1x56x128xf32> to vector<56x128xf32>
    %c4_62 = arith.constant 4 : index
    %c0_63 = arith.constant 0 : index
    %c0_64 = arith.constant 0 : index
    %105 = vector.load %arg8[%c4_62, %c0_63, %c0_64] : memref<6x56x128xf32, #tpu.memory_space<vmem>>, vector<1x56x128xf32>
    %106 = vector.shape_cast %105 : vector<1x56x128xf32> to vector<56x128xf32>
    %c5_65 = arith.constant 5 : index
    %c0_66 = arith.constant 0 : index
    %c0_67 = arith.constant 0 : index
    %107 = vector.load %arg8[%c5_65, %c0_66, %c0_67] : memref<6x56x128xf32, #tpu.memory_space<vmem>>, vector<1x56x128xf32>
    %108 = vector.shape_cast %107 : vector<1x56x128xf32> to vector<56x128xf32>
    %109 = arith.mulf %98, %98 : vector<56x128xf32>
    %110 = arith.mulf %100, %100 : vector<56x128xf32>
    %111 = arith.addf %109, %110 : vector<56x128xf32>
    %112 = arith.mulf %102, %102 : vector<56x128xf32>
    %113 = arith.addf %111, %112 : vector<56x128xf32>
    %cst_68 = arith.constant 1.000000e-24 : f32
    %114 = vector.broadcast %cst_68 : f32 to vector<56x128xf32>
    %115 = arith.maximumf %113, %114 : vector<56x128xf32>
    %116 = math.rsqrt %115 : vector<56x128xf32>
    %117 = arith.mulf %98, %116 : vector<56x128xf32>
    %118 = arith.mulf %100, %116 : vector<56x128xf32>
    %119 = arith.mulf %102, %116 : vector<56x128xf32>
    %120 = arith.mulf %117, %104 : vector<56x128xf32>
    %121 = arith.mulf %118, %106 : vector<56x128xf32>
    %122 = arith.addf %120, %121 : vector<56x128xf32>
    %123 = arith.mulf %119, %108 : vector<56x128xf32>
    %124 = arith.addf %122, %123 : vector<56x128xf32>
    %125 = arith.mulf %124, %117 : vector<56x128xf32>
    %126 = arith.subf %104, %125 : vector<56x128xf32>
    %127 = arith.mulf %124, %118 : vector<56x128xf32>
    %128 = arith.subf %106, %127 : vector<56x128xf32>
    %129 = arith.mulf %124, %119 : vector<56x128xf32>
    %130 = arith.subf %108, %129 : vector<56x128xf32>
    %131 = arith.mulf %126, %126 : vector<56x128xf32>
    %132 = arith.mulf %128, %128 : vector<56x128xf32>
    %133 = arith.addf %131, %132 : vector<56x128xf32>
    %134 = arith.mulf %130, %130 : vector<56x128xf32>
    %135 = arith.addf %133, %134 : vector<56x128xf32>
    %cst_69 = arith.constant 1.000000e-24 : f32
    %136 = vector.broadcast %cst_69 : f32 to vector<56x128xf32>
    %137 = arith.maximumf %135, %136 : vector<56x128xf32>
    %138 = math.rsqrt %137 : vector<56x128xf32>
    %139 = arith.mulf %126, %138 : vector<56x128xf32>
    %140 = arith.mulf %128, %138 : vector<56x128xf32>
    %141 = arith.mulf %130, %138 : vector<56x128xf32>
    %142 = arith.mulf %118, %141 : vector<56x128xf32>
    %143 = arith.mulf %119, %140 : vector<56x128xf32>
    %144 = arith.subf %142, %143 : vector<56x128xf32>
    %145 = arith.mulf %119, %139 : vector<56x128xf32>
    %146 = arith.mulf %117, %141 : vector<56x128xf32>
    %147 = arith.subf %145, %146 : vector<56x128xf32>
    %148 = arith.mulf %117, %140 : vector<56x128xf32>
    %149 = arith.mulf %118, %139 : vector<56x128xf32>
    %150 = arith.subf %148, %149 : vector<56x128xf32>
    %c127_i32 = arith.constant 127 : i32
    %151 = tpu.dynamic_rotate %117 by %c127_i32 dim 1 : vector<56x128xf32>, i32 -> vector<56x128xf32>
    %152 = arith.mulf %117, %151 : vector<56x128xf32>
    %c127_i32_70 = arith.constant 127 : i32
    %153 = tpu.dynamic_rotate %118 by %c127_i32_70 dim 1 : vector<56x128xf32>, i32 -> vector<56x128xf32>
    %154 = arith.mulf %118, %153 : vector<56x128xf32>
    %155 = arith.addf %152, %154 : vector<56x128xf32>
    %c127_i32_71 = arith.constant 127 : i32
    %156 = tpu.dynamic_rotate %119 by %c127_i32_71 dim 1 : vector<56x128xf32>, i32 -> vector<56x128xf32>
    %157 = arith.mulf %119, %156 : vector<56x128xf32>
    %158 = arith.addf %155, %157 : vector<56x128xf32>
    %c127_i32_72 = arith.constant 127 : i32
    %159 = tpu.dynamic_rotate %139 by %c127_i32_72 dim 1 : vector<56x128xf32>, i32 -> vector<56x128xf32>
    %160 = arith.mulf %139, %159 : vector<56x128xf32>
    %161 = arith.addf %158, %160 : vector<56x128xf32>
    %c127_i32_73 = arith.constant 127 : i32
    %162 = tpu.dynamic_rotate %140 by %c127_i32_73 dim 1 : vector<56x128xf32>, i32 -> vector<56x128xf32>
    %163 = arith.mulf %140, %162 : vector<56x128xf32>
    %164 = arith.addf %161, %163 : vector<56x128xf32>
    %c127_i32_74 = arith.constant 127 : i32
    %165 = tpu.dynamic_rotate %141 by %c127_i32_74 dim 1 : vector<56x128xf32>, i32 -> vector<56x128xf32>
    %166 = arith.mulf %141, %165 : vector<56x128xf32>
    %167 = arith.addf %164, %166 : vector<56x128xf32>
    %c127_i32_75 = arith.constant 127 : i32
    %168 = tpu.dynamic_rotate %144 by %c127_i32_75 dim 1 : vector<56x128xf32>, i32 -> vector<56x128xf32>
    %169 = arith.mulf %144, %168 : vector<56x128xf32>
    %170 = arith.addf %167, %169 : vector<56x128xf32>
    %c127_i32_76 = arith.constant 127 : i32
    %171 = tpu.dynamic_rotate %147 by %c127_i32_76 dim 1 : vector<56x128xf32>, i32 -> vector<56x128xf32>
    %172 = arith.mulf %147, %171 : vector<56x128xf32>
    %173 = arith.addf %170, %172 : vector<56x128xf32>
    %c127_i32_77 = arith.constant 127 : i32
    %174 = tpu.dynamic_rotate %150 by %c127_i32_77 dim 1 : vector<56x128xf32>, i32 -> vector<56x128xf32>
    %175 = arith.mulf %150, %174 : vector<56x128xf32>
    %176 = arith.addf %173, %175 : vector<56x128xf32>
    %cst_78 = arith.constant 1.000000e+00 : f32
    %177 = vector.broadcast %cst_78 : f32 to vector<56x128xf32>
    %178 = arith.subf %176, %177 : vector<56x128xf32>
    %cst_79 = arith.constant 5.000000e-01 : f32
    %179 = vector.broadcast %cst_79 : f32 to vector<56x128xf32>
    %180 = arith.mulf %178, %179 : vector<56x128xf32>
    %cst_80 = arith.constant -1.000000e+00 : f32
    %cst_81 = arith.constant 1.000000e+00 : f32
    %181 = vector.broadcast %cst_80 : f32 to vector<56x128xf32>
    %182 = arith.maximumf %181, %180 : vector<56x128xf32>
    %183 = vector.broadcast %cst_81 : f32 to vector<56x128xf32>
    %184 = arith.minimumf %183, %182 : vector<56x128xf32>
    %185 = math.absf %184 : vector<56x128xf32>
    %cst_82 = arith.constant 1.872930e-02 : f32
    %186 = vector.broadcast %cst_82 : f32 to vector<56x128xf32>
    %187 = arith.mulf %186, %185 : vector<56x128xf32>
    %cst_83 = arith.constant 7.426100e-02 : f32
    %188 = vector.broadcast %cst_83 : f32 to vector<56x128xf32>
    %189 = arith.subf %188, %187 : vector<56x128xf32>
    %190 = arith.mulf %185, %189 : vector<56x128xf32>
    %cst_84 = arith.constant -0.212114394 : f32
    %191 = vector.broadcast %cst_84 : f32 to vector<56x128xf32>
    %192 = arith.addf %191, %190 : vector<56x128xf32>
    %193 = arith.mulf %185, %192 : vector<56x128xf32>
    %cst_85 = arith.constant 1.57072878 : f32
    %194 = vector.broadcast %cst_85 : f32 to vector<56x128xf32>
    %195 = arith.addf %194, %193 : vector<56x128xf32>
    %cst_86 = arith.constant 1.000000e+00 : f32
    %196 = vector.broadcast %cst_86 : f32 to vector<56x128xf32>
    %197 = arith.subf %196, %185 : vector<56x128xf32>
    %cst_87 = arith.constant 0.000000e+00 : f32
    %198 = vector.broadcast %cst_87 : f32 to vector<56x128xf32>
    %199 = arith.maximumf %197, %198 : vector<56x128xf32>
    %200 = math.sqrt %199 : vector<56x128xf32>
    %201 = arith.mulf %200, %195 : vector<56x128xf32>
    %cst_88 = arith.constant 0.000000e+00 : f32
    %202 = vector.broadcast %cst_88 : f32 to vector<56x128xf32>
    %203 = arith.cmpf oge, %184, %202 : vector<56x128xf32>
    %cst_89 = arith.constant 3.14159274 : f32
    %204 = vector.broadcast %cst_89 : f32 to vector<56x128xf32>
    %205 = arith.subf %204, %201 : vector<56x128xf32>
    %206 = arith.select %203, %201, %205 : vector<56x128xi1>, vector<56x128xf32>
    %207 = arith.mulf %206, %206 : vector<56x128xf32>
    %208 = tpu.iota {dimensions = array<i32: 1>} : vector<56x128xi32>
    %c8_i32 = arith.constant 8 : i32
    %209 = vector.broadcast %c8_i32 : i32 to vector<56x128xi32>
    %210 = arith.cmpi slt, %208, %209 : vector<56x128xi32>
    %211 = arith.extui %210 : vector<56x128xi1> to vector<56x128xi32>
    %212 = arith.sitofp %211 : vector<56x128xi32> to vector<56x128xf32>
    %c127_i32_90 = arith.constant 127 : i32
    %213 = tpu.dynamic_rotate %212 by %c127_i32_90 dim 1 : vector<56x128xf32>, i32 -> vector<56x128xf32>
    %214 = arith.mulf %212, %213 : vector<56x128xf32>
    %215 = arith.mulf %207, %214 : vector<56x128xf32>
    %c0_91 = arith.constant 0 : index
    %c0_92 = arith.constant 0 : index
    %216 = vector.load %arg9[%c0_91, %c0_92] : memref<56x1xf32, #tpu.memory_space<vmem>>, vector<56x1xf32>
    %217 = vector.broadcast %216 : vector<56x1xf32> to vector<56x128xf32>
    %218 = arith.mulf %215, %217 : vector<56x128xf32>
    %cst_93 = arith.constant dense<0.000000e+00> : vector<56xf32>
    %219 = vector.multi_reduction <add>, %218, %cst_93 [1] : vector<56x128xf32> to vector<56xf32>
    %220 = vector.shape_cast %219 : vector<56xf32> to vector<56x1xf32>
    %cst_94 = arith.constant dense<0.000000e+00> : vector<1xf32>
    %221 = vector.multi_reduction <add>, %220, %cst_94 [0] : vector<56x1xf32> to vector<1xf32>
    %222 = vector.shape_cast %221 : vector<1xf32> to vector<1x1xf32>
    %c0_95 = arith.constant 0 : index
    %c0_96 = arith.constant 0 : index
    %223 = vector.load %arg12[%c0_95, %c0_96] : memref<1x1xf32, #tpu.memory_space<vmem>>, vector<1x1xf32>
    tpu.vector_store %arg12[%c0_95, %c0_96], %222 {strides = array<i32>} : memref<1x1xf32, #tpu.memory_space<vmem>>, vector<1x1xf32>,
    return
  }
  func.func @transform_0(%arg0: i32) -> (i32, i32) {
    %c0_i32 = arith.constant 0 : i32
    %c0_i32_0 = arith.constant 0 : i32
    return %c0_i32, %arg0 : i32, i32
  }
  func.func @transform_1(%arg0: i32) -> (i32, i32, i32) {
    %c0_i32 = arith.constant 0 : i32
    %c0_i32_0 = arith.constant 0 : i32
    %c0_i32_1 = arith.constant 0 : i32
    return %c0_i32, %c0_i32_0, %arg0 : i32, i32, i32
  }
  func.func @transform_2(%arg0: i32) -> (i32, i32, i32) {
    %c0_i32 = arith.constant 0 : i32
    %c0_i32_0 = arith.constant 0 : i32
    %c0_i32_1 = arith.constant 0 : i32
    return %c0_i32, %c0_i32_0, %arg0 : i32, i32, i32
  }
  func.func @transform_3(%arg0: i32) -> (i32, i32, i32) {
    %c0_i32 = arith.constant 0 : i32
    %c0_i32_0 = arith.constant 0 : i32
    %c0_i32_1 = arith.constant 0 : i32
    return %c0_i32, %c0_i32_0, %arg0 : i32, i32, i32
  }
  func.func @transform_4(%arg0: i32) -> (i32, i32) {
    %c0_i32 = arith.constant 0 : i32
    %c0_i32_0 = arith.constant 0 : i32
    %c0_i32_1 = arith.constant 0 : i32
    return %c0_i32, %c0_i32_0 : i32, i32
  }
  func.func @transform_5(%arg0: i32) -> (i32, i32) {
    %c0_i32 = arith.constant 0 : i32
    %c0_i32_0 = arith.constant 0 : i32
    %c0_i32_1 = arith.constant 0 : i32
    return %c0_i32, %c0_i32_0 : i32, i32
  }
  func.func @transform_6(%arg0: i32) -> (i32, i32) {
    %c0_i32 = arith.constant 0 : i32
    %c0_i32_0 = arith.constant 0 : i32
    %c0_i32_1 = arith.constant 0 : i32
    return %c0_i32, %c0_i32_0 : i32, i32
  }
  func.func @transform_7(%arg0: i32) -> (i32, i32, i32) {
    %c0_i32 = arith.constant 0 : i32
    %c0_i32_0 = arith.constant 0 : i32
    %c0_i32_1 = arith.constant 0 : i32
    %c0_i32_2 = arith.constant 0 : i32
    return %c0_i32, %c0_i32_0, %c0_i32_1 : i32, i32, i32
  }
  func.func @transform_8(%arg0: i32) -> (i32, i32) {
    %c0_i32 = arith.constant 0 : i32
    %c0_i32_0 = arith.constant 0 : i32
    %c0_i32_1 = arith.constant 0 : i32
    return %c0_i32, %c0_i32_0 : i32, i32
  }
  func.func @transform_9(%arg0: i32) -> (i32, i32, i32) {
    %c0_i32 = arith.constant 0 : i32
    %c0_i32_0 = arith.constant 0 : i32
    %c0_i32_1 = arith.constant 0 : i32
    return %arg0, %c0_i32, %c0_i32_0 : i32, i32, i32
  }
  func.func @transform_10(%arg0: i32) -> (i32, i32) {
    %c0_i32 = arith.constant 0 : i32
    %c0_i32_0 = arith.constant 0 : i32
    %c0_i32_1 = arith.constant 0 : i32
    return %c0_i32, %c0_i32_0 : i32, i32
  }
  func.func @transform_11(%arg0: i32) -> (i32, i32) {
    %c0_i32 = arith.constant 0 : i32
    %c0_i32_0 = arith.constant 0 : i32
    %c0_i32_1 = arith.constant 0 : i32
    return %c0_i32, %c0_i32_0 : i32, i32
  }
}

</mosaic_0001>

<bundles_post_ra>
// kernel: tpu_custom_call.1
= control target key start
LH: loop header
LB: loop body
LE: loop exit
PB: predicated region body
PF: predicated region fallthrough
CT: control target
= control target key end

     0   :  { %17 = vsyncpa [#allocation3], 0  ;;  %s4214_s0 = inlined_call_operand.hbm [shape: f32[16,128], index: 0, kind: input, shape index: {}]   ;;  %s4215_s1 = inlined_call_operand.hbm [shape: f32[3,144,128], index: 1, kind: input, shape index: {}]   ;;  %s4216_s2 = inlined_call_operand.hbm [shape: f32[2,144,128], index: 2, kind: input, shape index: {}]   ;;  %s4217_s3 = inlined_call_operand.hbm [shape: f32[1,144,128], index: 3, kind: input, shape index: {}]   ;;  %s4218_s4 = inlined_call_operand.vmem [shape: f32[8,512], index: 4, kind: input, shape index: {}]   ;;  %s4219_s5 = inlined_call_operand.vmem [shape: f32[8,512], index: 5, kind: input, shape index: {}]   ;;  %s4220_s6 = inlined_call_operand.hbm [shape: f32[1,512], index: 6, kind: input, shape index: {}]   ;;  %s4221_s7 = inlined_call_operand.hbm [shape: f32[6,56,128], index: 7, kind: input, shape index: {}]   ;;  %s4222_s8 = inlined_call_operand.vmem [shape: f32[56,1], index: 8, kind: input, shape index: {}]   ;;  %s4223_s9 = inlined_call_operand.hbm [shape: f32[1,1,1], index: 9, kind: output, shape index: {0}]   ;;  %s4224_s10 = inlined_call_operand.hbm [shape: f32[1,1], index: 10, kind: output, shape index: {1}]   ;;  %s4225_s11 = inlined_call_operand.hbm [shape: f32[1,1], index: 11, kind: output, shape index: {2}]  }
   0x1   :  { %18 = vsyncpa [#allocation6], 0 }
   0x2   :  { %19 = vsyncpa [#allocation9], 0 }
   0x3   :  { %20 = vsyncpa [#allocation12], 0 }
   0x4   :  { %21 = vsyncpa [#allocation4], 0 }
   0x5   :  { %22 = vsyncpa [#allocation15], 0  ;;  %s2409_s17 = smov [#allocation5]   ;;  %s2410_s19 = smov [#allocation8]  }
   0x6   :  { %s40_s18 = sshll.u32 %s2409_s17, 4  ;;  %s64_s20 = sshll.u32 %s2410_s19, 4  ;;  %s41_s18 = int_to_ptr.vmem [resolvable:$true] %s40_s18  ;;  %s65_s20 = int_to_ptr.vmem [resolvable:$true] %s64_s20 }
   0x7   :  { %s2225_s21 = scalar_lea.vmem %s41_s18, 6912  ;;  %p2230_p1 = scmp.lt.s32.totalorder %s41_s18, %s41_s18 }
   0x8   :  { %p2226_p0 = scmp.ne.s32.totalorder %s41_s18, %s2225_s21  ;;  %p2231_p2 = scmp.lt.s32.totalorder %s2225_s21, %s2225_s21 }
   0xa   :  { %p2232_p3 = por %p2231_p2, %p2230_p1 }
   0xc   :  { %p2233_p4 = pnand %p2232_p3, %p2226_p0 }
   0xe   :  { %2236 = shalt.err (!%p2233_p4)
}
   0xf   :  { %s2411_s22 = smov 128   ;;  %s2412_s23 = smov 8  }
  0x10   :  { %46 = dma.hbm_to_vmem [thread:$0]  %s4215_s1, 6912, %s41_s18, [#allocation6], %s2411_s22, %s2411_s22, %s2412_s23  }
  0x11   :  { %s2245_s26 = scalar_lea.vmem %s65_s20, 2304  ;;  %p2250_p6 = scmp.lt.s32.totalorder %s65_s20, %s65_s20 }
  0x12   :  { %p2246_p5 = scmp.ne.s32.totalorder %s65_s20, %s2245_s26  ;;  %p2251_p7 = scmp.lt.s32.totalorder %s2245_s26, %s2245_s26 }
  0x14   :  { %p2252_p8 = por %p2251_p7, %p2250_p6 }
  0x16   :  { %p2253_p9 = pnand %p2252_p8, %p2246_p5 }
  0x18   :  { %2256 = shalt.err (!%p2253_p9)
}
  0x19   :  { %70 = dma.hbm_to_vmem [thread:$0]  %s4217_s3, 2304, %s65_s20, [#allocation9], %s2411_s22, %s2411_s22, %s2412_s23  }
  0x1a   :  { %s2413_s29 = smov [#allocation2]   ;;  %s2414_s12 = smov [#allocation7]  }
  0x1b   :  { %s28_s30 = sshll.u32 %s2413_s29, 4  ;;  %s52_s13 = sshll.u32 %s2414_s12, 4  ;;  %s29_s30 = int_to_ptr.vmem [resolvable:$true] %s28_s30  ;;  %s53_s13 = int_to_ptr.vmem [resolvable:$true] %s52_s13 }
  0x1c   :  { %s2265_s1 = scalar_lea.vmem %s29_s30, 256  ;;  %p2270_p11 = scmp.lt.s32.totalorder %s29_s30, %s29_s30 }
  0x1d   :  { %p2266_p10 = scmp.ne.s32.totalorder %s29_s30, %s2265_s1  ;;  %p2271_p12 = scmp.lt.s32.totalorder %s2265_s1, %s2265_s1 }
  0x1f   :  { %p2272_p13 = por %p2271_p12, %p2270_p11 }
  0x21   :  { %p2273_p0 = pnand %p2272_p13, %p2266_p10 }
  0x23   :  { %2276 = shalt.err (!%p2273_p0)
}
  0x24   :  { %34 = dma.hbm_to_vmem [thread:$0]  %s4214_s0, 256, %s29_s30, [#allocation3], %s2411_s22, %s2411_s22, %s2412_s23  }
  0x25   :  { %s2285_s3 = scalar_lea.vmem %s53_s13, 4608  ;;  %p2290_p2 = scmp.lt.s32.totalorder %s53_s13, %s53_s13 }
  0x26   :  { %p2286_p1 = scmp.ne.s32.totalorder %s53_s13, %s2285_s3  ;;  %p2291_p3 = scmp.lt.s32.totalorder %s2285_s3, %s2285_s3 }
  0x28   :  { %p2292_p4 = por %p2291_p3, %p2290_p2 }
  0x2a   :  { %p2293_p5 = pnand %p2292_p4, %p2286_p1 }
  0x2c   :  { %2296 = shalt.err (!%p2293_p5)
}
  0x2d   :  { %58 = dma.hbm_to_vmem [thread:$0]  %s4216_s2, 4608, %s53_s13, [#allocation6], %s2411_s22, %s2411_s22, %s2412_s23  }
  0x2e   :  { %s2415_s18 = smov [#allocation10]   ;;  %s2416_s20 = smov [#allocation11]  }
  0x2f   :  { %s81_s19 = sshll.u32 %s2415_s18, 4  ;;  %s90_s21 = sshll.u32 %s2416_s20, 4  ;;  %s82_s19 = int_to_ptr.vmem [resolvable:$true] %s81_s19  ;;  %s91_s21 = int_to_ptr.vmem [resolvable:$true] %s90_s21 }
  0x30   :  { %s2305_s0 = scalar_lea.vmem %s82_s19, 64  ;;  %p2310_p7 = scmp.lt.s32.totalorder %s82_s19, %s82_s19 }
  0x31   :  { %p2306_p6 = scmp.ne.s32.totalorder %s82_s19, %s2305_s0  ;;  %p2311_p8 = scmp.lt.s32.totalorder %s2305_s0, %s2305_s0 }
  0x33   :  { %p2312_p9 = por %p2311_p8, %p2310_p7 }
  0x35   :  { %p2313_p10 = pnand %p2312_p9, %p2306_p6 }
  0x37   :  { %2316 = shalt.err (!%p2313_p10)
}
  0x38   :  { %84 = dma.hbm_to_vmem [thread:$0]  %s4220_s6, 64, %s82_s19, [#allocation9]  }
  0x39   :  { %s2325_s26 = scalar_lea.vmem %s91_s21, 5376  ;;  %p2330_p12 = scmp.lt.s32.totalorder %s91_s21, %s91_s21 }
  0x3a   :  { %p2326_p11 = scmp.ne.s32.totalorder %s91_s21, %s2325_s26  ;;  %p2331_p13 = scmp.lt.s32.totalorder %s2325_s26, %s2325_s26 }
  0x3c   :  { %p2332_p0 = por %p2331_p13, %p2330_p12 }
  0x3e   :  { %p2333_p1 = pnand %p2332_p0, %p2326_p11 }
  0x40   :  { %2336 = shalt.err (!%p2333_p1)
}
  0x41   :  { %96 = dma.hbm_to_vmem [thread:$0]  %s4221_s7, 5376, %s91_s21, [#allocation12], %s2411_s22, %s2411_s22, %s2412_s23  }
  0x42   :  { %2397 = dma.done.wait [#allocation3], 256  }
  0x43   :  { %2398 = vsyncadd [#allocation3], 4294967040 }
  0x44   :  { %2399 = dma.done.wait [#allocation6], 11520  }
  0x45   :  { %2400 = vsyncadd [#allocation6], 4294955776 }
  0x46   :  { %2401 = dma.done.wait [#allocation9], 2368  }
  0x47   :  { %2402 = vsyncadd [#allocation9], 4294964928 }
  0x48   :  { %2403 = dma.done.wait [#allocation12], 5376  }
  0x49   :  { %2404 = vsyncadd [#allocation12], 4294961920  ;;  %v2516_v0 = vld [vmem:[#allocation11 + $0x8] sm:$0xff]  ;;  %v2518_v1 = vld [vmem:[#allocation11 + $0x40] sm:$0xff]  ;;  %s2417_s6 = smov 127   ;;  %vm1109_vm8 = vcmask 1040384  }
  0x4a   :  { %v2520_v2 = vld [vmem:[#allocation11 + $0x78] sm:$0xff]  ;;  %v1168_v3 = vmul.f32 %v2516_v0, %v2516_v0  ;;  %v1175_v4 = vmul.f32 %v2518_v1, %v2518_v1  ;;  %v2528_v6 = vld [vmem:[#allocation11] sm:$0xff]  ;;  %v2532_v8 = vld [vmem:[#allocation11 + $0x70] sm:$0xff] }
  0x4b   :  { %v1189_v5 = vmul.f32 %v2520_v2, %v2520_v2  ;;  %v2530_v7 = vld [vmem:[#allocation11 + $0x38] sm:$0xff]  ;;  %v1167_v9 = vmul.f32 %v2528_v6, %v2528_v6  ;;  %v1188_v11 = vmul.f32 %v2532_v8, %v2532_v8  ;;  %v2540_v12 = vld [vmem:[#allocation11 + $0x10] sm:$0xff]  ;;  %v2542_v13 = vld [vmem:[#allocation11 + $0x48] sm:$0xff] }
  0x4c   :  { %v1174_v10 = vmul.f32 %v2530_v7, %v2530_v7  ;;  %v2544_v14 = vld [vmem:[#allocation11 + $0x80] sm:$0xff]  ;;  %v1182_v15 = vadd.f32 %v1175_v4, %v1168_v3  ;;  %v1169_v16 = vmul.f32 %v2540_v12, %v2540_v12  ;;  %v1176_v17 = vmul.f32 %v2542_v13, %v2542_v13  ;;  %v2552_v19 = vld [vmem:[#allocation11 + $0x18] sm:$0xff]  ;;  %v2554_v20 = vld [vmem:[#allocation11 + $0x50] sm:$0xff] }
  0x4d   :  { %v1190_v18 = vmul.f32 %v2544_v14, %v2544_v14  ;;  %v2556_v21 = vld [vmem:[#allocation11 + $0x88] sm:$0xff]  ;;  %v1170_v23 = vmul.f32 %v2552_v19, %v2552_v19  ;;  %v1177_v24 = vmul.f32 %v2554_v20, %v2554_v20  ;;  %v2564_v26 = vld [vmem:[#allocation11 + $0x20] sm:$0xff]  ;;  %v2566_v27 = vld [vmem:[#allocation11 + $0x58] sm:$0xff] }
  0x4e   :  { %v1181_v22 = vadd.f32 %v1174_v10, %v1167_v9  ;;  %v1191_v25 = vmul.f32 %v2556_v21, %v2556_v21  ;;  %v1140_v28 = vld [vmem:[#allocation11 + $0x90] sm:$0xff]  ;;  %v1196_v29 = vadd.f32 %v1189_v5, %v1182_v15  ;;  %v1183_v30 = vadd.f32 %v1176_v17, %v1169_v16  ;;  %v117_v36 = vld [vmem:[#allocation5] sm:$0xff]  ;;  %v2572_v37 = vld [vmem:[#allocation2] ss:$0 sm:$0xff] }
  0x4f   :  { %v1171_v31 = vmul.f32 %v2564_v26, %v2564_v26  ;;  %v1178_v32 = vmul.f32 %v2566_v27, %v2566_v27  ;;  %v1184_v34 = vadd.f32 %v1177_v24, %v1170_v23  ;;  %v1192_v35 = vmul.f32 %v1140_v28, %v1140_v28  ;;  %v2574_v38 = vld [vmem:[#allocation2 + $0x1] ss:$0 sm:$0xff]  ;;  %v155_v43 = vld [vmem:[#allocation5 + $0x120] sm:$0xff]  ;;  %v2577_v45 = vld [vmem:[#allocation2 + $0x2] ss:$0 sm:$0xff] }
  0x50   :  { %v1195_v33 = vadd.f32 %v1188_v11, %v1181_v22  ;;  %v1203_v39 = vmax.f32 %v1196_v29, 1e-24  ;;  %v1197_v40 = vadd.f32 %v1190_v18, %v1183_v30  ;;  %v136_v42 = vld [vmem:[#allocation5 + $0x90] sm:$0xff]  ;;  %v196_v44 = vmul.f32 %v2572_v37, %v117_v36  ;;  %v2593_v62 = vld [vmem:[#allocation2 + $0x9] ss:$0 sm:$0xff]  ;;  %v118_v11 = vld [vmem:[#allocation5 + $0x8] sm:$0xff] }
  0x51   :  { %v1185_v41 = vadd.f32 %v1178_v32, %v1171_v31  ;;  %v1198_v47 = vadd.f32 %v1191_v25, %v1184_v34  ;;  %v219_v48 = vmul.f32 %v2574_v38, %v136_v42  ;;  %v260_v49 = vmul.f32 %v2577_v45, %v155_v43  ;;  %v2581_v50 = vld [vmem:[#allocation2 + $0x3] ss:$0 sm:$0xff]  ;;  %v2583_v51 = vld [vmem:[#allocation2 + $0x4] ss:$0 sm:$0xff]  ;;  %v2586_v55 = vld [vmem:[#allocation2 + $0x5] ss:$0 sm:$0xff] }
  0x52   :  { %v1202_v46 = vmax.f32 %v1195_v33, 1e-24  ;;  %2046 = vrsqrt.f32 %v1203_v39  ;;  %v1204_v52 = vmax.f32 %v1197_v40, 1e-24  ;;  %v324_v54 = vmul.f32 %v2581_v50, %v117_v36  ;;  %v2589_v59 = vld [vmem:[#allocation2 + $0x6] ss:$0 sm:$0xff] }
  0x53   :  { %v1199_v53 = vadd.f32 %v1192_v35, %v1185_v41  ;;  %v1205_v56 = vmax.f32 %v1198_v47, 1e-24  ;;  %v237_v57 = vadd.f32 %v219_v48, %v196_v44  ;;  %v347_v58 = vmul.f32 %v2583_v51, %v136_v42  ;;  %v2591_v60 = vld [vmem:[#allocation2 + $0x7] ss:$0 sm:$0xff]  ;;  %v2597_v4 = vld [vmem:[#allocation2 + $0x8] ss:$0 sm:$0xff] }
  0x54   :  { %2048 = vrsqrt.f32 %v1202_v46  ;;  %v388_v63 = vmul.f32 %v2586_v55, %v155_v43  ;;  %v452_v3 = vmul.f32 %v2589_v59, %v117_v36  ;;  %v475_v10 = vmul.f32 %v2591_v60, %v136_v42  ;;  %v2600_v15 = vld [vmem:[#allocation2 + $0xa] ss:$0 sm:$0xff]  ;;  %v156_v28 = vld [vmem:[#allocation5 + $0x128] sm:$0xff]  ;;  %v2609_v30 = vld [vmem:[#allocation2 + $0xb] ss:$0 sm:$0xff] }
  0x55   :  { %2050 = vrsqrt.f32 %v1204_v52  ;;  %v1206_v61 = vmax.f32 %v1199_v53, 1e-24  ;;  %v278_v5 = vadd.f32 %v260_v49, %v237_v57  ;;  %v365_v9 = vadd.f32 %v347_v58, %v324_v54  ;;  %v137_v17 = vld [vmem:[#allocation5 + $0x98] sm:$0xff]  ;;  %v121_v41 = vld [vmem:[#allocation5 + $0x20] sm:$0xff]  ;;  %v140_v42 = vld [vmem:[#allocation5 + $0xb0] sm:$0xff] }
  0x56   :  { %2052 = vrsqrt.f32 %v1205_v56  ;;  %v516_v16 = vmul.f32 %v2597_v4, %v155_v43  ;;  %v197_v18 = vmul.f32 %v2572_v37, %v118_v11  ;;  %v325_v22 = vmul.f32 %v2581_v50, %v118_v11  ;;  %v159_v46 = vld [vmem:[#allocation5 + $0x140] sm:$0xff] }
  0x57   :  { %2054 = vrsqrt.f32 %v1206_v61  ;;  %v2606_v23 = vadd.f32 %v2593_v62, %v278_v5  ;;  %v406_v24 = vadd.f32 %v388_v63, %v365_v9  ;;  %v493_v25 = vadd.f32 %v475_v10, %v452_v3 }
  0x58   :  { %v220_v29 = vmul.f32 %v2574_v38, %v137_v17  ;;  %v261_v31 = vmul.f32 %v2577_v45, %v156_v28  ;;  %v348_v32 = vmul.f32 %v2583_v51, %v137_v17  ;;  %v389_v33 = vmul.f32 %v2586_v55, %v156_v28 }
  0x59   :  { %v453_v34 = vmul.f32 %v2589_v59, %v118_v11  ;;  %v2616_v35 = vadd.f32 %v2600_v15, %v406_v24  ;;  %v534_v36 = vadd.f32 %v516_v16, %v493_v25  ;;  %v476_v40 = vmul.f32 %v2591_v60, %v137_v17 }
  0x5a   :  { %v238_v39 = vadd.f32 %v220_v29, %v197_v18  ;;  %v366_v43 = vadd.f32 %v348_v32, %v325_v22  ;;  %v517_v44 = vmul.f32 %v2597_v4, %v156_v28  ;;  %v200_v47 = vmul.f32 %v2572_v37, %v121_v41 }
  0x5b   :  { %v223_v48 = vmul.f32 %v2574_v38, %v140_v42  ;;  %v557_v49 = vadd.f32 %v2609_v30, %v534_v36  ;;  %v494_v53 = vadd.f32 %v476_v40, %v453_v34  ;;  %v264_v54 = vmul.f32 %v2577_v45, %v159_v46 }
  0x5c   :  { %v279_v52 = vadd.f32 %v261_v31, %v238_v39  ;;  %v407_v56 = vadd.f32 %v389_v33, %v366_v43  ;;  %v328_v58 = vmul.f32 %v2581_v50, %v121_v41  ;;  %v351_v61 = vmul.f32 %v2583_v51, %v140_v42 }
  0x5d   :  { %v241_v57 = vadd.f32 %v223_v48, %v200_v47  ;;  %v575_v63 = vmax.f32 %v557_v49, 1e-05  ;;  %v535_v5 = vadd.f32 %v517_v44, %v494_v53  ;;  %v392_v9 = vmul.f32 %v2586_v55, %v159_v46  ;;  %v142_v47 = vld [vmem:[#allocation5 + $0xc0] sm:$0xff] }
  0x5e   :  { %v2627_v3 = vadd.f32 %v2593_v62, %v279_v52  ;;  %v2631_v10 = vadd.f32 %v2600_v15, %v407_v56  ;;  %v369_v16 = vadd.f32 %v351_v61, %v328_v58  ;;  %v456_v17 = vmul.f32 %v2589_v59, %v121_v41  ;;  %v119_v56 = vld [vmem:[#allocation5 + $0x10] sm:$0xff] }
  0x5f   :  { %v282_v11 = vadd.f32 %v264_v54, %v241_v57  ;;  %v2047_v18 = vpop.eup %2046  ;;  %2056 = vrcp.f32 %v575_v63  ;;  %v558_v22 = vadd.f32 %v2609_v30, %v535_v5  ;;  %v479_v24 = vmul.f32 %v2591_v60, %v140_v42  ;;  %v138_v63 = vld [vmem:[#allocation5 + $0xa0] sm:$0xff]  ;;  %v157_v5 = vld [vmem:[#allocation5 + $0x130] sm:$0xff] }
  0x60   :  { %v520_v25 = vmul.f32 %v2597_v4, %v159_v46  ;;  %v2638_v29 = vmul.f32 %v2047_v18, %v2516_v0  ;;  %v2641_v31 = vmul.f32 %v2047_v18, %v2518_v1  ;;  %v2644_v32 = vmul.f32 %v2047_v18, %v2520_v2 }
  0x61   :  { %v2049_v28 = vpop.eup %2048  ;;  %v2647_v33 = vadd.f32 %v2593_v62, %v282_v11  ;;  %v576_v0 = vmax.f32 %v558_v22, 1e-05  ;;  %v481_v58 = vmul.f32 %v2591_v60, %v142_v47  ;;  %v262_v18 = vmul.f32 %v2577_v45, %v157_v5 }
  0x62   :  { %v2051_v34 = vpop.eup %2050  ;;  %v2650_v36 = vmul.f32 %v2049_v28, %v2528_v6  ;;  %v2653_v39 = vmul.f32 %v2049_v28, %v2530_v7  ;;  %v2656_v40 = vmul.f32 %v2049_v28, %v2532_v8  ;;  %1449 = vrot.lane.b32.xlu1 %v2638_v29, %s2417_s6  ;;  %v410_v7 = vadd.f32 %v392_v9, %v369_v16 }
  0x63   :  { %v2053_v41 = vpop.eup %2052  ;;  %v2661_v1 = vmul.f32 %v2051_v34, %v2540_v12  ;;  %v2664_v2 = vmul.f32 %v2051_v34, %v2542_v13  ;;  %v2667_v6 = vmul.f32 %v2051_v34, %v2544_v14  ;;  %2058 = vrcp.f32 %v576_v0  ;;  %v123_v13 = vld [vmem:[#allocation5 + $0x30] sm:$0xff] }
  0x64   :  { %v2669_v42 = vpop.eup %2054  ;;  %1447 = vrot.lane.b32.xlu0 %v2650_v36, %s2417_s6  ;;  %v2674_v8 = vmul.f32 %v2053_v41, %v2552_v19  ;;  %v2677_v43 = vmul.f32 %v2053_v41, %v2554_v20  ;;  %v2680_v12 = vmul.f32 %v2053_v41, %v2556_v21  ;;  %v2691_v46 = vadd.f32 %v2600_v15, %v410_v7  ;;  %v161_v20 = vld [vmem:[#allocation5 + $0x150] sm:$0xff] }
  0x65   :  { %4282 = vst [vmem:[#allocation23_spill] sm:$0xff] %v2669_v42  ;;  %v2684_v14 = vmul.f32 %v2669_v42, %v2566_v27  ;;  %v2688_v44 = vmul.f32 %v2669_v42, %v2564_v26  ;;  %v497_v19 = vadd.f32 %v479_v24, %v456_v17  ;;  %v202_v48 = vmul.f32 %v2572_v37, %v123_v13 }
  0x66   :  { %4283 = vst [vmem:[#allocation24_spill] sm:$0xff] %v2680_v12  ;;  %v225_v21 = vmul.f32 %v2574_v38, %v142_v47  ;;  %v266_v49 = vmul.f32 %v2577_v45, %v161_v20  ;;  %v330_v52 = vmul.f32 %v2581_v50, %v123_v13  ;;  %1468 = vrot.lane.b32.xlu1 %v2653_v39, %s2417_s6 }
  0x67   :  { %4284 = vst [vmem:[#allocation25_spill] sm:$0xff] %v2684_v14  ;;  %4285 = vst [vmem:[#allocation26_spill] sm:$0xff] %v2688_v44  ;;  %v538_v27 = vadd.f32 %v520_v25, %v497_v19  ;;  %v353_v26 = vmul.f32 %v2583_v51, %v142_v47  ;;  %v394_v53 = vmul.f32 %v2586_v55, %v161_v20 }
  0x68   :  { %v458_v54 = vmul.f32 %v2589_v59, %v123_v13  ;;  %1451 = vrot.lane.b32.xlu0 %v2661_v1, %s2417_s6  ;;  %v243_v57 = vadd.f32 %v225_v21, %v202_v48  ;;  %v522_v61 = vmul.f32 %v2597_v4, %v161_v20  ;;  %v198_v9 = vmul.f32 %v2572_v37, %v119_v56  ;;  %v647_v21 = vld [vmem:[#allocation7] sm:$0xff] }
  0x69   :  { %v561_v11 = vadd.f32 %v2609_v30, %v538_v27  ;;  %v371_v16 = vadd.f32 %v353_v26, %v330_v52  ;;  %v221_v17 = vmul.f32 %v2574_v38, %v138_v63  ;;  %v326_v25 = vmul.f32 %v2581_v50, %v119_v56 }
  0x6a   :  { %v284_v22 = vadd.f32 %v266_v49, %v243_v57  ;;  %v499_v24 = vadd.f32 %v481_v58, %v458_v54  ;;  %v349_v28 = vmul.f32 %v2583_v51, %v138_v63  ;;  %1470 = vrot.lane.b32.xlu1 %v2641_v31, %s2417_s6  ;;  %v390_v7 = vmul.f32 %v2586_v55, %v157_v5  ;;  %v702_v49 = vld [vmem:[#allocation7 + $0x90] sm:$0xff] }
  0x6b   :  { %v579_v34 = vmax.f32 %v561_v11, 1e-05  ;;  %v412_v0 = vadd.f32 %v394_v53, %v371_v16  ;;  %v239_v41 = vadd.f32 %v221_v17, %v198_v9  ;;  %v454_v20 = vmul.f32 %v2589_v59, %v119_v56 }
  0x6c   :  { %1496 = vrot.lane.b32.xlu0 %v2656_v40, %s2417_s6  ;;  %v2718_v13 = vadd.f32 %v2593_v62, %v284_v22  ;;  %v540_v19 = vadd.f32 %v522_v61, %v499_v24  ;;  %v367_v47 = vadd.f32 %v349_v28, %v326_v25  ;;  %v2057_v48 = vpop.eup %2056  ;;  %v477_v26 = vmul.f32 %v2591_v60, %v138_v63  ;;  %v125_v61 = vld [vmem:[#allocation5 + $0x40] sm:$0xff]  ;;  %v648_v25 = vld [vmem:[#allocation7 + $0x8] sm:$0xff]  ;;  %v703_v28 = vld [vmem:[#allocation7 + $0x98] sm:$0xff] }
  0x6d   :  { %2060 = vrcp.f32 %v579_v34  ;;  %v2722_v52 = vadd.f32 %v2600_v15, %v412_v0  ;;  %v280_v27 = vadd.f32 %v262_v18, %v239_v41  ;;  %v629_v53 = vmul.f32 %v2057_v48, %v2606_v23  ;;  %v144_v18 = vld [vmem:[#allocation5 + $0xd0] sm:$0xff]  ;;  %v163_v22 = vld [vmem:[#allocation5 + $0x160] sm:$0xff] }
  0x6e   :  { %v683_v54 = vmul.f32 %v2057_v48, %v2616_v35  ;;  %v563_v57 = vadd.f32 %v2609_v30, %v540_v19  ;;  %v408_v58 = vadd.f32 %v390_v7, %v367_v47  ;;  %1472 = vrot.lane.b32.xlu1 %v2664_v2, %s2417_s6  ;;  %v495_v9 = vadd.f32 %v477_v26, %v454_v20 }
  0x6f   :  { %v2731_v56 = vadd.f32 %v2593_v62, %v280_v27  ;;  %v518_v11 = vmul.f32 %v2597_v4, %v157_v5  ;;  %v204_v16 = vmul.f32 %v2572_v37, %v125_v61  ;;  %v665_v23 = vsub.f32 %v629_v53, %v647_v21 }
  0x70   :  { %1453 = vrot.lane.b32.xlu0 %v2674_v8, %s2417_s6  ;;  %v720_v35 = vsub.f32 %v683_v54, %v702_v49  ;;  %v581_v63 = vmax.f32 %v563_v57, 1e-05  ;;  %v2738_v17 = vadd.f32 %v2600_v15, %v408_v58  ;;  %v2059_v24 = vpop.eup %2058  ;;  %v227_v0 = vmul.f32 %v2574_v38, %v144_v18 }
  0x71   :  { %v536_v34 = vadd.f32 %v518_v11, %v495_v9  ;;  %v268_v5 = vmul.f32 %v2577_v45, %v163_v22  ;;  %v332_v41 = vmul.f32 %v2581_v50, %v125_v61  ;;  %v2743_v7 = vmul.f32 %v665_v23, %v665_v23 }
  0x72   :  { %v2745_v19 = vmul.f32 %v720_v35, %v720_v35  ;;  %v630_v47 = vmul.f32 %v2059_v24, %v2627_v3  ;;  %v684_v20 = vmul.f32 %v2059_v24, %v2631_v10  ;;  %1498 = vrot.lane.b32.xlu1 %v2644_v32, %s2417_s6  ;;  %2062 = vrcp.f32 %v581_v63 }
  0x73   :  { %v559_v48 = vadd.f32 %v2609_v30, %v536_v34  ;;  %v245_v21 = vadd.f32 %v227_v0, %v204_v16  ;;  %v355_v49 = vmul.f32 %v2583_v51, %v144_v18  ;;  %v774_v27 = vadd.f32 10000.0, %v2743_v7  ;;  %v139_v34 = vld [vmem:[#allocation5 + $0xa8] sm:$0xff] }
  0x74   :  { %1500 = vrot.lane.b32.xlu0 %v2667_v6, %s2417_s6  ;;  %v846_v26 = vadd.f32 10000.0, %v2745_v19  ;;  %v666_v53 = vsub.f32 %v630_v47, %v648_v25  ;;  %v721_v3 = vsub.f32 %v684_v20, %v703_v28  ;;  %v396_v58 = vmul.f32 %v2586_v55, %v163_v22  ;;  %v120_v28 = vld [vmem:[#allocation5 + $0x18] sm:$0xff] }
  0x75   :  { %v577_v54 = vmax.f32 %v559_v48, 1e-05  ;;  %v286_v10 = vadd.f32 %v268_v5, %v245_v21  ;;  %v373_v57 = vadd.f32 %v355_v49, %v332_v41  ;;  %2064 = vrcp.f32 %v774_v27  ;;  %v158_v41 = vld [vmem:[#allocation5 + $0x138] sm:$0xff]  ;;  %v651_v48 = vld [vmem:[#allocation7 + $0x20] sm:$0xff]  ;;  %v706_v21 = vld [vmem:[#allocation7 + $0xb0] sm:$0xff] }
  0x76   :  { %v2758_v9 = vmul.f32 %v666_v53, %v666_v53  ;;  %v2760_v11 = vmul.f32 %v721_v3, %v721_v3  ;;  %v460_v16 = vmul.f32 %v2589_v59, %v125_v61  ;;  %1474 = vrot.lane.b32.xlu1 %v2677_v43, %s2417_s6  ;;  %2066 = vrcp.f32 %v846_v26 }
  0x77   :  { %v2766_v23 = vadd.f32 %v2593_v62, %v286_v10  ;;  %v414_v35 = vadd.f32 %v396_v58, %v373_v57  ;;  %v483_v63 = vmul.f32 %v2591_v60, %v144_v18  ;;  %2068 = vrcp.f32 %v577_v54 }
  0x78   :  { %1476 = vrot.lane.b32.xlu0 %v2684_v14, %s2417_s6  ;;  %v775_v24 = vadd.f32 10000.0, %v2758_v9  ;;  %v847_v25 = vadd.f32 10000.0, %v2760_v11  ;;  %v524_v61 = vmul.f32 %v2597_v4, %v163_v22  ;;  %v199_v47 = vmul.f32 %v2572_v37, %v120_v28  ;;  %v2790_v14 = vld [vmem:[#allocation5 + $0x28] sm:$0xff] }
  0x79   :  { %v2775_v0 = vadd.f32 %v2600_v15, %v414_v35  ;;  %v501_v5 = vadd.f32 %v483_v63, %v460_v16  ;;  %v222_v18 = vmul.f32 %v2574_v38, %v139_v34  ;;  %v263_v49 = vmul.f32 %v2577_v45, %v158_v41 }
  0x7a   :  { %v2061_v20 = vpop.eup %2060  ;;  %2070 = vrcp.f32 %v775_v24  ;;  %v327_v27 = vmul.f32 %v2581_v50, %v120_v28  ;;  %v350_v22 = vmul.f32 %v2583_v51, %v139_v34  ;;  %1455 = vrot.lane.b32.xlu1 %v2688_v44, %s2417_s6  ;;  %v391_v57 = vmul.f32 %v2586_v55, %v158_v41 }
  0x7b   :  { %2072 = vrcp.f32 %v847_v25  ;;  %v633_v26 = vmul.f32 %v2061_v20, %v2647_v33  ;;  %v687_v53 = vmul.f32 %v2061_v20, %v2691_v46  ;;  %v542_v3 = vadd.f32 %v524_v61, %v501_v5 }
  0x7c   :  { %v240_v54 = vadd.f32 %v222_v18, %v199_v47  ;;  %v368_v10 = vadd.f32 %v350_v22, %v327_v27  ;;  %v455_v58 = vmul.f32 %v2589_v59, %v120_v28  ;;  %v478_v24 = vmul.f32 %v2591_v60, %v139_v34  ;;  %v2801_v18 = vld [vmem:[#allocation5 + $0xb8] sm:$0xff]  ;;  %v2803_v34 = vld [vmem:[#allocation5 + $0x148] sm:$0xff] }
  0x7d   :  { %v669_v16 = vsub.f32 %v633_v26, %v651_v48  ;;  %v724_v35 = vsub.f32 %v687_v53, %v706_v21  ;;  %v565_v63 = vadd.f32 %v2609_v30, %v542_v3  ;;  %v519_v33 = vmul.f32 %v2597_v4, %v158_v41  ;;  %v653_v48 = vld [vmem:[#allocation7 + $0x30] sm:$0xff]  ;;  %v708_v21 = vld [vmem:[#allocation7 + $0xc0] sm:$0xff] }
  0x7e   :  { %v281_v25 = vadd.f32 %v263_v49, %v240_v54  ;;  %v409_v44 = vadd.f32 %v391_v57, %v368_v10  ;;  %v201_v46 = vmul.f32 %v2572_v37, %v2790_v14  ;;  %1502 = vrot.lane.b32.xlu1 %v2680_v12, %s2417_s6  ;;  %v496_v47 = vadd.f32 %v478_v24, %v455_v58 }
  0x7f   :  { %v2797_v61 = vmul.f32 %v669_v16, %v669_v16  ;;  %v2799_v28 = vmul.f32 %v724_v35, %v724_v35  ;;  %v583_v5 = vmax.f32 %v565_v63, 1e-05  ;;  %v2063_v20 = vpop.eup %2062  ;;  %v224_v27 = vmul.f32 %v2574_v38, %v2801_v18 }
  0x80   :  { %v2806_v41 = vadd.f32 %v2593_v62, %v281_v25  ;;  %v2809_v49 = vadd.f32 %v2600_v15, %v409_v44  ;;  %v265_v22 = vmul.f32 %v2577_v45, %v2803_v34  ;;  %v635_v3 = vmul.f32 %v2063_v20, %v2718_v13 }
  0x81   :  { %v778_v26 = vadd.f32 10000.0, %v2797_v61  ;;  %v850_v53 = vadd.f32 10000.0, %v2799_v28  ;;  %v689_v54 = vmul.f32 %v2063_v20, %v2722_v52  ;;  %2074 = vrcp.f32 %v583_v5  ;;  %v704_v20 = vld [vmem:[#allocation7 + $0xa0] sm:$0xff] }
  0x82   :  { %v537_v10 = vadd.f32 %v519_v33, %v496_v47  ;;  %v242_v57 = vadd.f32 %v224_v27, %v201_v46  ;;  %v329_v44 = vmul.f32 %v2581_v50, %v2790_v14  ;;  %v2065_v58 = vpop.eup %2064  ;;  %v671_v16 = vsub.f32 %v635_v3, %v653_v48  ;;  %v649_v47 = vld [vmem:[#allocation7 + $0x10] sm:$0xff] }
  0x83   :  { %2076 = vrcp.f32 %v778_v26  ;;  %v726_v35 = vsub.f32 %v689_v54, %v708_v21  ;;  %v352_v63 = vmul.f32 %v2583_v51, %v2801_v18  ;;  %v2067_v24 = vpop.eup %2066  ;;  %v810_v25 = vmul.f32 10000.0, %v2065_v58 }
  0x84   :  { %2078 = vrcp.f32 %v850_v53  ;;  %v560_v13 = vadd.f32 %v2609_v30, %v537_v10  ;;  %v283_v42 = vadd.f32 %v265_v22, %v242_v57  ;;  %v2069_v52 = vpop.eup %2068  ;;  %v882_v5 = vmul.f32 10000.0, %v2067_v24 }
  0x85   :  { %v2824_v33 = vmul.f32 %v671_v16, %v671_v16  ;;  %v2826_v46 = vmul.f32 %v726_v35, %v726_v35  ;;  %v370_v27 = vadd.f32 %v352_v63, %v329_v44  ;;  %v828_v48 = vmul.f32 %v810_v25, %v2743_v7  ;;  %v173_v16 = vld [vmem:[#allocation8] sm:$0xff] }
  0x86   :  { %v631_v21 = vmul.f32 %v2069_v52, %v2731_v56  ;;  %v685_v26 = vmul.f32 %v2069_v52, %v2738_v17  ;;  %v578_v3 = vmax.f32 %v560_v13, 1e-05  ;;  %v900_v54 = vmul.f32 %v882_v5, %v2745_v19 }
  0x87   :  { %v2071_v53 = vpop.eup %2070  ;;  %v780_v22 = vadd.f32 10000.0, %v2824_v33  ;;  %v852_v10 = vadd.f32 10000.0, %v2826_v46  ;;  %v2835_v57 = vadd.f32 %v2593_v62, %v283_v42  ;;  %v393_v17 = vmul.f32 %v2586_v55, %v2803_v34 }
  0x88   :  { %v2073_v58 = vpop.eup %2072  ;;  %v811_v44 = vmul.f32 10000.0, %v2071_v53  ;;  %v667_v35 = vsub.f32 %v631_v21, %v649_v47  ;;  %v722_v7 = vsub.f32 %v685_v26, %v704_v20  ;;  %2080 = vrcp.f32 %v578_v3  ;;  %v174_v47 = vld [vmem:[#allocation8 + $0x8] sm:$0xff]  ;;  %v143_v3 = vld [vmem:[#allocation5 + $0xc8] sm:$0xff] }
  0x89   :  { %v918_v56 = vadd.f32 %v900_v54, %v828_v48  ;;  %v883_v63 = vmul.f32 10000.0, %v2073_v58  ;;  %2082 = vrcp.f32 %v780_v22  ;;  %v411_v52 = vadd.f32 %v393_v17, %v370_v27  ;;  %v124_v26 = vld [vmem:[#allocation5 + $0x38] sm:$0xff] }
  0x8a   :  { %v829_v19 = vmul.f32 %v811_v44, %v2758_v9  ;;  %2084 = vrcp.f32 %v852_v10  ;;  %v2840_v24 = vmul.f32 %v667_v35, %v667_v35  ;;  %v2842_v25 = vmul.f32 %v722_v7, %v722_v7  ;;  %v162_v27 = vld [vmem:[#allocation5 + $0x158] sm:$0xff]  ;;  %v710_v44 = vld [vmem:[#allocation7 + $0xd0] sm:$0xff] }
  0x8b   :  { %v2844_v42 = vmul.f32 %v918_v56, %v173_v16  ;;  %v901_v13 = vmul.f32 %v883_v63, %v2760_v11  ;;  %v457_v5 = vmul.f32 %v2589_v59, %v2790_v14  ;;  %v480_v9 = vmul.f32 %v2591_v60, %v2801_v18 }
  0x8c   :  { %v776_v20 = vadd.f32 10000.0, %v2840_v24  ;;  %v848_v48 = vadd.f32 10000.0, %v2842_v25  ;;  %v521_v21 = vmul.f32 %v2597_v4, %v2803_v34  ;;  %v2856_v11 = vadd.f32 %v2600_v15, %v411_v52  ;;  %v655_v34 = vld [vmem:[#allocation7 + $0x40] sm:$0xff] }
  0x8d   :  { %v919_v53 = vadd.f32 %v901_v13, %v829_v19  ;;  %v203_v14 = vmul.f32 %v2572_v37, %v124_v26  ;;  %v226_v54 = vmul.f32 %v2574_v38, %v143_v3  ;;  %v498_v22 = vadd.f32 %v480_v9, %v457_v5 }
  0x8e   :  { %2086 = vrcp.f32 %v776_v20  ;;  %v267_v10 = vmul.f32 %v2577_v45, %v162_v27  ;;  %v331_v18 = vmul.f32 %v2581_v50, %v124_v26  ;;  %v2075_v58 = vpop.eup %2074  ;;  %v354_v7 = vmul.f32 %v2583_v51, %v143_v3 }
  0x8f   :  { %v937_v16 = vmul.f32 %v919_v53, %v174_v47  ;;  %2088 = vrcp.f32 %v848_v48  ;;  %v244_v35 = vadd.f32 %v226_v54, %v203_v14  ;;  %v637_v63 = vmul.f32 %v2075_v58, %v2766_v23 }
  0x90   :  { %v2077_v56 = vpop.eup %2076  ;;  %v691_v17 = vmul.f32 %v2075_v58, %v2775_v0  ;;  %v539_v19 = vadd.f32 %v521_v21, %v498_v22  ;;  %v395_v13 = vmul.f32 %v2586_v55, %v162_v27  ;;  %v372_v9 = vadd.f32 %v354_v7, %v331_v18  ;;  %v126_v18 = vld [vmem:[#allocation5 + $0x48] sm:$0xff] }
  0x91   :  { %v2079_v52 = vpop.eup %2078  ;;  %v814_v5 = vmul.f32 10000.0, %v2077_v56  ;;  %v285_v20 = vadd.f32 %v267_v10, %v244_v35  ;;  %v459_v47 = vmul.f32 %v2589_v59, %v124_v26  ;;  %v673_v53 = vsub.f32 %v637_v63, %v655_v34  ;;  %v650_v35 = vld [vmem:[#allocation7 + $0x18] sm:$0xff] }
  0x92   :  { %v886_v48 = vmul.f32 10000.0, %v2079_v52  ;;  %v728_v12 = vsub.f32 %v691_v17, %v710_v44  ;;  %v562_v14 = vadd.f32 %v2609_v30, %v539_v19  ;;  %v413_v0 = vadd.f32 %v395_v13, %v372_v9  ;;  %v177_v44 = vld [vmem:[#allocation8 + $0x20] sm:$0xff]  ;;  %v705_v13 = vld [vmem:[#allocation7 + $0xa8] sm:$0xff] }
  0x93   :  { %v832_v54 = vmul.f32 %v814_v5, %v2797_v61  ;;  %v2870_v23 = vadd.f32 %v2593_v62, %v285_v20  ;;  %v482_v21 = vmul.f32 %v2591_v60, %v143_v3  ;;  %v2874_v58 = vmul.f32 %v673_v53, %v673_v53 }
  0x94   :  { %v904_v22 = vmul.f32 %v886_v48, %v2799_v28  ;;  %v2876_v10 = vmul.f32 %v728_v12, %v728_v12  ;;  %v580_v26 = vmax.f32 %v562_v14, 1e-05  ;;  %v2879_v7 = vadd.f32 %v2600_v15, %v413_v0 }
  0x95   :  { %v2081_v34 = vpop.eup %2080  ;;  %v500_v61 = vadd.f32 %v482_v21, %v459_v47  ;;  %v523_v56 = vmul.f32 %v2597_v4, %v162_v27  ;;  %v205_v63 = vmul.f32 %v2572_v37, %v126_v18  ;;  %v782_v28 = vadd.f32 10000.0, %v2874_v58 }
  0x96   :  { %v2083_v3 = vpop.eup %2082  ;;  %v922_v17 = vadd.f32 %v904_v22, %v832_v54  ;;  %v854_v12 = vadd.f32 10000.0, %v2876_v10  ;;  %v632_v19 = vmul.f32 %v2081_v34, %v2806_v41  ;;  %v686_v20 = vmul.f32 %v2081_v34, %v2809_v49  ;;  %v145_v41 = vld [vmem:[#allocation5 + $0xd8] sm:$0xff]  ;;  %v164_v54 = vld [vmem:[#allocation5 + $0x168] sm:$0xff] }
  0x97   :  { %v2085_v52 = vpop.eup %2084  ;;  %954 = vadd.xlane.f32.xlu0 %v2844_v42  ;;  %v816_v5 = vmul.f32 10000.0, %v2083_v3  ;;  %2090 = vrcp.f32 %v580_v26  ;;  %v541_v9 = vadd.f32 %v523_v56, %v500_v61  ;;  %v228_v49 = vmul.f32 %v2574_v38, %v145_v41  ;;  %v179_v26 = vld [vmem:[#allocation8 + $0x30] sm:$0xff] }
  0x98   :  { %v940_v27 = vmul.f32 %v922_v17, %v177_v44  ;;  %v888_v47 = vmul.f32 10000.0, %v2085_v52  ;;  %2092 = vrcp.f32 %v782_v28  ;;  %v668_v37 = vsub.f32 %v632_v19, %v650_v35 }
  0x99   :  { %v834_v48 = vmul.f32 %v816_v5, %v2824_v33  ;;  %2094 = vrcp.f32 %v854_v12  ;;  %v723_v53 = vsub.f32 %v686_v20, %v705_v13  ;;  %v564_v14 = vadd.f32 %v2609_v30, %v541_v9  ;;  %v2904_v13 = vld [vmem:[#allocation11 + $0xe8] sm:$0xff]  ;;  %v2911_v20 = vld [vmem:[#allocation11 + $0xb8] sm:$0xff]  ;;  %v2913_v9 = vld [vmem:[#allocation11 + $0xf0] sm:$0xff] }
  0x9a   :  { %v906_v0 = vmul.f32 %v888_v47, %v2826_v46  ;;  %v2891_v42 = vmul.f32 %v668_v37, %v668_v37  ;;  %v269_v21 = vmul.f32 %v2577_v45, %v164_v54  ;;  %v333_v44 = vmul.f32 %v2581_v50, %v126_v18  ;;  %v2915_v47 = vld [vmem:[#allocation11 + $0x128] sm:$0xff] }
  0x9b   :  { %v2087_v22 = vpop.eup %2086  ;;  %956 = vadd.xlane.f32.xlu0 %v937_v16  ;;  %v2895_v34 = vmul.f32 %v723_v53, %v723_v53  ;;  %v582_v33 = vmax.f32 %v564_v14, 1e-05  ;;  %v356_v35 = vmul.f32 %v2583_v51, %v145_v41  ;;  %v246_v17 = vadd.f32 %v228_v49, %v205_v63  ;;  %v2901_v16 = vld [vmem:[#allocation11 + $0xb0] sm:$0xff]  ;;  %v2906_v51 = vld [vmem:[#allocation11 + $0x120] sm:$0xff]  ;;  %v2940_v49 = vld [vmem:[#allocation11 + $0x28] sm:$0xff] }
  0x9c   :  { %v2089_v61 = vpop.eup %2088  ;;  %v924_v56 = vadd.f32 %v906_v0, %v834_v48  ;;  %v812_v3 = vmul.f32 10000.0, %v2087_v22  ;;  %v777_v46 = vadd.f32 10000.0, %v2891_v42  ;;  %v397_v63 = vmul.f32 %v2586_v55, %v164_v54  ;;  %v2924_v55 = vld [vmem:[#allocation11 + $0xa8] sm:$0xff]  ;;  %v2930_v0 = vld [vmem:[#allocation11 + $0xe0] sm:$0xff] }
  0x9d   :  { %v884_v28 = vmul.f32 10000.0, %v2089_v61  ;;  %v849_v38 = vadd.f32 10000.0, %v2895_v34  ;;  %2096 = vrcp.f32 %v582_v33  ;;  %v374_v45 = vadd.f32 %v356_v35, %v333_v44  ;;  %v652_v35 = vld [vmem:[#allocation7 + $0x28] sm:$0xff]  ;;  %v707_v61 = vld [vmem:[#allocation7 + $0xb8] sm:$0xff] }
  0x9e   :  { %v942_v12 = vmul.f32 %v924_v56, %v179_v26  ;;  %v830_v19 = vmul.f32 %v812_v3, %v2840_v24  ;;  %2098 = vrcp.f32 %v777_v46  ;;  %v287_v50 = vadd.f32 %v269_v21, %v246_v17  ;;  %v175_v24 = vld [vmem:[#allocation8 + $0x10] sm:$0xff] }
  0x9f   :  { %962 = vadd.xlane.f32.xlu0 %v940_v27  ;;  %v902_v52 = vmul.f32 %v884_v28, %v2842_v25  ;;  %2100 = vrcp.f32 %v849_v38  ;;  %v461_v5 = vmul.f32 %v2589_v59, %v126_v18  ;;  %v484_v48 = vmul.f32 %v2591_v60, %v145_v41 }
  0xa0   :  { %v2918_v37 = vadd.f32 %v2593_v62, %v287_v50  ;;  %v525_v27 = vmul.f32 %v2597_v4, %v164_v54  ;;  %v1238_v25 = vmul.f32 %v2638_v29, %v2901_v16  ;;  %v415_v18 = vadd.f32 %v397_v63, %v374_v45  ;;  %v2932_v62 = vld [vmem:[#allocation11 + $0x118] sm:$0xff] }
  0xa1   :  { %v920_v59 = vadd.f32 %v902_v52, %v830_v19  ;;  %v1245_v53 = vmul.f32 %v2641_v31, %v2904_v13  ;;  %v1259_v14 = vmul.f32 %v2644_v32, %v2906_v51  ;;  %v502_v60 = vadd.f32 %v484_v48, %v461_v5 }
  0xa2   :  { %v1239_v4 = vmul.f32 %v2661_v1, %v2911_v20  ;;  %v1246_v41 = vmul.f32 %v2664_v2, %v2913_v9  ;;  %v1260_v54 = vmul.f32 %v2667_v6, %v2915_v47  ;;  %v2943_v22 = vadd.f32 %v2600_v15, %v415_v18 }
  0xa3   :  { %966 = vadd.xlane.f32.xlu0 %v942_v12  ;;  %v938_v21 = vmul.f32 %v920_v59, %v175_v24  ;;  %v1252_v26 = vadd.f32 %v1245_v53, %v1238_v25  ;;  %v1237_v33 = vmul.f32 %v2650_v36, %v2924_v55  ;;  %v543_v56 = vadd.f32 %v525_v27, %v502_v60 }
  0xa4   :  { %v2091_v44 = vpop.eup %2090  ;;  %v1253_v3 = vadd.f32 %v1246_v41, %v1239_v4  ;;  %v1244_v46 = vmul.f32 %v2653_v39, %v2930_v0  ;;  %v1258_v17 = vmul.f32 %v2656_v40, %v2932_v62  ;;  %v2955_v12 = vmul.f32 %v2940_v49, %v2940_v49  ;;  %v181_v41 = vld [vmem:[#allocation8 + $0x40] sm:$0xff] }
  0xa5   :  { %v2093_v28 = vpop.eup %2092  ;;  %958 = vadd.xlane.f32.xlu1 %v938_v21  ;;  %v634_v15 = vmul.f32 %v2091_v44, %v2835_v57  ;;  %v688_v38 = vmul.f32 %v2091_v44, %v2856_v11  ;;  %v1266_v45 = vadd.f32 %v1259_v14, %v1252_v26  ;;  %v566_v52 = vadd.f32 %v2609_v30, %v543_v56 }
  0xa6   :  { %v2095_v19 = vpop.eup %2094  ;;  %v818_v50 = vmul.f32 10000.0, %v2093_v28  ;;  %v1267_v63 = vadd.f32 %v1260_v54, %v1253_v3  ;;  %v1251_v5 = vadd.f32 %v1244_v46, %v1237_v33  ;;  %v654_v54 = vld [vmem:[#allocation7 + $0x38] sm:$0xff] }
  0xa7   :  { %v890_v24 = vmul.f32 10000.0, %v2095_v19  ;;  %v670_v48 = vsub.f32 %v634_v15, %v652_v35  ;;  %v725_v27 = vsub.f32 %v688_v38, %v707_v61  ;;  %v1273_v25 = vmul.f32 %v1266_v45, %v2638_v29  ;;  %v709_v61 = vld [vmem:[#allocation7 + $0xc8] sm:$0xff] }
  0xa8   :  { %v836_v57 = vmul.f32 %v818_v50, %v2874_v58  ;;  %v584_v59 = vmax.f32 %v566_v52, 1e-05  ;;  %v1287_v11 = vmul.f32 %v1266_v45, %v2641_v31  ;;  %v1301_v18 = vmul.f32 %v1266_v45, %v2644_v32 }
  0xa9   :  { %v908_v53 = vmul.f32 %v890_v24, %v2876_v10  ;;  %v2963_v14 = vmul.f32 %v670_v48, %v670_v48  ;;  %v2965_v60 = vmul.f32 %v725_v27, %v725_v27  ;;  %v2968_v30 = vsub.f32 %v2901_v16, %v1273_v25  ;;  %v176_v48 = vld [vmem:[#allocation8 + $0x18] sm:$0xff] }
  0xaa   :  { %v2097_v4 = vpop.eup %2096  ;;  %2102 = vrcp.f32 %v584_v59  ;;  %v2971_v58 = vsub.f32 %v2904_v13, %v1287_v11  ;;  %v2974_v21 = vsub.f32 %v2906_v51, %v1301_v18  ;;  %v1274_v26 = vmul.f32 %v1267_v63, %v2661_v1 }
  0xab   :  { %v2099_v10 = vpop.eup %2098  ;;  %v926_v33 = vadd.f32 %v908_v53, %v836_v57  ;;  %v779_v44 = vadd.f32 10000.0, %v2963_v14  ;;  %v851_v35 = vadd.f32 10000.0, %v2965_v60  ;;  %v636_v16 = vmul.f32 %v2097_v4, %v2870_v23 }
  0xac   :  { %v2101_v56 = vpop.eup %2100  ;;  %v813_v3 = vmul.f32 10000.0, %v2099_v10  ;;  %v690_v46 = vmul.f32 %v2097_v4, %v2879_v7  ;;  %v1315_v13 = vmul.f32 %v2968_v30, %v2968_v30  ;;  %v1322_v51 = vmul.f32 %v2971_v58, %v2971_v58  ;;  %v1147_v10 = vld [vmem:[#allocation11 + $0xc0] sm:$0xff] }
  0xad   :  { %v944_v28 = vmul.f32 %v926_v33, %v181_v41  ;;  %v885_v15 = vmul.f32 10000.0, %v2101_v56  ;;  %2104 = vrcp.f32 %v779_v44  ;;  %v672_v38 = vsub.f32 %v636_v16, %v654_v54  ;;  %v3009_v54 = vld [vmem:[#allocation11 + $0x60] sm:$0xff]  ;;  %v1155_v44 = vld [vmem:[#allocation11 + $0xf8] sm:$0xff]  ;;  %v1163_v56 = vld [vmem:[#allocation11 + $0x130] sm:$0xff] }
  0xae   :  { %v831_v45 = vmul.f32 %v813_v3, %v2891_v42  ;;  %2106 = vrcp.f32 %v851_v35  ;;  %v727_v19 = vsub.f32 %v690_v46, %v709_v61  ;;  %v1329_v23 = vadd.f32 %v1322_v51, %v1315_v13  ;;  %v656_v51 = vld [vmem:[#allocation7 + $0x48] sm:$0xff] }
  0xaf   :  { %970 = vadd.xlane.f32.xlu0 %v944_v28  ;;  %v903_v50 = vmul.f32 %v885_v15, %v2895_v34  ;;  %v2987_v52 = vmul.f32 %v672_v38, %v672_v38  ;;  %v1336_v7 = vmul.f32 %v2974_v21, %v2974_v21  ;;  %v2992_v24 = vsub.f32 %v2911_v20, %v1274_v26  ;;  %v3012_v26 = vld [vmem:[#allocation11 + $0x98] sm:$0xff]  ;;  %v711_v28 = vld [vmem:[#allocation7 + $0xd8] sm:$0xff] }
  0xb0   :  { %v2994_v27 = vmul.f32 %v727_v19, %v727_v19  ;;  %v1288_v25 = vmul.f32 %v1267_v63, %v2664_v2  ;;  %v1302_v42 = vmul.f32 %v1267_v63, %v2667_v6  ;;  %v1265_v57 = vadd.f32 %v1258_v17, %v1251_v5 }
  0xb1   :  { %v921_v59 = vadd.f32 %v903_v50, %v831_v45  ;;  %v781_v11 = vadd.f32 10000.0, %v2987_v52  ;;  %v1343_v34 = vadd.f32 %v1336_v7, %v1329_v23  ;;  %v1316_v18 = vmul.f32 %v2992_v24, %v2992_v24  ;;  %v4286_v7 = vld [vmem:[#allocation24_spill] sm:$0xff] }
  0xb2   :  { %v853_v53 = vadd.f32 10000.0, %v2994_v27  ;;  %v3003_v20 = vsub.f32 %v2913_v9, %v1288_v25  ;;  %v3006_v4 = vsub.f32 %v2915_v47, %v1302_v42  ;;  %v1272_v41 = vmul.f32 %v1265_v57, %v2650_v36 }
  0xb3   :  { %v939_v17 = vmul.f32 %v921_v59, %v176_v48  ;;  %2108 = vrcp.f32 %v781_v11  ;;  %v1350_v63 = vmax.f32 %v1343_v34, 1e-24  ;;  %v1286_v5 = vmul.f32 %v1265_v57, %v2653_v39 }
  0xb4   :  { %2110 = vrcp.f32 %v853_v53  ;;  %v1323_v9 = vmul.f32 %v3003_v20, %v3003_v20  ;;  %v1337_v47 = vmul.f32 %v3006_v4, %v3006_v4  ;;  %v3019_v33 = vsub.f32 %v2924_v55, %v1272_v41 }
  0xb5   :  { %960 = vadd.xlane.f32.xlu1 %v939_v17  ;;  %2112 = vrsqrt.f32 %v1350_v63  ;;  %v3022_v35 = vsub.f32 %v2930_v0, %v1286_v5  ;;  %v1300_v16 = vmul.f32 %v1265_v57, %v2656_v40  ;;  %v1179_v61 = vmul.f32 %v3009_v54, %v3009_v54 }
  0xb6   :  { %v1330_v3 = vadd.f32 %v1323_v9, %v1316_v18  ;;  %v1193_v46 = vmul.f32 %v3012_v26, %v3012_v26  ;;  %v1240_v13 = vmul.f32 %v2674_v8, %v1147_v10  ;;  %v1314_v15 = vmul.f32 %v3019_v33, %v3019_v33  ;;  %v3046_v9 = vld [vmem:[#allocation11 + $0x30] sm:$0xff] }
  0xb7   :  { %v2103_v55 = vpop.eup %2102  ;;  %v1321_v0 = vmul.f32 %v3022_v35, %v3022_v35  ;;  %v1186_v38 = vadd.f32 %v1179_v61, %v2955_v12  ;;  %v1247_v45 = vmul.f32 %v2677_v43, %v1155_v44  ;;  %v1261_v48 = vmul.f32 %v4286_v7, %v1163_v56  ;;  %v3052_v61 = vld [vmem:[#allocation11 + $0x68] sm:$0xff] }
  0xb8   :  { %v638_v19 = vmul.f32 %v2103_v55, %v2918_v37  ;;  %v692_v23 = vmul.f32 %v2103_v55, %v2943_v22  ;;  %v1344_v50 = vadd.f32 %v1337_v47, %v1330_v3  ;;  %v3040_v25 = vsub.f32 %v2932_v62, %v1300_v16 }
  0xb9   :  { %v1200_v42 = vadd.f32 %v1193_v46, %v1186_v38  ;;  %v1254_v57 = vadd.f32 %v1247_v45, %v1240_v13  ;;  %v1328_v41 = vadd.f32 %v1321_v0, %v1314_v15  ;;  %v2204_v15 = vld [vmem:[#allocation11 + $0x90] sm:$0xff]  ;;  %v1173_v45 = vmul.f32 %v3046_v9, %v3046_v9 }
  0xba   :  { %v2105_v59 = vpop.eup %2104  ;;  %v674_v11 = vsub.f32 %v638_v19, %v656_v51  ;;  %v729_v34 = vsub.f32 %v692_v23, %v711_v28  ;;  %v1351_v18 = vmax.f32 %v1344_v50, 1e-24  ;;  %v1335_v47 = vmul.f32 %v3040_v25, %v3040_v25  ;;  %v178_v51 = vld [vmem:[#allocation8 + $0x28] sm:$0xff] }
  0xbb   :  { %v2107_v53 = vpop.eup %2106  ;;  %v815_v12 = vmul.f32 10000.0, %v2105_v59  ;;  %v1207_v17 = vmax.f32 %v1200_v42, 1e-24  ;;  %v1268_v63 = vadd.f32 %v1261_v48, %v1254_v57  ;;  %v4287_v0 = vld [vmem:[#allocation23_spill] sm:$0xff]  ;;  %v1180_v50 = vmul.f32 %v3052_v61, %v3052_v61  ;;  %v3074_v59 = vld [vmem:[#allocation11 + $0xa0] sm:$0xff] }
  0xbc   :  { %v887_v37 = vmul.f32 10000.0, %v2107_v53  ;;  %v3042_v5 = vmul.f32 %v674_v11, %v674_v11  ;;  %v3044_v22 = vmul.f32 %v729_v34, %v729_v34  ;;  %2114 = vrsqrt.f32 %v1351_v18 }
  0xbd   :  { %v833_v62 = vmul.f32 %v815_v12, %v2963_v14  ;;  %2116 = vrsqrt.f32 %v1207_v17  ;;  %v1275_v16 = vmul.f32 %v1268_v63, %v2674_v8  ;;  %v1289_v55 = vmul.f32 %v1268_v63, %v2677_v43  ;;  %v1148_v12 = vld [vmem:[#allocation11 + $0xc8] sm:$0xff]  ;;  %v1156_v17 = vld [vmem:[#allocation11 + $0x100] sm:$0xff] }
  0xbe   :  { %v905_v3 = vmul.f32 %v887_v37, %v2965_v60  ;;  %v783_v46 = vadd.f32 10000.0, %v3042_v5  ;;  %v855_v13 = vadd.f32 10000.0, %v3044_v22  ;;  %v1303_v14 = vmul.f32 %v1268_v63, %v4286_v7  ;;  %v1164_v63 = vld [vmem:[#allocation11 + $0x138] sm:$0xff] }
  0xbf   :  { %v3058_v28 = vsub.f32 %v1147_v10, %v1275_v16  ;;  %v3062_v38 = vmul.f32 %v2204_v15, %v4287_v0  ;;  %v3066_v23 = vsub.f32 %v1155_v44, %v1289_v55  ;;  %v1187_v53 = vadd.f32 %v1180_v50, %v1173_v45 }
  0xc0   :  { %v2109_v19 = vpop.eup %2108  ;;  %v923_v60 = vadd.f32 %v905_v3, %v833_v62  ;;  %2118 = vrcp.f32 %v783_v46  ;;  %v3070_v42 = vsub.f32 %v1163_v56, %v1303_v14  ;;  %v1342_v62 = vadd.f32 %v1335_v47, %v1328_v41  ;;  %v4292_v41 = vld [vmem:[#allocation25_spill] sm:$0xff] }
  0xc1   :  { %4288 = vst [vmem:[#allocation24_spill] sm:$0xff] %v3062_v38  ;;  %v2111_v48 = vpop.eup %2110  ;;  %v817_v10 = vmul.f32 10000.0, %v2109_v19  ;;  %2120 = vrcp.f32 %v855_v13  ;;  %v1317_v57 = vmul.f32 %v3058_v28, %v3058_v28  ;;  %v1324_v44 = vmul.f32 %v3066_v23, %v3066_v23 }
  0xc2   :  { %v2113_v11 = vpop.eup %2112  ;;  %v941_v34 = vmul.f32 %v923_v60, %v178_v51  ;;  %v889_v18 = vmul.f32 10000.0, %v2111_v48  ;;  %v1338_v16 = vmul.f32 %v3070_v42, %v3070_v42  ;;  %v1194_v13 = vmul.f32 %v3074_v59, %v3074_v59  ;;  %v180_v51 = vld [vmem:[#allocation8 + $0x38] sm:$0xff] }
  0xc3   :  { %v835_v37 = vmul.f32 %v817_v10, %v2987_v52  ;;  %v3080_v56 = vmul.f32 %v2113_v11, %v2968_v30  ;;  %v1331_v46 = vadd.f32 %v1324_v44, %v1317_v57  ;;  %v3088_v55 = vmul.f32 %v2113_v11, %v2974_v21  ;;  %v4291_v30 = vld [vmem:[#allocation26_spill] sm:$0xff] }
  0xc4   :  { %964 = vadd.xlane.f32.xlu1 %v941_v34  ;;  %v907_v3 = vmul.f32 %v889_v18, %v2994_v27  ;;  %v1241_v52 = vmul.f32 %v4291_v30, %v1148_v12  ;;  %v1248_v47 = vmul.f32 %v4292_v41, %v1156_v17  ;;  %v1262_v14 = vmul.f32 %v3062_v38, %v1164_v63  ;;  %v1149_v18 = vld [vmem:[#allocation11 + $0xd0] sm:$0xff] }
  0xc5   :  { %4289 = vst [vmem:[#allocation23_spill] sm:$0xff] %v3080_v56  ;;  %4290 = vst [vmem:[#allocation27_spill] sm:$0xff] %v3088_v55  ;;  %1526 = vrot.lane.b32.xlu0 %v3080_v56, %s2417_s6  ;;  %v1345_v0 = vadd.f32 %v1338_v16, %v1331_v46  ;;  %v1201_v27 = vadd.f32 %v1194_v13, %v1187_v53  ;;  %v1349_v60 = vmax.f32 %v1342_v62, 1e-24  ;;  %v2418_v44 = vmov 0   ;;  %v1157_v16 = vld [vmem:[#allocation11 + $0x108] sm:$0xff] }
  0xc6   :  { %v925_v15 = vadd.f32 %v907_v3, %v835_v37  ;;  %v1255_v45 = vadd.f32 %v1248_v47, %v1241_v52  ;;  %2045 = vset.pattern.permute.xlu0 %v2418_v44  ;;  %2044 = vset.pattern.permute.xlu1 %v2418_v44  ;;  %v3107_v37 = vmul.f32 %v2113_v11, %v2971_v58  ;;  %v1165_v47 = vld [vmem:[#allocation11 + $0x140] sm:$0xff] }
  0xc7   :  { %v1352_v50 = vmax.f32 %v1345_v0, 1e-24  ;;  %v1208_v48 = vmax.f32 %v1201_v27, 1e-24 }
  0xc8   :  { %v943_v19 = vmul.f32 %v925_v15, %v180_v51  ;;  %v1269_v10 = vadd.f32 %v1262_v14, %v1255_v45  ;;  %4295 = vst [vmem:[#allocation28_spill] sm:$0xff] %v3107_v37 }
  0xc9   :  { %v3095_v21 = vpop.eup %2114  ;;  %2122 = vrsqrt.f32 %v1352_v50 }
  0xca   :  { %v2117_v57 = vpop.eup %2116  ;;  %968 = vadd.xlane.f32.xlu1 %v943_v19  ;;  %v3099_v34 = vmul.f32 %v3095_v21, %v2992_v24  ;;  %2124 = vrsqrt.f32 %v1208_v48  ;;  %v1276_v62 = vmul.f32 %v1269_v10, %v4291_v30  ;;  %v1290_v24 = vmul.f32 %v1269_v10, %v4292_v41  ;;  %v182_v19 = vld [vmem:[#allocation8 + $0x48] sm:$0xff] }
  0xcb   :  { %v3102_v53 = vmul.f32 %v2117_v57, %v2940_v49  ;;  %2126 = vrsqrt.f32 %v1349_v60  ;;  %v3112_v46 = vmul.f32 %v2117_v57, %v3009_v54  ;;  %v3115_v49 = vmul.f32 %v2117_v57, %v3012_v26 }
  0xcc   :  { %4293 = vst [vmem:[#allocation26_spill] sm:$0xff] %v3099_v34  ;;  %1528 = vrot.lane.b32.xlu0 %v3099_v34, %s2417_s6  ;;  %v3122_v15 = vsub.f32 %v1148_v12, %v1276_v62  ;;  %v3124_v54 = vsub.f32 %v1156_v17, %v1290_v24  ;;  %v1304_v26 = vmul.f32 %v1269_v10, %v3062_v38 }
  0xcd   :  { %4294 = vst [vmem:[#allocation25_spill] sm:$0xff] %v3102_v53  ;;  %v2119_v3 = vpop.eup %2118  ;;  %4296 = vst [vmem:[#allocation29_spill] sm:$0xff] %v3112_v46  ;;  %v1242_v13 = vmul.f32 %v3102_v53, %v1149_v18  ;;  %v1249_v58 = vmul.f32 %v3112_v46, %v1157_v16  ;;  %v1263_v45 = vmul.f32 %v3115_v49, %v1165_v47 }
  0xce   :  { %4297 = vst [vmem:[#allocation30_spill] sm:$0xff] %v3115_v49  ;;  %v2121_v51 = vpop.eup %2120  ;;  %v819_v52 = vmul.f32 10000.0, %v2119_v3  ;;  %v1318_v12 = vmul.f32 %v3122_v15, %v3122_v15  ;;  %v1325_v17 = vmul.f32 %v3124_v54, %v3124_v54 }
  0xcf   :  { %v891_v14 = vmul.f32 10000.0, %v2121_v51  ;;  %v1256_v27 = vadd.f32 %v1249_v58, %v1242_v13 }
  0xd0   :  { %v837_v11 = vmul.f32 %v819_v52, %v3042_v5  ;;  %1554 = vrot.lane.b32.xlu0 %v3107_v37, %s2417_s6  ;;  %v3131_v5 = vsub.f32 %v1164_v63, %v1304_v26  ;;  %v1332_v13 = vadd.f32 %v1325_v17, %v1318_v12  ;;  %v1150_v52 = vld [vmem:[#allocation11 + $0xd8] sm:$0xff] }
  0xd1   :  { %v909_v0 = vmul.f32 %v891_v14, %v3044_v22  ;;  %v1270_v50 = vadd.f32 %v1263_v45, %v1256_v27  ;;  %v1158_v14 = vld [vmem:[#allocation11 + $0x110] sm:$0xff] }
  0xd2   :  { %v1339_v51 = vmul.f32 %v3131_v5, %v3131_v5 }
  0xd3   :  { %v927_v60 = vadd.f32 %v909_v0, %v837_v11  ;;  %v1277_v44 = vmul.f32 %v1270_v50, %v3102_v53  ;;  %v1291_v62 = vmul.f32 %v1270_v50, %v3112_v46 }
  0xd4   :  { %1478 = vrot.lane.b32.xlu0 %v3112_v46, %s2417_s6  ;;  %v1450_v10 = vpop.permute.xlu1 %1449 }
  0xd5   :  { %v945_v48 = vmul.f32 %v927_v60, %v182_v19  ;;  %v3164_v12 = vsub.f32 %v1149_v18, %v1277_v44  ;;  %v3166_v17 = vsub.f32 %v1157_v16, %v1291_v62 }
  0xd6   :  { %v1448_v22 = vpop.permute.xlu0 %1447  ;;  %v3137_v57 = vpop.eup %2122 }
  0xd7   :  { %972 = vadd.xlane.f32.xlu1 %v945_v48  ;;  %v2125_v24 = vpop.eup %2124  ;;  %v3143_v63 = vmul.f32 %v3137_v57, %v3058_v28  ;;  %v1461_v3 = vmul.f32 %v1448_v22, %v2650_v36  ;;  %v1166_v28 = vld [vmem:[#allocation11 + $0x148] sm:$0xff]  ;;  %v1346_v22 = vadd.f32 %v1339_v51, %v1332_v13  ;;  %v1319_v62 = vmul.f32 %v3164_v12, %v3164_v12 }
  0xd8   :  { %v2127_v58 = vpop.eup %2126  ;;  %v3149_v11 = vmul.f32 %v2125_v24, %v3046_v9  ;;  %v1469_v26 = vpop.permute.xlu1 %1468  ;;  %v3152_v0 = vmul.f32 %v2125_v24, %v3052_v61  ;;  %v3155_v27 = vmul.f32 %v2125_v24, %v3074_v59  ;;  %v1305_v9 = vmul.f32 %v1270_v50, %v3115_v49 }
  0xd9   :  { %4298 = vst [vmem:[#allocation31_spill] sm:$0xff] %v3143_v63  ;;  %1530 = vrot.lane.b32.xlu0 %v3143_v63, %s2417_s6  ;;  %v3160_v45 = vmul.f32 %v2127_v58, %v3040_v25  ;;  %v1482_v19 = vmul.f32 %v1469_v26, %v2653_v39  ;;  %v1462_v26 = vmul.f32 %v1450_v10, %v2638_v29 }
  0xda   :  { %4299 = vst [vmem:[#allocation32_spill] sm:$0xff] %v3149_v11  ;;  %4300 = vst [vmem:[#allocation33_spill] sm:$0xff] %v3152_v0  ;;  %v1452_v60 = vpop.permute.xlu0 %1451  ;;  %v1243_v61 = vmul.f32 %v3149_v11, %v1150_v52  ;;  %v1250_v59 = vmul.f32 %v3152_v0, %v1158_v14  ;;  %v1264_v24 = vmul.f32 %v3155_v27, %v1166_v28 }
  0xdb   :  { %4301 = vst [vmem:[#allocation34_spill] sm:$0xff] %v3155_v27  ;;  %4302 = vst [vmem:[#allocation35_spill] sm:$0xff] %v3160_v45  ;;  %v1489_v48 = vadd.f32 %v1482_v19, %v1461_v3  ;;  %v3176_v44 = vsub.f32 %v1165_v47, %v1305_v9  ;;  %v1326_v3 = vmul.f32 %v3166_v17, %v3166_v17  ;;  %v1353_v19 = vmax.f32 %v1346_v22, 1e-24 }
  0xdc   :  { %v1471_v63 = vpop.permute.xlu1 %1470  ;;  %v1257_v25 = vadd.f32 %v1250_v59, %v1243_v61  ;;  %v1463_v13 = vmul.f32 %v1452_v60, %v2661_v1  ;;  %v3189_v9 = vmul.f32 %v2127_v58, %v3019_v33  ;;  %v3202_v33 = vmul.f32 %v3137_v57, %v3066_v23 }
  0xdd   :  { %1580 = vrot.lane.b32.xlu0 %v3160_v45, %s2417_s6  ;;  %v1483_v18 = vmul.f32 %v1471_v63, %v2641_v31  ;;  %v1333_v46 = vadd.f32 %v1326_v3, %v1319_v62  ;;  %v1340_v60 = vmul.f32 %v3176_v44, %v3176_v44  ;;  %2128 = vrsqrt.f32 %v1353_v19 }
  0xde   :  { %v1497_v50 = vpop.permute.xlu0 %1496  ;;  %v1271_v61 = vadd.f32 %v1264_v24, %v1257_v25  ;;  %4304 = vst [vmem:[#allocation37_spill] sm:$0xff] %v3189_v9  ;;  %4306 = vst [vmem:[#allocation39_spill] sm:$0xff] %v3202_v33 }
  0xdf   :  { %v1510_v16 = vmul.f32 %v1497_v50, %v2656_v40  ;;  %v1490_v51 = vadd.f32 %v1483_v18, %v1462_v26  ;;  %v3192_v50 = vmul.f32 %v2127_v58, %v3022_v35  ;;  %v1384_v35 = vmul.f32 %v3160_v45, %v2653_v39 }
  0xe0   :  { %v1473_v10 = vpop.permute.xlu1 %1472  ;;  %v1278_v22 = vmul.f32 %v1271_v61, %v3149_v11  ;;  %v1292_v24 = vmul.f32 %v1271_v61, %v3152_v0  ;;  %v1347_v62 = vadd.f32 %v1340_v60, %v1333_v46  ;;  %v1306_v3 = vmul.f32 %v1271_v61, %v3155_v27 }
  0xe1   :  { %v3183_v59 = vadd.f32 %v1510_v16, %v1489_v48  ;;  %1459 = vrot.lane.b32.xlu0 %v3149_v11, %s2417_s6  ;;  %v1484_v47 = vmul.f32 %v1473_v10, %v2664_v2  ;;  %4305 = vst [vmem:[#allocation38_spill] sm:$0xff] %v3192_v50  ;;  %v1391_v58 = vmul.f32 %v3192_v50, %v2656_v40 }
  0xe2   :  { %v1454_v63 = vpop.permute.xlu0 %1453  ;;  %v3216_v19 = vsub.f32 %v1150_v52, %v1278_v22  ;;  %v3218_v10 = vsub.f32 %v1158_v14, %v1292_v24  ;;  %v3245_v24 = vmul.f32 %v3095_v21, %v3006_v4 }
  0xe3   :  { %4303 = vst [vmem:[#allocation36_spill] sm:$0xff] %v3183_v59  ;;  %v1491_v48 = vadd.f32 %v1484_v47, %v1463_v13  ;;  %v1464_v23 = vmul.f32 %v1454_v63, %v2674_v8  ;;  %v3224_v46 = vsub.f32 %v1384_v35, %v1391_v58  ;;  %v3227_v59 = vsub.f32 %v1166_v28, %v1306_v3 }
  0xe4   :  { %v1499_v25 = vpop.permute.xlu1 %1498  ;;  %v1327_v63 = vmul.f32 %v3218_v10, %v3218_v10  ;;  %v3241_v28 = vmul.f32 %v3095_v21, %v3003_v20  ;;  %4311 = vst [vmem:[#allocation44_spill] sm:$0xff] %v3245_v24  ;;  %v1386_v4 = vmul.f32 %v3245_v24, %v2664_v2 }
  0xe5   :  { %1506 = vrot.lane.b32.xlu0 %v3115_v49, %s2417_s6  ;;  %v1511_v26 = vmul.f32 %v1499_v25, %v2644_v32  ;;  %4309 = vst [vmem:[#allocation42_spill] sm:$0xff] %v3224_v46 }
  0xe6   :  { %v1501_v18 = vpop.permute.xlu0 %1500  ;;  %4310 = vst [vmem:[#allocation43_spill] sm:$0xff] %v3241_v28  ;;  %v1393_v21 = vmul.f32 %v3241_v28, %v2667_v6 }
  0xe7   :  { %v1512_v16 = vmul.f32 %v1501_v18, %v2667_v6  ;;  %v3214_v13 = vadd.f32 %v1511_v26, %v1490_v51  ;;  %v1354_v18 = vmax.f32 %v1347_v62, 1e-24  ;;  %v1320_v51 = vmul.f32 %v3216_v19, %v3216_v19 }
  0xe8   :  { %1524 = vrot.lane.b32.xlu1 %v3189_v9, %s2417_s6  ;;  %v1475_v25 = vpop.permute.xlu1 %1474  ;;  %v1341_v26 = vmul.f32 %v3227_v59, %v3227_v59 }
  0xe9   :  { %4307 = vst [vmem:[#allocation40_spill] sm:$0xff] %v3214_v13  ;;  %v3220_v47 = vadd.f32 %v1512_v16, %v1491_v48  ;;  %1558 = vrot.lane.b32.xlu0 %v3202_v33, %s2417_s6  ;;  %v1485_v61 = vmul.f32 %v1475_v25, %v2677_v43  ;;  %2130 = vrsqrt.f32 %v1354_v18  ;;  %v1334_v58 = vadd.f32 %v1327_v63, %v1320_v51  ;;  %v3287_v63 = vld [vmem:[#allocation5 + $0x50] sm:$0xff]  ;;  %v3341_v13 = vld [vmem:[#allocation5 + $0x180] sm:$0xff] }
  0xea   :  { %v1477_v60 = vpop.permute.xlu0 %1476  ;;  %v2129_v16 = vpop.eup %2128 }
  0xeb   :  { %4308 = vst [vmem:[#allocation41_spill] sm:$0xff] %v3220_v47  ;;  %v1492_v52 = vadd.f32 %v1485_v61, %v1464_v23  ;;  %v1486_v14 = vmul.f32 %v1477_v60, %v4292_v41  ;;  %v3256_v20 = vmul.f32 %v2129_v16, %v3124_v54  ;;  %v1348_v25 = vadd.f32 %v1341_v26, %v1334_v58 }
  0xec   :  { %1552 = vrot.lane.b32.xlu1 %v3192_v50, %s2417_s6  ;;  %v1456_v48 = vpop.permute.xlu1 %1455  ;;  %v3269_v61 = vsub.f32 %v1386_v4, %v1393_v21  ;;  %v1406_v54 = vmul.f32 %v3080_v56, %v2644_v32  ;;  %v1413_v60 = vmul.f32 %v3088_v55, %v2638_v29  ;;  %v1394_v26 = vmul.f32 %v3202_v33, %v4286_v7  ;;  %v3309_v4 = vld [vmem:[#allocation2 + $0x7] ss:$0 sm:$0xff] }
  0xed   :  { %1608 = vrot.lane.b32.xlu0 %v3224_v46, %s2417_s6  ;;  %v1465_v22 = vmul.f32 %v1456_v48, %v4291_v30  ;;  %4313 = vst [vmem:[#allocation46_spill] sm:$0xff] %v3256_v20  ;;  %v1355_v18 = vmax.f32 %v1348_v25, 1e-24  ;;  %v3289_v48 = vld [vmem:[#allocation5 + $0xe0] sm:$0xff]  ;;  %v3313_v21 = vld [vmem:[#allocation5 + $0x170] sm:$0xff] }
  0xee   :  { %4315 = vst [vmem:[#allocation48_spill] sm:$0xff] %v3269_v61  ;;  %v3317_v25 = vld [vmem:[#allocation5 + $0xf0] sm:$0xff] }
  0xef   :  { %v3249_v35 = vadd.f32 %v1486_v14, %v1465_v22  ;;  %v3285_v14 = vmul.f32 %v3137_v57, %v3070_v42  ;;  %2132 = vrsqrt.f32 %v1355_v18  ;;  %v3303_v42 = vmul.f32 %v2129_v16, %v3122_v15  ;;  %v3305_v57 = vld [vmem:[#allocation2 + $0x6] ss:$0 sm:$0xff] }
  0xf0   :  { %1457 = vrot.lane.b32.xlu1 %v3102_v53, %s2417_s6  ;;  %v1503_v62 = vpop.permute.xlu1 %1502  ;;  %v1385_v18 = vmul.f32 %v3088_v55, %v2641_v31 }
  0xf1   :  { %4312 = vst [vmem:[#allocation45_spill] sm:$0xff] %v3249_v35  ;;  %1508 = vrot.lane.b32.xlu0 %v3155_v27, %s2417_s6  ;;  %v1513_v3 = vmul.f32 %v1503_v62, %v4286_v7  ;;  %4317 = vst [vmem:[#allocation50_spill] sm:$0xff] %v3285_v14  ;;  %v1387_v58 = vmul.f32 %v3285_v14, %v2677_v43  ;;  %v462_v62 = vmul.f32 %v3305_v57, %v3287_v63 }
  0xf2   :  { %4319 = vst [vmem:[#allocation52_spill] sm:$0xff] %v3303_v42 }
  0xf3   :  { %v3265_v23 = vadd.f32 %v1513_v3, %v1492_v52  ;;  %v3279_v52 = vsub.f32 %v1406_v54, %v1413_v60  ;;  %v3315_v3 = vld [vmem:[#allocation5 + $0x60] sm:$0xff]  ;;  %v3321_v15 = vsub.f32 %v1387_v58, %v1394_v26  ;;  %v1426_v54 = vmul.f32 %v3192_v50, %v2650_v36 }
  0xf4   :  { %1504 = vrot.lane.b32.xlu1 %v3062_v38, %s2417_s6  ;;  %v1433_v60 = vmul.f32 %v3189_v9, %v2653_v39  ;;  %v464_v26 = vmul.f32 %v3305_v57, %v3315_v3  ;;  %v487_v39 = vmul.f32 %v3309_v4, %v3317_v25 }
  0xf5   :  { %4314 = vst [vmem:[#allocation47_spill] sm:$0xff] %v3265_v23  ;;  %1560 = vrot.lane.b32.xlu0 %v3256_v20, %s2417_s6  ;;  %4316 = vst [vmem:[#allocation49_spill] sm:$0xff] %v3279_v52  ;;  %v1392_v23 = vmul.f32 %v3107_v37, %v2644_v32 }
  0xf6   :  { %v2131_v51 = vpop.eup %2130  ;;  %4320 = vst [vmem:[#allocation53_spill] sm:$0xff] %v3321_v15  ;;  %v3345_v32 = vsub.f32 %v1426_v54, %v1433_v60  ;;  %v505_v47 = vadd.f32 %v487_v39, %v464_v26  ;;  %v1395_v60 = vmul.f32 %v3256_v20, %v3062_v38  ;;  %v1428_v26 = vmul.f32 %v3241_v28, %v2661_v1 }
  0xf7   :  { %v3294_v22 = vmul.f32 %v2131_v51, %v3166_v17  ;;  %v485_v17 = vmul.f32 %v3309_v4, %v3289_v48 }
  0xf8   :  { %1556 = vrot.lane.b32.xlu1 %v3241_v28, %s2417_s6  ;;  %4321 = vst [vmem:[#allocation54_spill] sm:$0xff] %v3345_v32 }
  0xf9   :  { %1612 = vrot.lane.b32.xlu0 %v3269_v61, %s2417_s6  ;;  %4318 = vst [vmem:[#allocation51_spill] sm:$0xff] %v3294_v22  ;;  %v3333_v61 = vld [vmem:[#allocation2 + $0x8] ss:$0 sm:$0xff] }
  0xfa   :  { %v526_v58 = vmul.f32 %v3333_v61, %v3313_v21  ;;  %v528_v46 = vmul.f32 %v3333_v61, %v3341_v13 }
  0xfc   :  { %1582 = vrot.lane.b32.xlu1 %v3088_v55, %s2417_s6  ;;  %v3347_v55 = vsub.f32 %v1385_v18, %v1392_v23  ;;  %v2133_v50 = vpop.eup %2132  ;;  %v546_v18 = vadd.f32 %v528_v46, %v505_v47  ;;  %v1405_v47 = vmul.f32 %v3189_v9, %v2656_v40  ;;  %v1412_v46 = vmul.f32 %v3160_v45, %v2650_v36  ;;  %v3403_v36 = vld [vmem:[#allocation2 + $0x1] ss:$0 sm:$0xff] }
  0xfd   :  { %1638 = vrot.lane.b32.xlu0 %v3279_v52, %s2417_s6  ;;  %v503_v52 = vadd.f32 %v485_v17, %v462_v62  ;;  %v3352_v62 = vmul.f32 %v2129_v16, %v3131_v5  ;;  %v3359_v54 = vmul.f32 %v2133_v50, %v3218_v10  ;;  %v3368_v5 = vmul.f32 %v2131_v51, %v3164_v12  ;;  %v3370_v16 = vld [vmem:[#allocation2 + $0xb] ss:$0 sm:$0xff] }
  0xfe   :  { %4322 = vst [vmem:[#allocation55_spill] sm:$0xff] %v3347_v55  ;;  %v1435_v12 = vmul.f32 %v3099_v34, %v2664_v2 }
  0xff   :  { %4323 = vst [vmem:[#allocation56_spill] sm:$0xff] %v3352_v62  ;;  %v544_v17 = vadd.f32 %v526_v58, %v503_v52  ;;  %4324 = vst [vmem:[#allocation57_spill] sm:$0xff] %v3359_v54  ;;  %v1388_v23 = vmul.f32 %v3352_v62, %v4292_v41  ;;  %v3378_v58 = vmul.f32 %v2131_v51, %v3176_v44  ;;  %v4329_v51 = vld [vmem:[#allocation29_spill] sm:$0xff] }
 0x100   :  { %1480 = vrot.lane.b32.xlu1 %v3152_v0, %s2417_s6  ;;  %4325 = vst [vmem:[#allocation58_spill] sm:$0xff] %v3368_v5  ;;  %v3393_v44 = vsub.f32 %v1428_v26, %v1435_v12  ;;  %v3411_v12 = vld [vmem:[#allocation2 + $0x4] ss:$0 sm:$0xff] }
 0x101   :  { %1562 = vrot.lane.b32.xlu0 %v3294_v22, %s2417_s6  ;;  %v567_v52 = vadd.f32 %v3370_v16, %v544_v17  ;;  %v3375_v10 = vsub.f32 %v1388_v23, %v1395_v60  ;;  %4327 = vst [vmem:[#allocation60_spill] sm:$0xff] %v3378_v58  ;;  %v569_v17 = vadd.f32 %v3370_v16, %v546_v18  ;;  %v3399_v60 = vld [vmem:[#allocation2] ss:$0 sm:$0xff]  ;;  %v3407_v18 = vld [vmem:[#allocation2 + $0x3] ss:$0 sm:$0xff] }
 0x102   :  { %4328 = vst [vmem:[#allocation61_spill] sm:$0xff] %v3393_v44  ;;  %v1389_v2 = vmul.f32 %v3378_v58, %v4329_v51  ;;  %v1396_v23 = vmul.f32 %v3294_v22, %v3115_v49  ;;  %v206_v40 = vmul.f32 %v3399_v60, %v3287_v63  ;;  %v334_v26 = vmul.f32 %v3407_v18, %v3287_v63 }
 0x103   :  { %4326 = vst [vmem:[#allocation59_spill] sm:$0xff] %v3375_v10  ;;  %v585_v39 = vmax.f32 %v567_v52, 1e-05  ;;  %v229_v52 = vmul.f32 %v3403_v36, %v3289_v48  ;;  %v1429_v63 = vmul.f32 %v3202_v33, %v2674_v8  ;;  %v3462_v33 = vld [vmem:[#allocation5 + $0xe8] sm:$0xff] }
 0x104   :  { %1532 = vrot.lane.b32.xlu1 %v3303_v42, %s2417_s6  ;;  %v3421_v28 = vsub.f32 %v1389_v2, %v1396_v23  ;;  %v3438_v2 = vmul.f32 %v2133_v50, %v3216_v19  ;;  %v231_v23 = vmul.f32 %v3403_v36, %v3317_v25  ;;  %v359_v19 = vmul.f32 %v3411_v12, %v3317_v25 }
 0x105   :  { %1614 = vrot.lane.b32.xlu0 %v3321_v15, %s2417_s6  ;;  %v3417_v15 = vsub.f32 %v1405_v47, %v1412_v46  ;;  %2134 = vrcp.f32 %v585_v39  ;;  %v247_v9 = vadd.f32 %v229_v52, %v206_v40  ;;  %v3431_v39 = vld [vmem:[#allocation2 + $0x5] ss:$0 sm:$0xff]  ;;  %v1417_v40 = vmul.f32 %v3378_v58, %v3102_v53 }
 0x106   :  { %4331 = vst [vmem:[#allocation62_spill] sm:$0xff] %v3421_v28  ;;  %4333 = vst [vmem:[#allocation63_spill] sm:$0xff] %v3438_v2 }
 0x107   :  { %4330 = vst [vmem:[#allocation29_spill] sm:$0xff] %v3417_v15 }
 0x108   :  { %1584 = vrot.lane.b32.xlu1 %v3245_v24, %s2417_s6 }
 0x109   :  { %1664 = vrot.lane.b32.xlu0 %v3345_v32, %s2417_s6  ;;  %v4332_v32 = vld [vmem:[#allocation31_spill] sm:$0xff] }
 0x10a   :  { %v1436_v45 = vmul.f32 %v4332_v32, %v2677_v43  ;;  %v208_v43 = vmul.f32 %v3399_v60, %v3315_v3 }
 0x10c   :  { %1610 = vrot.lane.b32.xlu1 %v3347_v55, %s2417_s6  ;;  %v587_v55 = vmax.f32 %v569_v17, 1e-05  ;;  %v398_v17 = vmul.f32 %v3431_v39, %v3313_v21  ;;  %v3454_v52 = vsub.f32 %v1429_v63, %v1436_v45 }
 0x10d   :  { %1564 = vrot.lane.b32.xlu0 %v3359_v54, %s2417_s6 }
 0x10e   :  { %2136 = vrcp.f32 %v587_v55  ;;  %4334 = vst [vmem:[#allocation64_spill] sm:$0xff] %v3454_v52  ;;  %v1407_v55 = vmul.f32 %v3099_v34, %v2667_v6 }
 0x110   :  { %1534 = vrot.lane.b32.xlu1 %v3368_v5, %s2417_s6 }
 0x111   :  { %1616 = vrot.lane.b32.xlu0 %v3375_v10, %s2417_s6  ;;  %v357_v10 = vmul.f32 %v3411_v12, %v3289_v48  ;;  %v3427_v48 = vld [vmem:[#allocation2 + $0x2] ss:$0 sm:$0xff] }
 0x112   :  { %v270_v47 = vmul.f32 %v3427_v48, %v3313_v21  ;;  %v336_v21 = vmul.f32 %v3407_v18, %v3315_v3  ;;  %v3467_v3 = vmul.f32 %v2133_v50, %v3227_v59  ;;  %v272_v45 = vmul.f32 %v3427_v48, %v3341_v13 }
 0x113   :  { %v375_v46 = vadd.f32 %v357_v10, %v334_v26  ;;  %v1410_v10 = vmul.f32 %v3368_v5, %v3115_v49  ;;  %v1414_v26 = vmul.f32 %v3245_v24, %v2661_v1  ;;  %v3460_v49 = vld [vmem:[#allocation5 + $0x58] sm:$0xff]  ;;  %v400_v1 = vmul.f32 %v3431_v39, %v3341_v13 }
 0x114   :  { %1586 = vrot.lane.b32.xlu1 %v3285_v14, %s2417_s6  ;;  %4335 = vst [vmem:[#allocation65_spill] sm:$0xff] %v3467_v3  ;;  %v288_v25 = vadd.f32 %v270_v47, %v247_v9  ;;  %v1411_v24 = vmul.f32 %v3438_v2, %v3155_v27  ;;  %v1418_v59 = vmul.f32 %v3467_v3, %v3149_v11  ;;  %v3481_v9 = vld [vmem:[#allocation5 + $0x178] sm:$0xff] }
 0x115   :  { %1668 = vrot.lane.b32.xlu0 %v3393_v44, %s2417_s6  ;;  %v3471_v63 = vsub.f32 %v1410_v10, %v1417_v40  ;;  %v416_v6 = vadd.f32 %v398_v17, %v375_v46  ;;  %v377_v44 = vadd.f32 %v359_v19, %v336_v21  ;;  %v463_v50 = vmul.f32 %v3305_v57, %v3460_v49  ;;  %v2135_v21 = vpop.eup %2134  ;;  %v3498_v19 = vld [vmem:[#allocation2 + $0xa] ss:$0 sm:$0xff] }
 0x116   :  { %v486_v47 = vmul.f32 %v3309_v4, %v3462_v33  ;;  %v1427_v13 = vmul.f32 %v3107_v37, %v2638_v29  ;;  %v3491_v46 = vsub.f32 %v1407_v55, %v1414_v26  ;;  %v1434_v17 = vmul.f32 %v3080_v56, %v2641_v31 }
 0x117   :  { %4336 = vst [vmem:[#allocation66_spill] sm:$0xff] %v3471_v63  ;;  %v527_v29 = vmul.f32 %v3333_v61, %v3481_v9  ;;  %v418_v37 = vadd.f32 %v400_v1, %v377_v44  ;;  %v3505_v55 = vsub.f32 %v1411_v24, %v1418_v59  ;;  %v1432_v31 = vmul.f32 %v3359_v54, %v3149_v11  ;;  %v657_v11 = vld [vmem:[#allocation7 + $0x50] sm:$0xff] }
 0x118   :  { %1636 = vrot.lane.b32.xlu1 %v3417_v15, %s2417_s6  ;;  %4337 = vst [vmem:[#allocation67_spill] sm:$0xff] %v3491_v46  ;;  %v504_v26 = vadd.f32 %v486_v47, %v463_v50  ;;  %v3517_v44 = vsub.f32 %v1427_v13, %v1434_v17  ;;  %v712_v47 = vld [vmem:[#allocation7 + $0xe0] sm:$0xff] }
 0x119   :  { %1618 = vrot.lane.b32.xlu0 %v3421_v28, %s2417_s6  ;;  %v249_v28 = vadd.f32 %v231_v23, %v208_v43  ;;  %v3495_v23 = vld [vmem:[#allocation2 + $0x9] ss:$0 sm:$0xff]  ;;  %4338 = vst [vmem:[#allocation68_spill] sm:$0xff] %v3505_v55 }
 0x11a   :  { %v311_v10 = vadd.f32 %v3495_v23, %v288_v25  ;;  %v3511_v25 = vld [vmem:[#allocation5 + $0x68] sm:$0xff]  ;;  %4339 = vst [vmem:[#allocation69_spill] sm:$0xff] %v3517_v44  ;;  %v545_v15 = vadd.f32 %v527_v29, %v504_v26  ;;  %v714_v29 = vld [vmem:[#allocation7 + $0xf0] sm:$0xff] }
 0x11b   :  { %v290_v40 = vadd.f32 %v272_v45, %v249_v28  ;;  %v1439_v28 = vmul.f32 %v3438_v2, %v3152_v0  ;;  %v3513_v45 = vld [vmem:[#allocation5 + $0xf8] sm:$0xff]  ;;  %v2137_v59 = vpop.eup %2136  ;;  %v465_v13 = vmul.f32 %v3305_v57, %v3511_v25 }
 0x11c   :  { %1536 = vrot.lane.b32.xlu1 %v3438_v2, %s2417_s6  ;;  %v639_v1 = vmul.f32 %v2135_v21, %v311_v10  ;;  %v441_v2 = vadd.f32 %v3498_v19, %v418_v37  ;;  %v488_v17 = vmul.f32 %v3309_v4, %v3513_v45  ;;  %v3529_v10 = vld [vmem:[#allocation5 + $0x70] sm:$0xff]  ;;  %v1408_v37 = vmul.f32 %v4332_v32, %v4286_v7  ;;  %v3578_v32 = vld [vmem:[#allocation5 + $0x108] sm:$0xff] }
 0x11d   :  { %1670 = vrot.lane.b32.xlu0 %v3454_v52, %s2417_s6  ;;  %v439_v52 = vadd.f32 %v3498_v19, %v416_v6  ;;  %v313_v24 = vadd.f32 %v3495_v23, %v290_v40  ;;  %v3523_v50 = vsub.f32 %v1432_v31, %v1439_v28  ;;  %v3537_v40 = vld [vmem:[#allocation5 + $0x188] sm:$0xff]  ;;  %v466_v7 = vmul.f32 %v3305_v57, %v3529_v10 }
 0x11e   :  { %v675_v31 = vsub.f32 %v639_v1, %v657_v11  ;;  %v506_v11 = vadd.f32 %v488_v17, %v465_v13  ;;  %v4342_v17 = vlaneseq }
 0x11f   :  { %v693_v56 = vmul.f32 %v2135_v21, %v439_v52  ;;  %4340 = vst [vmem:[#allocation70_spill] sm:$0xff] %v3523_v50  ;;  %v1415_v52 = vmul.f32 %v3285_v14, %v2674_v8  ;;  %v1409_v21 = vmul.f32 %v3303_v42, %v3062_v38  ;;  %v641_v28 = vmul.f32 %v2137_v59, %v313_v24  ;;  %v1883_v24 = vld [vmem:[%s4222_s8 + $0x8] sm:$0xff] }
 0x120   :  { %1588 = vrot.lane.b32.xlu1 %v3352_v62, %s2417_s6  ;;  %v955_v43 = vpop.xlane.xlu0 %954  ;;  %v1416_v14 = vmul.f32 %v3352_v62, %v4291_v30  ;;  %v3576_v62 = vld [vmem:[#allocation5 + $0x78] sm:$0xff] }
 0x121   :  { %1646 = vrot.lane.b32.xlu0 %v3471_v63, %s2417_s6  ;;  %v730_v26 = vsub.f32 %v693_v56, %v712_v47  ;;  %v529_v56 = vmul.f32 %v3333_v61, %v3537_v40  ;;  %v3556_v1 = vsub.f32 %v1408_v37, %v1415_v52  ;;  %v230_v47 = vmul.f32 %v3403_v36, %v3462_v33 }
 0x122   :  { %v3572_v37 = vand.u32 127, %v4342_v17  ;;  %v3574_v52 = vmul.f32 %v675_v31, %v675_v31 }
 0x123   :  { %4341 = vst [vmem:[#allocation71_spill] sm:$0xff] %v3556_v1 }
 0x124   :  { %1640 = vrot.lane.b32.xlu1 %v3491_v46, %s2417_s6  ;;  %v957_v6 = vpop.xlane.xlu0 %956  ;;  %v3580_v46 = vmul.f32 %v730_v26, %v730_v26  ;;  %vm1869_vm0 = vcmp.lt.s32.totalorder %v3572_v37, 8 }
 0x125   :  { %v990_v63 = vadd.f32 %v957_v6, %v955_v43  ;;  %1648 = vrot.lane.b32.xlu0 %v3505_v55, %s2417_s6  ;;  %v3531_v43 = vld [vmem:[#allocation5 + $0x100] sm:$0xff]  ;;  %v659_v6 = vld [vmem:[#allocation7 + $0x60] sm:$0xff]  ;;  %v695_v55 = vmul.f32 %v2137_v59, %v441_v2  ;;  %v207_v59 = vmul.f32 %v3399_v60, %v3460_v49 }
 0x126   :  { %v489_v8 = vmul.f32 %v3309_v4, %v3531_v43  ;;  %v3554_v2 = vld [vmem:[#allocation5 + $0x190] sm:$0xff] }
 0x127   :  { %v732_v34 = vsub.f32 %v695_v55, %v714_v29  ;;  %v248_v55 = vadd.f32 %v230_v47, %v207_v59  ;;  %v467_v29 = vmul.f32 %v3305_v57, %v3576_v62 }
 0x128   :  { %1666 = vrot.lane.b32.xlu1 %v3517_v44, %s2417_s6  ;;  %v568_v44 = vadd.f32 %v3370_v16, %v545_v15  ;;  %v1430_v15 = vmul.f32 %v3256_v20, %v4291_v30  ;;  %v3569_v13 = vpop.xlane.xlu0 %962  ;;  %v507_v35 = vadd.f32 %v489_v8, %v466_v7  ;;  %v3584_v30 = vsub.f32 %v1409_v21, %v1416_v14  ;;  %v3606_v7 = vld [vmem:[#allocation5 + $0x198] sm:$0xff]  ;;  %v3608_v8 = vld [vmem:[#allocation5 + $0x80] sm:$0xff] }
 0x129   :  { %1676 = vrot.lane.b32.xlu0 %v3523_v50, %s2417_s6  ;;  %v677_v50 = vsub.f32 %v641_v28, %v659_v6  ;;  %v1437_v20 = vmul.f32 %v3303_v42, %v4292_v41  ;;  %v547_v28 = vadd.f32 %v529_v56, %v506_v11  ;;  %v1885_v6 = vld [vmem:[%s4222_s8 + $0x18] sm:$0xff]  ;;  %v490_v14 = vmul.f32 %v3309_v4, %v3578_v32  ;;  %v3610_v11 = vld [vmem:[#allocation5 + $0x110] sm:$0xff] }
 0x12a   :  { %v586_v17 = vmax.f32 %v568_v44, 1e-05  ;;  %v1431_v41 = vmul.f32 %v3294_v22, %v3102_v53  ;;  %v1438_v44 = vmul.f32 %v3368_v5, %v4329_v51  ;;  %v784_v21 = vadd.f32 10000.0, %v3574_v52  ;;  %v1887_v5 = vld [vmem:[%s4222_s8 + $0x28] sm:$0xff] }
 0x12b   :  { %v856_v56 = vadd.f32 10000.0, %v3580_v46  ;;  %v3615_v59 = vmul.f32 %v732_v34, %v732_v34  ;;  %v358_v22 = vmul.f32 %v3411_v12, %v3462_v33  ;;  %v508_v42 = vadd.f32 %v490_v14, %v467_v29 }
 0x12c   :  { %1590 = vrot.lane.b32.xlu1 %v3378_v58, %s2417_s6  ;;  %v530_v58 = vmul.f32 %v3333_v61, %v3554_v2  ;;  %2138 = vrcp.f32 %v586_v17  ;;  %v531_v34 = vmul.f32 %v3333_v61, %v3606_v7  ;;  %v1390_v33 = vmul.f32 %v3467_v3, %v3152_v0 }
 0x12d   :  { %1896 = vperm.xlu0 %2045, %v1883_v24   ;;  %v271_v24 = vmul.f32 %v3427_v48, %v3481_v9  ;;  %2140 = vrcp.f32 %v784_v21  ;;  %v858_v29 = vadd.f32 10000.0, %v3615_v59  ;;  %v3646_v38 = vsub.f32 %v1431_v41, %v1438_v44 }
 0x12e   :  { %v959_v31 = vpop.xlane.xlu1 %958  ;;  %v548_v47 = vadd.f32 %v530_v58, %v507_v35  ;;  %v468_v35 = vmul.f32 %v3305_v57, %v3608_v8  ;;  %v1397_v58 = vmul.f32 %v3359_v54, %v3155_v27  ;;  %2142 = vrcp.f32 %v856_v56  ;;  %v3656_v56 = vld [vmem:[#allocation5 + $0x118] sm:$0xff] }
 0x12f   :  { %v3591_v26 = vadd.f32 %v990_v63, %v959_v31  ;;  %v3604_v63 = vmul.f32 %v677_v50, %v677_v50  ;;  %v3617_v31 = vpop.xlane.xlu0 %966  ;;  %v335_v50 = vmul.f32 %v3407_v18, %v3460_v49  ;;  %v491_v49 = vmul.f32 %v3309_v4, %v3610_v11 }
 0x130   :  { %1642 = vrot.lane.b32.xlu1 %v3556_v1, %s2417_s6  ;;  %v570_v1 = vadd.f32 %v3370_v16, %v547_v28  ;;  %v3640_v28 = vld [vmem:[#allocation5 + $0x1a0] sm:$0xff]  ;;  %v571_v14 = vadd.f32 %v3370_v16, %v548_v47  ;;  %v289_v53 = vadd.f32 %v271_v24, %v248_v55  ;;  %v232_v21 = vmul.f32 %v3403_v36, %v3513_v45 }
 0x131   :  { %1906 = vperm.xlu0 %2045, %v1885_v6   ;;  %v786_v17 = vadd.f32 10000.0, %v3604_v63  ;;  %v3642_v6 = vsub.f32 %v1430_v15, %v1437_v20  ;;  %v549_v27 = vadd.f32 %v531_v34, %v508_v42  ;;  %v509_v0 = vadd.f32 %v491_v49, %v468_v35  ;;  %v3654_v15 = vld [vmem:[#allocation5 + $0x88] sm:$0xff] }
 0x132   :  { %v588_v54 = vmax.f32 %v570_v1, 1e-05  ;;  %v532_v20 = vmul.f32 %v3333_v61, %v3640_v28  ;;  %v376_v1 = vadd.f32 %v358_v22, %v335_v50  ;;  %v399_v41 = vmul.f32 %v3431_v39, %v3481_v9  ;;  %v3679_v49 = vld [vmem:[#allocation5 + $0x1a8] sm:$0xff] }
 0x133   :  { %2144 = vrcp.f32 %v786_v17  ;;  %v337_v42 = vmul.f32 %v3407_v18, %v3511_v25  ;;  %v360_v44 = vmul.f32 %v3411_v12, %v3513_v45  ;;  %v589_v24 = vmax.f32 %v571_v14, 1e-05 }
 0x134   :  { %1592 = vrot.lane.b32.xlu1 %v3467_v3, %s2417_s6  ;;  %v209_v3 = vmul.f32 %v3399_v60, %v3511_v25  ;;  %2146 = vrcp.f32 %v858_v29  ;;  %v312_v47 = vadd.f32 %v3495_v23, %v289_v53  ;;  %v469_v22 = vmul.f32 %v3305_v57, %v3654_v15 }
 0x135   :  { %1916 = vperm.xlu0 %2045, %v1887_v5   ;;  %v3660_v5 = vsub.f32 %v1390_v33, %v1397_v58  ;;  %2148 = vrcp.f32 %v588_v54  ;;  %v492_v9 = vmul.f32 %v3309_v4, %v3656_v56  ;;  %v273_v34 = vmul.f32 %v3427_v48, %v3537_v40 }
 0x136   :  { %v250_v50 = vadd.f32 %v232_v21, %v209_v3  ;;  %v572_v35 = vadd.f32 %v3370_v16, %v549_v27  ;;  %v550_v25 = vadd.f32 %v532_v20, %v509_v0  ;;  %v210_v57 = vmul.f32 %v3399_v60, %v3529_v10 }
 0x137   :  { %v233_v4 = vmul.f32 %v3403_v36, %v3531_v43  ;;  %v338_v54 = vmul.f32 %v3407_v18, %v3529_v10  ;;  %v361_v27 = vmul.f32 %v3411_v12, %v3531_v43  ;;  %v417_v0 = vadd.f32 %v399_v41, %v376_v1 }
 0x138   :  { %1644 = vrot.lane.b32.xlu1 %v3584_v30, %s2417_s6  ;;  %v3662_v55 = vpop.xlane.xlu0 %970  ;;  %v378_v3 = vadd.f32 %v360_v44, %v337_v42  ;;  %v401_v45 = vmul.f32 %v3431_v39, %v3537_v40  ;;  %2150 = vrcp.f32 %v589_v24  ;;  %v211_v58 = vmul.f32 %v3399_v60, %v3576_v62 }
 0x139   :  { %v234_v17 = vmul.f32 %v3403_v36, %v3578_v32  ;;  %v510_v29 = vadd.f32 %v492_v9, %v469_v22  ;;  %v533_v10 = vmul.f32 %v3333_v61, %v3679_v49  ;;  %v2139_v14 = vpop.eup %2138  ;;  %v291_v21 = vadd.f32 %v273_v34, %v250_v50 }
 0x13a   :  { %v590_v20 = vmax.f32 %v572_v35, 1e-05  ;;  %v573_v1 = vadd.f32 %v3370_v16, %v550_v25  ;;  %v251_v41 = vadd.f32 %v233_v4, %v210_v57  ;;  %v274_v42 = vmul.f32 %v3427_v48, %v3554_v2  ;;  %v2141_v24 = vpop.eup %2140 }
 0x13b   :  { %v379_v44 = vadd.f32 %v361_v27, %v338_v54  ;;  %v402_v61 = vmul.f32 %v3431_v39, %v3554_v2  ;;  %v440_v22 = vadd.f32 %v3498_v19, %v417_v0  ;;  %v419_v9 = vadd.f32 %v401_v45, %v378_v3  ;;  %v2143_v34 = vpop.eup %2142  ;;  %v658_v3 = vld [vmem:[#allocation7 + $0x58] sm:$0xff] }
 0x13c   :  { %1620 = vrot.lane.b32.xlu1 %v3660_v5, %s2417_s6  ;;  %v3683_v53 = vpop.permute.xlu0 %1526  ;;  %v275_v50 = vmul.f32 %v3427_v48, %v3606_v7  ;;  %v252_v35 = vadd.f32 %v234_v17, %v211_v58  ;;  %v339_v25 = vmul.f32 %v3407_v18, %v3576_v62  ;;  %v362_v57 = vmul.f32 %v3411_v12, %v3578_v32 }
 0x13d   :  { %v551_v4 = vadd.f32 %v533_v10, %v510_v29  ;;  %v640_v2 = vmul.f32 %v2139_v14, %v312_v47  ;;  %2152 = vrcp.f32 %v590_v20  ;;  %v591_v54 = vmax.f32 %v573_v1, 1e-05  ;;  %v1882_v47 = vld [vmem:[%s4222_s8] sm:$0xff] }
 0x13e   :  { %v961_v33 = vpop.xlane.xlu1 %960  ;;  %v314_v62 = vadd.f32 %v3495_v23, %v291_v21  ;;  %v292_v45 = vadd.f32 %v274_v42, %v251_v41  ;;  %v820_v58 = vmul.f32 10000.0, %v2141_v24  ;;  %v892_v17 = vmul.f32 10000.0, %v2143_v34 }
 0x13f   :  { %v992_v43 = vadd.f32 %v3591_v26, %v961_v33  ;;  %v420_v33 = vadd.f32 %v402_v61, %v379_v44  ;;  %v442_v29 = vadd.f32 %v3498_v19, %v419_v9  ;;  %v403_v37 = vmul.f32 %v3431_v39, %v3606_v7  ;;  %v713_v44 = vld [vmem:[#allocation7 + $0xe8] sm:$0xff] }
 0x140   :  { %1672 = vrot.lane.b32.xlu1 %v3642_v6, %s2417_s6  ;;  %v3705_v40 = vpop.permute.xlu0 %1528  ;;  %v2145_v32 = vpop.eup %2144  ;;  %v293_v20 = vadd.f32 %v275_v50, %v252_v35  ;;  %v380_v1 = vadd.f32 %v362_v57, %v339_v25  ;;  %v574_v21 = vadd.f32 %v3370_v16, %v551_v4  ;;  %v676_v42 = vsub.f32 %v640_v2, %v658_v3 }
 0x141   :  { %v3712_v26 = vadd.f32 %v992_v43, %v3569_v13  ;;  %v2419_v13 = vmov 0.0   ;;  %v2147_v10 = vpop.eup %2146  ;;  %v694_v43 = vmul.f32 %v2139_v14, %v440_v22  ;;  %v212_v61 = vmul.f32 %v3399_v60, %v3608_v8 }
 0x142   :  { %v3725_v27 = vsel %vm1869_vm0, 1.0, %v2419_v13  ;;  %v2149_v41 = vpop.eup %2148  ;;  %v235_v24 = vmul.f32 %v3403_v36, %v3610_v11  ;;  %2154 = vrcp.f32 %v591_v54  ;;  %v315_v7 = vadd.f32 %v3495_v23, %v292_v45  ;;  %v660_v45 = vld [vmem:[#allocation7 + $0x68] sm:$0xff] }
 0x143   :  { %v443_v14 = vadd.f32 %v3498_v19, %v420_v33  ;;  %v340_v16 = vmul.f32 %v3407_v18, %v3608_v8  ;;  %v363_v22 = vmul.f32 %v3411_v12, %v3610_v11  ;;  %v838_v50 = vmul.f32 %v820_v58, %v3574_v52  ;;  %v1884_v58 = vld [vmem:[%s4222_s8 + $0x10] sm:$0xff] }
 0x144   :  { %1674 = vrot.lane.b32.xlu1 %v3646_v38, %s2417_s6  ;;  %v3727_v0 = vpop.permute.xlu0 %1554  ;;  %v910_v34 = vmul.f32 %v892_v17, %v3580_v46  ;;  %v822_v35 = vmul.f32 10000.0, %v2145_v32  ;;  %v894_v25 = vmul.f32 10000.0, %v2147_v10  ;;  %v731_v4 = vsub.f32 %v694_v43, %v713_v44 }
 0x145   :  { %v2151_v57 = vpop.eup %2150  ;;  %v642_v2 = vmul.f32 %v2149_v41, %v314_v62  ;;  %v316_v54 = vadd.f32 %v3495_v23, %v293_v20  ;;  %v592_v13 = vmax.f32 %v574_v21, 1e-05  ;;  %v3752_v3 = vmul.f32 %v676_v42, %v676_v42  ;;  %v715_v20 = vld [vmem:[#allocation7 + $0xf8] sm:$0xff]  ;;  %v183_v21 = vld [vmem:[#allocation8 + $0x50] sm:$0xff] }
 0x146   :  { %v421_v33 = vadd.f32 %v403_v37, %v380_v1  ;;  %v253_v8 = vadd.f32 %v235_v24, %v212_v61  ;;  %v276_v11 = vmul.f32 %v3427_v48, %v3640_v28  ;;  %v696_v52 = vmul.f32 %v2149_v41, %v442_v29 }
 0x147   :  { %v381_v32 = vadd.f32 %v363_v22, %v340_v16  ;;  %v404_v62 = vmul.f32 %v3431_v39, %v3640_v28  ;;  %v928_v37 = vadd.f32 %v910_v34, %v838_v50  ;;  %v840_v10 = vmul.f32 %v822_v35, %v3604_v63  ;;  %v661_v28 = vld [vmem:[#allocation7 + $0x70] sm:$0xff]  ;;  %v716_v16 = vld [vmem:[#allocation7 + $0x100] sm:$0xff] }
 0x148   :  { %1891 = vperm.xlu1 %2044, %v1882_v47   ;;  %v3741_v9 = vpop.permute.xlu0 %1478  ;;  %v213_v47 = vmul.f32 %v3399_v60, %v3654_v15  ;;  %v912_v43 = vmul.f32 %v894_v25, %v3615_v59  ;;  %v643_v1 = vmul.f32 %v2151_v57, %v315_v7  ;;  %v678_v41 = vsub.f32 %v642_v2, %v660_v45 }
 0x149   :  { %v236_v60 = vmul.f32 %v3403_v36, %v3656_v56  ;;  %2156 = vrcp.f32 %v592_v13  ;;  %v3772_v42 = vmul.f32 %v731_v4, %v731_v4  ;;  %v697_v44 = vmul.f32 %v2151_v57, %v443_v14  ;;  %v1886_v14 = vld [vmem:[%s4222_s8 + $0x20] sm:$0xff] }
 0x14a   :  { %v444_v61 = vadd.f32 %v3498_v19, %v421_v33  ;;  %v294_v24 = vadd.f32 %v276_v11, %v253_v8  ;;  %v2153_v63 = vpop.eup %2152  ;;  %v341_v22 = vmul.f32 %v3407_v18, %v3654_v15  ;;  %v364_v36 = vmul.f32 %v3411_v12, %v3656_v56  ;;  %v185_v57 = vld [vmem:[#allocation8 + $0x60] sm:$0xff] }
 0x14b   :  { %v946_v50 = vmul.f32 %v928_v37, %v183_v21  ;;  %v930_v34 = vadd.f32 %v912_v43, %v840_v10  ;;  %v679_v35 = vsub.f32 %v643_v1, %v661_v28  ;;  %v422_v25 = vadd.f32 %v404_v62, %v381_v32  ;;  %v662_v32 = vld [vmem:[#allocation7 + $0x78] sm:$0xff]  ;;  %v663_v28 = vld [vmem:[#allocation7 + $0x80] sm:$0xff] }
 0x14c   :  { %1872 = vrot.lane.b32.xlu1 %v3725_v27, %s2417_s6  ;;  %v3758_v46 = vpop.permute.xlu0 %1530  ;;  %v3786_v4 = vmul.f32 %v678_v41, %v678_v41  ;;  %v254_v2 = vadd.f32 %v236_v60, %v213_v47  ;;  %v277_v18 = vmul.f32 %v3427_v48, %v3679_v49  ;;  %v857_v12 = vadd.f32 10000.0, %v3772_v42  ;;  %v1888_v48 = vld [vmem:[%s4222_s8 + $0x30] sm:$0xff] }
 0x14d   :  { %v965_v17 = vpop.xlane.xlu1 %964  ;;  %v734_v56 = vsub.f32 %v697_v44, %v716_v16  ;;  %v644_v13 = vmul.f32 %v2153_v63, %v316_v54  ;;  %v317_v45 = vadd.f32 %v3495_v23, %v294_v24  ;;  %v382_v62 = vadd.f32 %v364_v36, %v341_v22  ;;  %v1015_v24 = vld [vmem:[%s4218_s4] sm:$0xff]  ;;  %v1020_v22 = vld [vmem:[%s4219_s5 + $0x8] sm:$0xff] }
 0x14e   :  { %v994_v29 = vadd.f32 %v3712_v26, %v965_v17  ;;  %v733_v26 = vsub.f32 %v696_v52, %v715_v20  ;;  %v405_v47 = vmul.f32 %v3431_v39, %v3679_v49  ;;  %v948_v54 = vmul.f32 %v930_v34, %v185_v57  ;;  %v717_v20 = vld [vmem:[#allocation7 + $0x108] sm:$0xff] }
 0x14f   :  { %v2155_v33 = vpop.eup %2154  ;;  %v698_v17 = vmul.f32 %v2153_v63, %v444_v61  ;;  %v445_v37 = vadd.f32 %v3498_v19, %v422_v25  ;;  %v787_v43 = vadd.f32 10000.0, %v3786_v4  ;;  %v295_v1 = vadd.f32 %v277_v18, %v254_v2  ;;  %v1016_v63 = vld [vmem:[%s4218_s4 + $0x8] sm:$0xff]  ;;  %v1017_v25 = vld [vmem:[%s4218_s4 + $0x10] sm:$0xff] }
 0x150   :  { %1901 = vperm.xlu1 %2044, %v1884_v58   ;;  %v995_v59 = vadd.f32 %v994_v29, %v3617_v31  ;;  %v3776_v7 = vpop.permute.xlu0 %1580  ;;  %v785_v31 = vadd.f32 10000.0, %v3752_v3  ;;  %v3794_v52 = vmul.f32 %v733_v26, %v733_v26  ;;  %v3801_v58 = vmul.f32 %v679_v35, %v679_v35  ;;  %v718_v26 = vld [vmem:[#allocation7 + $0x110] sm:$0xff] }
 0x151   :  { %v3806_v29 = vmul.f32 %v734_v56, %v734_v56  ;;  %v680_v39 = vsub.f32 %v644_v13, %v662_v32  ;;  %v645_v49 = vmul.f32 %v2155_v33, %v317_v45  ;;  %v423_v60 = vadd.f32 %v405_v47, %v382_v62  ;;  %v1018_v13 = vld [vmem:[%s4218_s4 + $0x18] sm:$0xff]  ;;  %s2420_s4 = smov [#allocation14]  }
 0x152   :  { %2158 = vrcp.f32 %v785_v31  ;;  %v859_v41 = vadd.f32 10000.0, %v3794_v52  ;;  %v735_v44 = vsub.f32 %v698_v17, %v717_v20  ;;  %v699_v61 = vmul.f32 %v2155_v33, %v445_v37  ;;  %v1021_v31 = vld [vmem:[%s4219_s5 + $0x10] sm:$0xff]  ;;  %v1022_v45 = vld [vmem:[%s4219_s5 + $0x18] sm:$0xff] }
 0x153   :  { %v969_v15 = vpop.xlane.xlu1 %968  ;;  %2160 = vrcp.f32 %v857_v12  ;;  %v318_v16 = vadd.f32 %v3495_v23, %v295_v1  ;;  %v3826_v34 = vmul.f32 %v680_v39, %v680_v39  ;;  %v681_v35 = vsub.f32 %v645_v49, %v663_v28 }
 0x154   :  { %1911 = vperm.xlu1 %2044, %v1886_v14   ;;  %v996_v8 = vadd.f32 %v995_v59, %v969_v15  ;;  %v3792_v11 = vpop.permute.xlu0 %1459  ;;  %974 = vadd.xlane.f32.xlu0 %v946_v50  ;;  %v1019_v59 = vld [vmem:[%s4219_s5] sm:$0xff]  ;;  %2162 = vrcp.f32 %v787_v43  ;;  %v860_v50 = vadd.f32 10000.0, %v3806_v29  ;;  %v1024_v23 = vsub.f32 %v1016_v63, %v1020_v22  ;;  %s1974_s5 = sshll.u32 %s2420_s4, 4  ;;  %s1975_s5 = int_to_ptr.vmem [resolvable:$true] %s1974_s5 }
 0x155   :  { %v1023_v36 = vsub.f32 %v1015_v24, %v1019_v59  ;;  %2164 = vrcp.f32 %v859_v41  ;;  %v446_v2 = vadd.f32 %v3498_v19, %v423_v60  ;;  %v1025_v18 = vsub.f32 %v1017_v25, %v1021_v31  ;;  %s2337_s29 = scalar_lea.vmem %s1975_s5, 16  ;;  %s2341_s30 = scalar_lea.vmem %s1975_s5, 32 }
 0x156   :  { %v997_v10 = vadd.f32 %v996_v8, %v3662_v55  ;;  %v788_v55 = vadd.f32 10000.0, %v3801_v58  ;;  %v2157_v14 = vpop.eup %2156  ;;  %v3837_v12 = vmul.f32 %v735_v44, %v735_v44  ;;  %v736_v56 = vsub.f32 %v699_v61, %v718_v26  ;;  %p2338_p2 = scmp.ne.s32.totalorder %s1975_s5, %s2337_s29  ;;  %p2342_p3 = scmp.lt.s32.totalorder %s1975_s5, %s1975_s5 }
 0x157   :  { %v1027_v15 = vmul.f32 %v1023_v36, %v1023_v36  ;;  %v1028_v33 = vmul.f32 %v1024_v23, %v1024_v23  ;;  %v646_v8 = vmul.f32 %v2157_v14, %v318_v16  ;;  %v1026_v32 = vsub.f32 %v1018_v13, %v1022_v45  ;;  %p2343_p4 = scmp.lt.s32.totalorder %s2341_s30, %s2337_s29 }
 0x158   :  { %1921 = vperm.xlu1 %2044, %v1888_v48   ;;  %v3808_v21 = vpop.permute.xlu0 %1506  ;;  %978 = vadd.xlane.f32.xlu0 %v948_v54  ;;  %2166 = vrcp.f32 %v788_v55  ;;  %v1029_v62 = vmul.f32 %v1025_v18, %v1025_v18  ;;  %v789_v19 = vadd.f32 10000.0, %v3826_v34  ;;  %v3846_v48 = vmul.f32 %v681_v35, %v681_v35  ;;  %v664_v54 = vld [vmem:[#allocation7 + $0x88] sm:$0xff]  ;;  %v719_v55 = vld [vmem:[#allocation7 + $0x118] sm:$0xff] }
 0x159   :  { %v1031_v47 = vrot.slane %v1027_v15, 4  ;;  %2168 = vrcp.f32 %v860_v50  ;;  %v1037_v17 = vrot.slane %v1028_v33, 4  ;;  %v700_v20 = vmul.f32 %v2157_v14, %v446_v2  ;;  %p2344_p5 = por %p2343_p4, %p2342_p3 }
 0x15a   :  { %v1030_v1 = vmul.f32 %v1026_v32, %v1026_v32  ;;  %v1043_v49 = vrot.slane %v1029_v62, 4  ;;  %v861_v28 = vadd.f32 10000.0, %v3837_v12  ;;  %v3853_v60 = vmul.f32 %v736_v56, %v736_v56 }
 0x15b   :  { %v1032_v39 = vadd.f32 %v1031_v47, %v1027_v15  ;;  %v1038_v44 = vadd.f32 %v1037_v17, %v1028_v33  ;;  %v682_v61 = vsub.f32 %v646_v8, %v664_v54  ;;  %2170 = vrcp.f32 %v789_v19  ;;  %p2345_p6 = pnand %p2344_p5, %p2338_p2 }
 0x15c   :  { %v3834_v57 = vpop.permute.xlu0 %1558  ;;  %v1044_v63 = vadd.f32 %v1043_v49, %v1029_v62  ;;  %v1049_v59 = vrot.slane %v1030_v1, 4  ;;  %v790_v26 = vadd.f32 10000.0, %v3846_v48  ;;  %v737_v36 = vsub.f32 %v700_v20, %v719_v55 }
 0x15d   :  { %v1033_v24 = vrot.slane %v1032_v39, 2  ;;  %v1039_v16 = vrot.slane %v1038_v44, 2  ;;  %2172 = vrcp.f32 %v861_v28  ;;  %v862_v25 = vadd.f32 10000.0, %v3853_v60 }
 0x15e   :  { %v1050_v50 = vadd.f32 %v1049_v59, %v1030_v1  ;;  %v3861_v18 = vmul.f32 %v682_v61, %v682_v61  ;;  %2174 = vrcp.f32 %v790_v26  ;;  %v3865_v32 = vmul.f32 %v737_v36, %v737_v36  ;;  %v4343_v26 = vld [vmem:[#allocation25_spill] sm:$0xff] }
 0x15f   :  { %v1034_v14 = vadd.f32 %v1033_v24, %v1032_v39  ;;  %v2159_v35 = vpop.eup %2158  ;;  %v1040_v31 = vadd.f32 %v1039_v16, %v1038_v44  ;;  %2176 = vrcp.f32 %v862_v25  ;;  %v1487_v55 = vmul.f32 %v3741_v9, %v4329_v51 }
 0x160   :  { %v973_v37 = vpop.xlane.xlu1 %972  ;;  %v3848_v43 = vpop.permute.xlu0 %1608  ;;  %v1051_v13 = vrot.slane %v1050_v50, 2  ;;  %v821_v17 = vmul.f32 10000.0, %v2159_v35  ;;  %v791_v39 = vadd.f32 10000.0, %v3861_v18 }
 0x161   :  { %v3850_v41 = vadd.f32 %v997_v10, %v973_v37  ;;  %v1045_v10 = vrot.slane %v1044_v63, 2  ;;  %v2161_v23 = vpop.eup %2160  ;;  %v1035_v15 = vrot.slane %v1034_v14, 1  ;;  %v1041_v33 = vrot.slane %v1040_v31, 1 }
 0x162   :  { %v2163_v45 = vpop.eup %2162  ;;  %v1052_v19 = vadd.f32 %v1051_v13, %v1050_v50  ;;  %v893_v37 = vmul.f32 10000.0, %v2161_v23  ;;  %v839_v36 = vmul.f32 %v821_v17, %v3752_v3  ;;  %v4344_v23 = vld [vmem:[#allocation24_spill] sm:$0xff] }
 0x163   :  { %v1046_v56 = vadd.f32 %v1045_v10, %v1044_v63  ;;  %v3867_v62 = vadd.f32 %v1035_v15, %v1034_v14  ;;  %v2165_v54 = vpop.eup %2164  ;;  %v3869_v20 = vadd.f32 %v1041_v33, %v1040_v31  ;;  %v863_v63 = vadd.f32 10000.0, %v3865_v32 }
 0x164   :  { %v3856_v22 = vpop.permute.xlu1 %1524  ;;  %v3859_v2 = vpop.permute.xlu0 %1508  ;;  %v1053_v28 = vrot.slane %v1052_v19, 1  ;;  %v911_v14 = vmul.f32 %v893_v37, %v3772_v42  ;;  %v823_v10 = vmul.f32 10000.0, %v2163_v45  ;;  %v895_v51 = vmul.f32 10000.0, %v2165_v54  ;;  %v4345_v42 = vld [vmem:[#allocation45_spill] sm:$0xff] }
 0x165   :  { %v1047_v47 = vrot.slane %v1046_v56, 1  ;;  %v2167_v1 = vpop.eup %2166  ;;  %2178 = vrsqrt.f32 %v3867_v62  ;;  %vm1057_vm1 = vcmp.eq.f32.partialorder %v3867_v62, inf  ;;  %vm1064_vm2 = vcmp.eq.f32.partialorder %v3869_v20, inf }
 0x166   :  { %2180 = vrsqrt.f32 %v3869_v20  ;;  %v2169_v44 = vpop.eup %2168  ;;  %v3881_v59 = vadd.f32 %v1053_v28, %v1052_v19  ;;  %v824_v50 = vmul.f32 10000.0, %v2167_v1  ;;  %v929_v13 = vadd.f32 %v911_v14, %v839_v36  ;;  %v184_v1 = vld [vmem:[#allocation8 + $0x58] sm:$0xff] }
 0x167   :  { %v3872_v49 = vadd.f32 %v1047_v47, %v1046_v56  ;;  %v896_v35 = vmul.f32 10000.0, %v2169_v44  ;;  %v841_v3 = vmul.f32 %v823_v10, %v3786_v4  ;;  %v913_v47 = vmul.f32 %v895_v51, %v3794_v52  ;;  %v186_v51 = vld [vmem:[#allocation8 + $0x68] sm:$0xff] }
 0x168   :  { %v3863_v8 = vpop.permute.xlu1 %1552  ;;  %v3878_v24 = vpop.permute.xlu0 %1560  ;;  %v842_v19 = vmul.f32 %v824_v50, %v3801_v58  ;;  %v4346_v28 = vlaneseq  ;;  %v187_v50 = vld [vmem:[#allocation8 + $0x70] sm:$0xff]  ;;  %vm1059_vm3 = vcmp.eq.f32.partialorder %v3867_v62, 0.0  ;;  %vm1066_vm4 = vcmp.eq.f32.partialorder %v3869_v20, 0.0 }
 0x169   :  { %2182 = vrsqrt.f32 %v3872_v49  ;;  %v2171_v25 = vpop.eup %2170  ;;  %v914_v54 = vmul.f32 %v896_v35, %v3806_v29  ;;  %vm1071_vm5 = vcmp.eq.f32.partialorder %v3872_v49, inf  ;;  %vm1073_vm6 = vcmp.eq.f32.partialorder %v3872_v49, 0.0 }
 0x16a   :  { %2184 = vrcp.f32 %v791_v39  ;;  %v2173_v56 = vpop.eup %2172  ;;  %v825_v39 = vmul.f32 10000.0, %v2171_v25  ;;  %vm1078_vm7 = vcmp.eq.f32.partialorder %v3881_v59, inf  ;;  %vm1080_vm9 = vcmp.eq.f32.partialorder %v3881_v59, 0.0 }
 0x16b   :  { %2186 = vrsqrt.f32 %v3881_v59  ;;  %v2175_v17 = vpop.eup %2174  ;;  %v897_v4 = vmul.f32 10000.0, %v2173_v56  ;;  %v1083_v56 = vld [vmem:[#allocation10] sm:$0xf] }
 0x16c   :  { %v1458_v61 = vpop.permute.xlu1 %1457  ;;  %2188 = vrcp.f32 %v863_v63  ;;  %v3892_v33 = vpop.permute.xlu0 %1612  ;;  %v947_v63 = vmul.f32 %v929_v13, %v184_v1  ;;  %v843_v58 = vmul.f32 %v825_v39, %v3826_v34  ;;  %v826_v25 = vmul.f32 10000.0, %v2175_v17 }
 0x16d   :  { %v1466_v16 = vmul.f32 %v1458_v61, %v4343_v26  ;;  %v2177_v44 = vpop.eup %2176  ;;  %v931_v26 = vadd.f32 %v913_v47, %v841_v3  ;;  %v915_v35 = vmul.f32 %v897_v4, %v3837_v12  ;;  %v1060_v34 = vand.u32 2147483648, %v3867_v62 }
 0x16e   :  { %v898_v1 = vmul.f32 10000.0, %v2177_v44  ;;  %v844_v44 = vmul.f32 %v826_v25, %v3846_v48 }
 0x16f   :  { %v3887_v9 = vadd.f32 %v1487_v55, %v1466_v16  ;;  %v3903_v55 = vshrl.u32 %v4346_v28, 7  ;;  %v932_v16 = vadd.f32 %v914_v54, %v842_v19  ;;  %v949_v17 = vmul.f32 %v931_v26, %v186_v51 }
 0x170   :  { %v1505_v31 = vpop.permute.xlu1 %1504  ;;  %v3908_v29 = vpop.permute.xlu0 %1638  ;;  %v1074_v26 = vand.u32 2147483648, %v3872_v49 }
 0x171   :  { %v1514_v15 = vmul.f32 %v1505_v31, %v4344_v23  ;;  %v1087_v23 = vsub.s32 0, %v3903_v55  ;;  %v1091_v13 = vsub.s32 1, %v3903_v55  ;;  %v950_v28 = vmul.f32 %v932_v16, %v187_v50 }
 0x172   :  { %v2179_v61 = vpop.eup %2178  ;;  %v916_v50 = vmul.f32 %v898_v1, %v3853_v60 }
 0x173   :  { %v3895_v45 = vadd.f32 %v1514_v15, %v4345_v42  ;;  %v2181_v36 = vpop.eup %2180  ;;  %v1056_v14 = vmul.f32 %v2179_v61, %v3867_v62  ;;  %v1067_v15 = vand.u32 2147483648, %v3869_v20  ;;  %v1088_v4 = vrot.slane %v1083_v56, %v1087_v23 }
 0x174   :  { %v3900_v37 = vpop.permute.xlu1 %1556  ;;  %v1063_v31 = vmul.f32 %v2181_v36, %v3869_v20  ;;  %v1092_v61 = vrot.slane %v1083_v56, %v1091_v13  ;;  %v1095_v36 = vsub.s32 2, %v3903_v55 }
 0x175   :  { %v1058_v42 = vsel %vm1057_vm1, %v3867_v62, %v1056_v14  ;;  %v933_v14 = vadd.f32 %v915_v35, %v843_v58 }
 0x176   :  { %v2183_v10 = vpop.eup %2182  ;;  %v1065_v47 = vsel %vm1064_vm2, %v3869_v20, %v1063_v31  ;;  %v3928_v31 = vpop.permute.xlu0 %1562  ;;  %v188_v20 = vld [vmem:[#allocation8 + $0x78] sm:$0xff]  ;;  %v1096_v23 = vrot.slane %v1083_v56, %v1095_v36 }
 0x177   :  { %v2185_v3 = vpop.eup %2184  ;;  %v1070_v12 = vmul.f32 %v2183_v10, %v3872_v49  ;;  %v1061_v10 = vsel %vm1059_vm3, %v1060_v34, %v1058_v42  ;;  %v1099_v34 = vsub.s32 3, %v3903_v55  ;;  %v934_v42 = vadd.f32 %v916_v50, %v844_v44  ;;  %v189_v55 = vld [vmem:[#allocation8 + $0x80] sm:$0xff] }
 0x178   :  { %v3905_v52 = vpop.permute.xlu1 %1582  ;;  %v2187_v19 = vpop.eup %2186  ;;  %v827_v62 = vmul.f32 10000.0, %v2185_v3  ;;  %v1105_v48 = vmul.f32 %v1088_v4, %v1061_v10  ;;  %v951_v3 = vmul.f32 %v933_v14, %v188_v20  ;;  %v4347_v10 = vld [vmem:[#allocation37_spill] sm:$0xff] }
 0x179   :  { %v2189_v39 = vpop.eup %2188  ;;  %v1072_v51 = vsel %vm1071_vm5, %v3872_v49, %v1070_v12  ;;  %v1077_v16 = vmul.f32 %v2187_v19, %v3881_v59  ;;  %v1081_v49 = vand.u32 2147483648, %v3881_v59 }
 0x17a   :  { %v899_v35 = vmul.f32 10000.0, %v2189_v39  ;;  %v3949_v19 = vpop.permute.xlu0 %1614  ;;  %v1110_v39 = vsel %vm1109_vm8, %v1105_v48, 0.0  ;;  %v4350_v48 = vld [vmem:[#allocation35_spill] sm:$0xff] }
 0x17b   :  { %v1079_v13 = vsel %vm1078_vm7, %v3881_v59, %v1077_v16 }
 0x17c   :  { %976 = vadd.xlane.f32.xlu1 %v947_v63  ;;  %v3924_v54 = vpop.permute.xlu1 %1480  ;;  %v1068_v63 = vsel %vm1066_vm4, %v1067_v15, %v1065_v47  ;;  %v1075_v15 = vsel %vm1073_vm6, %v1074_v26, %v1072_v51  ;;  %v845_v47 = vmul.f32 %v827_v62, %v3861_v18  ;;  %v917_v12 = vmul.f32 %v899_v35, %v3865_v32  ;;  %v4349_v35 = vld [vmem:[#allocation36_spill] sm:$0xff] }
 0x17d   :  { %v1106_v25 = vmul.f32 %v1092_v61, %v1068_v63  ;;  %v1107_v1 = vmul.f32 %v1096_v23, %v1075_v15  ;;  %v1082_v61 = vsel %vm1080_vm9, %v1081_v49, %v1079_v13  ;;  %v1538_v18 = vmul.f32 %v3856_v22, %v4347_v10  ;;  %v190_v63 = vld [vmem:[#allocation8 + $0x88] sm:$0xff]  ;;  %v4357_v10 = vld [vmem:[#allocation41_spill] sm:$0xff] }
 0x17e   :  { %v935_v36 = vadd.f32 %v917_v12, %v845_v47  ;;  %v1665_v44 = vpop.permute.xlu0 %1664  ;;  %v1594_v22 = vmul.f32 %v3776_v7, %v4350_v48  ;;  %v4351_v13 = vld [vmem:[#allocation42_spill] sm:$0xff]  ;;  %v4355_v7 = vld [vmem:[#allocation43_spill] sm:$0xff] }
 0x17f   :  { %v1111_v4 = vsel %vm1109_vm8, %v1106_v25, 0.0  ;;  %v1113_v26 = vsel %vm1109_vm8, %v1107_v1, 0.0  ;;  %v1545_v20 = vadd.f32 %v1538_v18, %v4349_v35 }
 0x180   :  { %980 = vadd.xlane.f32.xlu1 %v949_v17  ;;  %v3939_v58 = vpop.permute.xlu1 %1532  ;;  %v1100_v17 = vrot.slane %v1083_v56, %v1099_v34  ;;  %v1112_v14 = vadd.f32 %v1111_v4, %v1110_v39  ;;  %v4348_v56 = vld [vmem:[#allocation38_spill] sm:$0xff]  ;;  %v953_v50 = vmul.f32 %v935_v36, %v190_v63  ;;  %v4356_v36 = vld [vmem:[#allocation23_spill] sm:$0xff]  ;;  %v4358_v63 = vld [vmem:[#allocation44_spill] sm:$0xff] }
 0x181   :  { %v1566_v51 = vmul.f32 %v3863_v8, %v4348_v56  ;;  %v1622_v8 = vmul.f32 %v3848_v43, %v4351_v13  ;;  %v4354_v39 = vld [vmem:[#allocation54_spill] sm:$0xff] }
 0x182   :  { %v1108_v32 = vmul.f32 %v1100_v17, %v1082_v61  ;;  %v1114_v62 = vadd.f32 %v1113_v26, %v1112_v14  ;;  %v3964_v15 = vpop.permute.xlu0 %1564  ;;  %v4353_v17 = vld [vmem:[#allocation29_spill] sm:$0xff]  ;;  %v1678_v4 = vmul.f32 %v1665_v44, %v4354_v39  ;;  %v1568_v61 = vmul.f32 %v3900_v37, %v4355_v7  ;;  %v4359_v26 = vld [vmem:[#allocation28_spill] sm:$0xff]  ;;  %v4361_v37 = vld [vmem:[#allocation27_spill] sm:$0xff] }
 0x183   :  { %v1573_v34 = vadd.f32 %v1566_v51, %v1545_v20  ;;  %v1539_v14 = vmul.f32 %v3683_v53, %v4356_v36  ;;  %v1567_v56 = vmul.f32 %v3727_v0, %v4359_v26  ;;  %v1595_v35 = vmul.f32 %v3905_v52, %v4361_v37  ;;  %v4362_v53 = vld [vmem:[#allocation48_spill] sm:$0xff]  ;;  %v4366_v39 = vld [vmem:[#allocation61_spill] sm:$0xff] }
 0x184   :  { %982 = vadd.xlane.f32.xlu1 %v950_v28  ;;  %v1585_v60 = vpop.permute.xlu1 %1584  ;;  %v952_v28 = vmul.f32 %v934_v42, %v189_v55  ;;  %v1115_v23 = vsel %vm1109_vm8, %v1108_v32, 0.0  ;;  %v4352_v42 = vld [vmem:[#allocation26_spill] sm:$0xff]  ;;  %v4369_v26 = vld [vmem:[#allocation69_spill] sm:$0xff] }
 0x185   :  { %v1116_v49 = vadd.f32 %v1115_v23, %v1114_v62  ;;  %v1540_v47 = vmul.f32 %v3705_v40, %v4352_v42  ;;  %v1596_v40 = vmul.f32 %v1585_v60, %v4358_v63 }
 0x187   :  { %v1547_v18 = vadd.f32 %v1540_v47, %v4357_v10  ;;  %v4364_v47 = vld [vmem:[#allocation49_spill] sm:$0xff] }
 0x188   :  { %984 = vadd.xlane.f32.xlu1 %v951_v3  ;;  %v1611_v59 = vpop.permute.xlu1 %1610  ;;  %v1601_v3 = vadd.f32 %v1594_v22, %v1573_v34  ;;  %v1624_v34 = vmul.f32 %v3892_v33, %v4362_v53  ;;  %v1651_v52 = vmul.f32 %v3908_v29, %v4364_v47 }
 0x189   :  { %v1575_v44 = vadd.f32 %v1568_v61, %v1547_v18 }
 0x18a   :  { %v1629_v55 = vadd.f32 %v1622_v8, %v1601_v3 }
 0x18b   :  { %v1603_v23 = vadd.f32 %v1596_v40, %v1575_v44 }
 0x18c   :  { %986 = vadd.xlane.f32.xlu1 %v952_v28  ;;  %v3958_v16 = vpop.permute.xlu1 %1534  ;;  %v3974_v28 = vpop.permute.xlu0 %1616 }
 0x18d   :  { %v1631_v42 = vadd.f32 %v1624_v34, %v1603_v23 }
 0x190   :  { %988 = vadd.xlane.f32.xlu1 %v953_v50  ;;  %v1587_v25 = vpop.permute.xlu1 %1586  ;;  %v4360_v50 = vld [vmem:[#allocation40_spill] sm:$0xff]  ;;  %v1669_v60 = vpop.permute.xlu0 %1668 }
 0x191   :  { %v1546_v62 = vadd.f32 %v1539_v14, %v4360_v50  ;;  %v4371_v50 = vld [vmem:[#allocation50_spill] sm:$0xff] }
 0x193   :  { %v1574_v22 = vadd.f32 %v1567_v56, %v1546_v62  ;;  %v1597_v62 = vmul.f32 %v1587_v25, %v4371_v50 }
 0x194   :  { %v1637_v12 = vpop.permute.xlu1 %1636  ;;  %1117 = vadd.xlane.f32.xlu1 %v1116_v49  ;;  %v4363_v49 = vld [vmem:[#allocation55_spill] sm:$0xff]  ;;  %v4005_v61 = vpop.permute.xlu0 %1618 }
 0x195   :  { %v1650_v1 = vmul.f32 %v1637_v12, %v4353_v17  ;;  %v1623_v13 = vmul.f32 %v1611_v59, %v4363_v49  ;;  %v1602_v0 = vadd.f32 %v1595_v35, %v1574_v22  ;;  %v4365_v17 = vld [vmem:[#allocation67_spill] sm:$0xff]  ;;  %v4372_v35 = vld [vmem:[#allocation32_spill] sm:$0xff] }
 0x196   :  { %v4367_v59 = vld [vmem:[#allocation31_spill] sm:$0xff] }
 0x197   :  { %v1657_v43 = vadd.f32 %v1650_v1, %v1629_v55  ;;  %v1630_v55 = vadd.f32 %v1623_v13, %v1602_v0  ;;  %v1541_v7 = vmul.f32 %v3758_v46, %v4367_v59  ;;  %v4374_v0 = vld [vmem:[#allocation30_spill] sm:$0xff] }
 0x198   :  { %v3980_v32 = vpop.permute.xlu1 %1536  ;;  %v1671_v22 = vpop.permute.xlu0 %1670  ;;  %v1515_v25 = vmul.f32 %v3808_v21, %v4374_v0 }
 0x199   :  { %v1685_v51 = vadd.f32 %v1678_v4, %v1657_v43  ;;  %v1680_v4 = vmul.f32 %v1669_v60, %v4366_v39  ;;  %v4368_v43 = vld [vmem:[#allocation39_spill] sm:$0xff]  ;;  %v1658_v18 = vadd.f32 %v1651_v52, %v1630_v55 }
 0x19a   :  { %v1569_v29 = vmul.f32 %v3834_v57, %v4368_v43  ;;  %v4373_v57 = vld [vmem:[#allocation33_spill] sm:$0xff]  ;;  %v4380_v43 = vld [vmem:[#allocation71_spill] sm:$0xff] }
 0x19b   :  { %v2015_v20 = vadd.f32 -1.0, %v1685_v51  ;;  %v4370_v51 = vld [vmem:[#allocation47_spill] sm:$0xff]  ;;  %v1488_v53 = vmul.f32 %v3924_v54, %v4373_v57 }
 0x19c   :  { %v3989_v48 = vpop.permute.xlu1 %1588  ;;  %v1548_v44 = vadd.f32 %v1541_v7, %v4370_v51 }
 0x19d   :  { %v3992_v8 = vmul.f32 0.5, %v2015_v20  ;;  %v1467_v20 = vmul.f32 %v3792_v11, %v4372_v35 }
 0x19e   :  { %v1576_v23 = vadd.f32 %v1569_v29, %v1548_v44 }
 0x19f   :  { %v2022_v3 = vclamps-f32 %v3992_v8, 1.0 }
 0x1a0   :  { %v1641_v12 = vpop.permute.xlu1 %1640  ;;  %v1604_v52 = vadd.f32 %v1597_v62, %v1576_v23  ;;  %v4384_v23 = vld [vmem:[#allocation57_spill] sm:$0xff] }
 0x1a1   :  { %v3999_v33 = vand.u32 2147483647, %v2022_v3  ;;  %v1652_v1 = vmul.f32 %v1641_v12, %v4365_v17  ;;  %v4376_v12 = vld [vmem:[#allocation53_spill] sm:$0xff]  ;;  %v1495_v17 = vadd.f32 %v1488_v53, %v1467_v20  ;;  %vm1839_vm15 = vcmp.ge.f32.partialorder %v2022_v3, 0.0 }
 0x1a2   :  { %v1625_v11 = vmul.f32 %v3949_v19, %v4376_v12 }
 0x1a3   :  { %v1769_v36 = vsub.f32 1.0, %v3999_v33  ;;  %v1659_v14 = vadd.f32 %v1652_v1, %v1631_v42  ;;  %v1727_v34 = vmul.f32 0.0187293, %v3999_v33  ;;  %v4375_v42 = vld [vmem:[#allocation52_spill] sm:$0xff]  ;;  %v4377_v1 = vld [vmem:[#allocation34_spill] sm:$0xff] }
 0x1a4   :  { %v1667_v10 = vpop.permute.xlu1 %1666  ;;  %v1542_v47 = vmul.f32 %v3939_v58, %v4375_v42  ;;  %v1516_v39 = vmul.f32 %v3859_v2, %v4377_v1  ;;  %v4387_v1 = vld [vmem:[#allocation62_spill] sm:$0xff] }
 0x1a5   :  { %v4010_v63 = vmax.f32 %v1769_v36, 0.0  ;;  %v1687_v40 = vadd.f32 %v1680_v4, %v1659_v14  ;;  %v1679_v56 = vmul.f32 %v1667_v10, %v4369_v26  ;;  %v4378_v4 = vld [vmem:[#allocation46_spill] sm:$0xff]  ;;  %v1734_v7 = vsub.f32 0.074261, %v1727_v34  ;;  %v1647_v26 = vpop.permute.xlu0 %1646 }
 0x1a6   :  { %v1570_v59 = vmul.f32 %v3878_v24, %v4378_v4  ;;  %v4379_v36 = vld [vmem:[#allocation58_spill] sm:$0xff]  ;;  %v1522_v10 = vadd.f32 %v1515_v25, %v3887_v9  ;;  %v1549_v2 = vadd.f32 %v1542_v47, %v3895_v45  ;;  %v1523_v62 = vadd.f32 %v1516_v39, %v1495_v17  ;;  %v4386_v47 = vld [vmem:[#allocation56_spill] sm:$0xff] }
 0x1a7   :  { %v2017_v46 = vadd.f32 -1.0, %v1687_v40  ;;  %v1686_v37 = vadd.f32 %v1679_v56, %v1658_v18  ;;  %2190 = vrsqrt.f32 %v4010_v63  ;;  %v1543_v58 = vmul.f32 %v3958_v16, %v4379_v36  ;;  %v4381_v40 = vld [vmem:[#allocation64_spill] sm:$0xff]  ;;  %v4382_v56 = vld [vmem:[#allocation63_spill] sm:$0xff]  ;;  %v4389_v36 = vld [vmem:[#allocation65_spill] sm:$0xff] }
 0x1a8   :  { %v1591_v60 = vpop.permute.xlu1 %1590  ;;  %v1632_v18 = vadd.f32 %v1625_v11, %v1604_v52  ;;  %v1681_v24 = vmul.f32 %v1671_v22, %v4381_v40  ;;  %v1544_v51 = vmul.f32 %v3980_v32, %v4382_v56  ;;  %v1741_v45 = vmul.f32 %v1734_v7, %v3999_v33  ;;  %v4385_v22 = vld [vmem:[#allocation59_spill] sm:$0xff]  ;;  %v4388_v7 = vld [vmem:[#allocation60_spill] sm:$0xff] }
 0x1a9   :  { %v4021_v49 = vmul.f32 0.5, %v2017_v46  ;;  %v2016_v13 = vadd.f32 -1.0, %v1686_v37  ;;  %v4383_v46 = vld [vmem:[#allocation51_spill] sm:$0xff]  ;;  %v1550_v20 = vadd.f32 %v1543_v58, %v1522_v10  ;;  %v1572_v32 = vmul.f32 %v3964_v15, %v4384_v23  ;;  %v1649_v42 = vpop.permute.xlu0 %1648 }
 0x1aa   :  { %v1571_v9 = vmul.f32 %v3928_v31, %v4383_v46  ;;  %v1577_v34 = vadd.f32 %v1570_v59, %v1549_v2  ;;  %v1551_v31 = vadd.f32 %v1544_v51, %v1523_v62  ;;  %v1598_v52 = vmul.f32 %v3989_v48, %v4386_v47 }
 0x1ab   :  { %v2024_v55 = vclamps-f32 %v4021_v49, 1.0  ;;  %v4030_v54 = vmul.f32 0.5, %v2016_v13  ;;  %v1626_v13 = vmul.f32 %v3974_v28, %v4385_v22  ;;  %v1748_v11 = vadd.f32 -0.2121144, %v1741_v45 }
 0x1ac   :  { %v1643_v21 = vpop.permute.xlu1 %1642  ;;  %v1627_v39 = vmul.f32 %v4005_v61, %v4387_v1  ;;  %v1578_v59 = vadd.f32 %v1571_v9, %v1550_v20  ;;  %v1605_v40 = vadd.f32 %v1598_v52, %v1577_v34  ;;  %vm1785_vm10 = vcmp.eq.f32.partialorder %v4010_v63, inf }
 0x1ad   :  { %v4040_v14 = vand.u32 2147483647, %v2024_v55  ;;  %v2023_v19 = vclamps-f32 %v4030_v54, 1.0  ;;  %v1653_v29 = vmul.f32 %v1643_v21, %v4380_v43  ;;  %v1599_v21 = vmul.f32 %v1591_v60, %v4388_v7  ;;  %v4390_v43 = vld [vmem:[#allocation68_spill] sm:$0xff]  ;;  %v1677_v51 = vpop.permute.xlu0 %1676 }
 0x1ae   :  { %v1656_v48 = vmul.f32 %v1649_v42, %v4390_v43  ;;  %v1788_v61 = vand.u32 2147483648, %v4010_v63  ;;  %vm1787_vm11 = vcmp.eq.f32.partialorder %v4010_v63, 0.0  ;;  %vm1841_vm1 = vcmp.ge.f32.partialorder %v2024_v55, 0.0 }
 0x1af   :  { %v1729_v16 = vmul.f32 0.0187293, %v4040_v14  ;;  %v1771_v44 = vsub.f32 1.0, %v4040_v14  ;;  %v4053_v50 = vand.u32 2147483647, %v2023_v19  ;;  %v1660_v37 = vadd.f32 %v1653_v29, %v1632_v18 }
 0x1b0   :  { %v1593_v35 = vpop.permute.xlu1 %1592  ;;  %v1579_v18 = vadd.f32 %v1572_v32, %v1551_v31  ;;  %v1606_v62 = vadd.f32 %v1599_v21, %v1578_v59  ;;  %v1633_v32 = vadd.f32 %v1626_v13, %v1605_v40  ;;  %vm1840_vm2 = vcmp.ge.f32.partialorder %v2023_v19, 0.0 }
 0x1b1   :  { %v4060_v57 = vmax.f32 %v1771_v44, 0.0  ;;  %v1770_v53 = vsub.f32 1.0, %v4053_v50  ;;  %v1736_v0 = vsub.f32 0.074261, %v1729_v16  ;;  %v1688_v25 = vadd.f32 %v1681_v24, %v1660_v37 }
 0x1b2   :  { %v1728_v17 = vmul.f32 0.0187293, %v4053_v50  ;;  %v1600_v58 = vmul.f32 %v1593_v35, %v4389_v36  ;;  %v1755_v16 = vmul.f32 %v1748_v11, %v3999_v33  ;;  %v4391_v35 = vld [vmem:[#allocation66_spill] sm:$0xff]  ;;  %v1634_v42 = vadd.f32 %v1627_v39, %v1606_v62 }
 0x1b3   :  { %v4067_v12 = vmax.f32 %v1770_v53, 0.0  ;;  %2192 = vrsqrt.f32 %v4060_v57  ;;  %v2018_v4 = vadd.f32 -1.0, %v1688_v25  ;;  %v1743_v29 = vmul.f32 %v1736_v0, %v4040_v14  ;;  %v4392_v33 = vld [vmem:[#allocation70_spill] sm:$0xff] }
 0x1b4   :  { %v2191_v15 = vpop.eup %2190  ;;  %v1645_v28 = vpop.permute.xlu1 %1644  ;;  %v1735_v24 = vsub.f32 0.074261, %v1728_v17  ;;  %v1607_v46 = vadd.f32 %v1600_v58, %v1579_v18  ;;  %v1655_v20 = vmul.f32 %v1647_v26, %v4391_v35  ;;  %v1684_v34 = vmul.f32 %v1677_v51, %v4392_v33 }
 0x1b5   :  { %v4077_v10 = vmul.f32 0.5, %v2018_v4  ;;  %v1784_v2 = vmul.f32 %v2191_v15, %v4010_v63  ;;  %2194 = vrsqrt.f32 %v4067_v12  ;;  %v1654_v9 = vmul.f32 %v1645_v28, %v3584_v30 }
 0x1b6   :  { %v1750_v23 = vadd.f32 -0.2121144, %v1743_v29  ;;  %v1742_v0 = vmul.f32 %v1735_v24, %v4053_v50  ;;  %v1662_v11 = vadd.f32 %v1655_v20, %v1634_v42  ;;  %vm1799_vm12 = vcmp.eq.f32.partialorder %v4060_v57, inf }
 0x1b7   :  { %v2025_v60 = vclamps-f32 %v4077_v10, 1.0  ;;  %v1786_v44 = vsel %vm1785_vm10, %v4010_v63, %v1784_v2  ;;  %v1661_v31 = vadd.f32 %v1654_v9, %v1633_v32  ;;  %vm1801_vm13 = vcmp.eq.f32.partialorder %v4060_v57, 0.0 }
 0x1b8   :  { %v1621_v56 = vpop.permute.xlu1 %1620  ;;  %v1789_v22 = vsel %vm1787_vm11, %v1788_v61, %v1786_v44  ;;  %v1757_v63 = vmul.f32 %v1750_v23, %v4040_v14  ;;  %v1802_v39 = vand.u32 2147483648, %v4060_v57  ;;  %v1749_v59 = vadd.f32 -0.2121144, %v1742_v0 }
 0x1b9   :  { %v1628_v45 = vmul.f32 %v1621_v56, %v3660_v5  ;;  %v4090_v37 = vand.u32 2147483647, %v2025_v60  ;;  %v1762_v5 = vadd.f32 1.5707288, %v1755_v16  ;;  %vm1792_vm14 = vcmp.eq.f32.partialorder %v4067_v12, inf }
 0x1ba   :  { %v1764_v14 = vadd.f32 1.5707288, %v1757_v63  ;;  %v1756_v24 = vmul.f32 %v1749_v59, %v4053_v50  ;;  %vm1794_vm0 = vcmp.eq.f32.partialorder %v4067_v12, 0.0  ;;  %vm1842_vm5 = vcmp.ge.f32.partialorder %v2025_v60, 0.0 }
 0x1bb   :  { %v1635_v53 = vadd.f32 %v1628_v45, %v1607_v46  ;;  %v1772_v30 = vsub.f32 1.0, %v4090_v37  ;;  %v1730_v26 = vmul.f32 0.0187293, %v4090_v37  ;;  %v1832_v13 = vmul.f32 %v1789_v22, %v1762_v5 }
 0x1bc   :  { %v1673_v25 = vpop.permute.xlu1 %1672  ;;  %v1763_v23 = vadd.f32 1.5707288, %v1756_v24 }
 0x1bd   :  { %v1663_v47 = vadd.f32 %v1656_v48, %v1635_v53  ;;  %v1682_v52 = vmul.f32 %v1673_v25, %v3642_v6  ;;  %v4099_v15 = vmax.f32 %v1772_v30, 0.0  ;;  %v1846_v58 = vsub.f32 3.1415927, %v1832_v13 }
 0x1be   :  { %v1737_v43 = vsub.f32 0.074261, %v1730_v26 }
 0x1bf   :  { %v1689_v17 = vadd.f32 %v1682_v52, %v1661_v31  ;;  %v1691_v1 = vadd.f32 %v1684_v34, %v1663_v47  ;;  %2196 = vrsqrt.f32 %v4099_v15  ;;  %v1853_v45 = vsel %vm1839_vm15, %v1832_v13, %v1846_v58 }
 0x1c0   :  { %v2193_v4 = vpop.eup %2192  ;;  %v1675_v28 = vpop.permute.xlu1 %1674  ;;  %v1744_v35 = vmul.f32 %v1737_v43, %v4090_v37  ;;  %v1860_v0 = vmul.f32 %v1853_v45, %v1853_v45  ;;  %vm1806_vm3 = vcmp.eq.f32.partialorder %v4099_v15, inf  ;;  %vm1808_vm4 = vcmp.eq.f32.partialorder %v4099_v15, 0.0 }
 0x1c1   :  { %v2019_v6 = vadd.f32 -1.0, %v1689_v17  ;;  %v2021_v7 = vadd.f32 -1.0, %v1691_v1  ;;  %v1683_v21 = vmul.f32 %v1675_v28, %v3646_v38  ;;  %v1798_v36 = vmul.f32 %v2193_v4, %v4060_v57 }
 0x1c2   :  { %v2195_v48 = vpop.eup %2194  ;;  %v1751_v5 = vadd.f32 -0.2121144, %v1744_v35  ;;  %vm1013_vm15 = vcmask 0  }
 0x1c3   :  { %v4108_v29 = vmul.f32 0.5, %v2019_v6  ;;  %v4110_v2 = vmul.f32 0.5, %v2021_v7  ;;  %v1690_v18 = vadd.f32 %v1683_v21, %v1662_v11  ;;  %v1800_v40 = vsel %vm1799_vm12, %v4060_v57, %v1798_v36  ;;  %v1897_v6 = vpop.permute.xlu0 %1896 }
 0x1c4   :  { %v1892_v61 = vpop.permute.xlu1 %1891  ;;  %v1803_v38 = vsel %vm1801_vm13, %v1802_v39, %v1800_v40  ;;  %v1791_v56 = vmul.f32 %v2195_v48, %v4067_v12  ;;  %v1795_v57 = vand.u32 2147483648, %v4067_v12  ;;  %v1758_v54 = vmul.f32 %v1751_v5, %v4090_v37 }
 0x1c5   :  { %v2026_v51 = vclamps-f32 %v4108_v29, 1.0  ;;  %v2028_v16 = vclamps-f32 %v4110_v2, 1.0  ;;  %v2020_v44 = vadd.f32 -1.0, %v1690_v18  ;;  %v1834_v62 = vmul.f32 %v1803_v38, %v1764_v14 }
 0x1c6   :  { %v1793_v46 = vsel %vm1792_vm14, %v4067_v12, %v1791_v56  ;;  %v1809_v21 = vand.u32 2147483648, %v4099_v15  ;;  %v1765_v37 = vadd.f32 1.5707288, %v1758_v54 }
 0x1c7   :  { %v1724_v50 = vand.u32 2147483647, %v2026_v51  ;;  %v4131_v9 = vand.u32 2147483647, %v2028_v16  ;;  %v4134_v20 = vmul.f32 0.5, %v2020_v44  ;;  %v1796_v32 = vsel %vm1794_vm0, %v1795_v57, %v1793_v46 }
 0x1c8   :  { %v1873_v8 = vpop.permute.xlu1 %1872  ;;  %v1848_v3 = vsub.f32 3.1415927, %v1834_v62  ;;  %v1833_v30 = vmul.f32 %v1796_v32, %v1763_v23  ;;  %vm1843_vm10 = vcmp.ge.f32.partialorder %v2026_v51, 0.0  ;;  %vm1845_vm13 = vcmp.ge.f32.partialorder %v2028_v16, 0.0 }
 0x1c9   :  { %v1731_v53 = vmul.f32 0.0187293, %v1724_v50  ;;  %v1773_v33 = vsub.f32 1.0, %v1724_v50  ;;  %v1775_v12 = vsub.f32 1.0, %v4131_v9  ;;  %v2027_v34 = vclamps-f32 %v4134_v20, 1.0 }
 0x1ca   :  { %v4139_v22 = vmul.f32 %v3725_v27, %v1873_v8  ;;  %v1733_v42 = vmul.f32 0.0187293, %v4131_v9  ;;  %v1855_v47 = vsel %vm1841_vm1, %v1834_v62, %v1848_v3  ;;  %v1847_v63 = vsub.f32 3.1415927, %v1833_v30 }
 0x1cb   :  { %v4143_v25 = vmax.f32 %v1773_v33, 0.0  ;;  %v4148_v31 = vand.u32 2147483647, %v2027_v34  ;;  %v1738_v26 = vsub.f32 0.074261, %v1731_v53  ;;  %v4151_v27 = vmax.f32 %v1775_v12, 0.0 }
 0x1cc   :  { %v1875_v52 = vmul.f32 %v4139_v22, %v1860_v0  ;;  %v2197_v13 = vpop.eup %2196  ;;  %v1854_v11 = vsel %vm1840_vm2, %v1833_v30, %v1847_v63  ;;  %v1862_v4 = vmul.f32 %v1855_v47, %v1855_v47  ;;  %v1740_v59 = vsub.f32 0.074261, %v1733_v42  ;;  %v1907_v0 = vpop.permute.xlu0 %1906 }
 0x1cd   :  { %2198 = vrsqrt.f32 %v4143_v25  ;;  %v1774_v49 = vsub.f32 1.0, %v4148_v31  ;;  %v1732_v17 = vmul.f32 0.0187293, %v4148_v31  ;;  %v1861_v28 = vmul.f32 %v1854_v11, %v1854_v11 }
 0x1ce   :  { %v1924_v55 = vmul.f32 %v1892_v61, %v1875_v52  ;;  %v1745_v39 = vmul.f32 %v1738_v26, %v1724_v50  ;;  %2200 = vrsqrt.f32 %v4151_v27  ;;  %v1805_v7 = vmul.f32 %v2197_v13, %v4099_v15  ;;  %v1902_v61 = vpop.permute.xlu1 %1901 }
 0x1cf   :  { %v4158_v1 = vmax.f32 %v1774_v49, 0.0  ;;  %v1876_v19 = vmul.f32 %v4139_v22, %v1861_v28  ;;  %v1739_v36 = vsub.f32 0.074261, %v1732_v17  ;;  %v1877_v14 = vmul.f32 %v4139_v22, %v1862_v4 }
 0x1d0   :  { %1931 = vadd.xlane.f32.xlu0 %v1924_v55  ;;  %v1747_v43 = vmul.f32 %v1740_v59, %v4131_v9  ;;  %v1752_v48 = vadd.f32 -0.2121144, %v1745_v39  ;;  %v1807_v18 = vsel %vm1806_vm3, %v4099_v15, %v1805_v7  ;;  %vm1813_vm6 = vcmp.eq.f32.partialorder %v4143_v25, inf }
 0x1d1   :  { %v1925_v58 = vmul.f32 %v1897_v6, %v1876_v19  ;;  %2202 = vrsqrt.f32 %v4158_v1  ;;  %v1810_v40 = vsel %vm1808_vm4, %v1809_v21, %v1807_v18  ;;  %v1746_v24 = vmul.f32 %v1739_v36, %v4148_v31  ;;  %v1917_v21 = vpop.permute.xlu0 %1916 }
 0x1d2   :  { %v1835_v38 = vmul.f32 %v1810_v40, %v1765_v37  ;;  %v1926_v56 = vmul.f32 %v1902_v61, %v1877_v14  ;;  %v1759_v44 = vmul.f32 %v1752_v48, %v1724_v50  ;;  %v1754_v62 = vadd.f32 -0.2121144, %v1747_v43  ;;  %v1912_v28 = vpop.permute.xlu1 %1911 }
 0x1d3   :  { %v1816_v15 = vand.u32 2147483648, %v4143_v25  ;;  %v1753_v3 = vadd.f32 -0.2121144, %v1746_v24  ;;  %vm1815_vm7 = vcmp.eq.f32.partialorder %v4143_v25, 0.0  ;;  %vm1827_vm8 = vcmp.eq.f32.partialorder %v4151_v27, inf }
 0x1d4   :  { %1933 = vadd.xlane.f32.xlu0 %v1925_v58  ;;  %v1849_v46 = vsub.f32 3.1415927, %v1835_v38  ;;  %v1766_v23 = vadd.f32 1.5707288, %v1759_v44  ;;  %v1761_v50 = vmul.f32 %v1754_v62, %v4131_v9  ;;  %v1830_v30 = vand.u32 2147483648, %v4151_v27 }
 0x1d5   :  { %v1760_v42 = vmul.f32 %v1753_v3, %v4148_v31  ;;  %vm1829_vm9 = vcmp.eq.f32.partialorder %v4151_v27, 0.0  ;;  %vm1820_vm11 = vcmp.eq.f32.partialorder %v4158_v1, inf  ;;  %v1823_v31 = vand.u32 2147483648, %v4158_v1 }
 0x1d6   :  { %v1856_v35 = vsel %vm1842_vm5, %v1835_v38, %v1849_v46  ;;  %vm1822_vm12 = vcmp.eq.f32.partialorder %v4158_v1, 0.0  ;;  %vm1844_vm14 = vcmp.ge.f32.partialorder %v2027_v34, 0.0  ;;  %v1922_v2 = vpop.permute.xlu1 %1921 }
 0x1d7   :  { %v1863_v8 = vmul.f32 %v1856_v35, %v1856_v35  ;;  %v1767_v11 = vadd.f32 1.5707288, %v1760_v42 }
 0x1d8   :  { %1935 = vadd.xlane.f32.xlu0 %v1926_v56 }
 0x1d9   :  { %v1878_v10 = vmul.f32 %v4139_v22, %v1863_v8 }
 0x1da   :  { %v2199_v57 = vpop.eup %2198 }
 0x1db   :  { %v1812_v45 = vmul.f32 %v2199_v57, %v4143_v25  ;;  %v2201_v53 = vpop.eup %2200  ;;  %v1927_v5 = vmul.f32 %v1907_v0, %v1878_v10 }
 0x1dc   :  { %v1826_v12 = vmul.f32 %v2201_v53, %v4151_v27 }
 0x1dd   :  { %v1814_v32 = vsel %vm1813_vm6, %v4143_v25, %v1812_v45  ;;  %v1768_v25 = vadd.f32 1.5707288, %v1761_v50  ;;  %1937 = vadd.xlane.f32.xlu0 %v1927_v5  ;;  %v975_v58 = vpop.xlane.xlu0 %974 }
 0x1de   :  { %v1817_v33 = vsel %vm1815_vm7, %v1816_v15, %v1814_v32  ;;  %v2203_v47 = vpop.eup %2202  ;;  %v1828_v9 = vsel %vm1827_vm8, %v4151_v27, %v1826_v12  ;;  %v999_v48 = vadd.f32 %v3850_v41, %v975_v58 }
 0x1df   :  { %v1836_v60 = vmul.f32 %v1817_v33, %v1766_v23  ;;  %v1831_v26 = vsel %vm1829_vm9, %v1830_v30, %v1828_v9  ;;  %v1819_v63 = vmul.f32 %v2203_v47, %v4158_v1 }
 0x1e0   :  { %v1838_v55 = vmul.f32 %v1831_v26, %v1768_v25 }
 0x1e1   :  { %v1850_v52 = vsub.f32 3.1415927, %v1836_v60  ;;  %v1821_v17 = vsel %vm1820_vm11, %v4158_v1, %v1819_v63  ;;  %v979_v37 = vpop.xlane.xlu0 %978 }
 0x1e2   :  { %v1852_v27 = vsub.f32 3.1415927, %v1838_v55  ;;  %v1824_v4 = vsel %vm1822_vm12, %v1823_v31, %v1821_v17 }
 0x1e3   :  { %v1857_v49 = vsel %vm1843_vm10, %v1836_v60, %v1850_v52  ;;  %v1837_v51 = vmul.f32 %v1824_v4, %v1767_v11 }
 0x1e4   :  { %v1864_v13 = vmul.f32 %v1857_v49, %v1857_v49  ;;  %v1859_v59 = vsel %vm1845_vm13, %v1838_v55, %v1852_v27 }
 0x1e5   :  { %v1851_v6 = vsub.f32 3.1415927, %v1837_v51  ;;  %v1866_v19 = vmul.f32 %v1859_v59, %v1859_v59 }
 0x1e6   :  { %v1879_v29 = vmul.f32 %v4139_v22, %v1864_v13 }
 0x1e7   :  { %v1858_v54 = vsel %vm1844_vm14, %v1837_v51, %v1851_v6  ;;  %v1881_v36 = vmul.f32 %v4139_v22, %v1866_v19 }
 0x1e8   :  { %v1928_v39 = vmul.f32 %v1912_v28, %v1879_v29  ;;  %v1865_v7 = vmul.f32 %v1858_v54, %v1858_v54 }
 0x1e9   :  { %v1930_v16 = vmul.f32 %v1922_v2, %v1881_v36 }
 0x1ea   :  { %1939 = vadd.xlane.f32.xlu0 %v1928_v39  ;;  %v1880_v1 = vmul.f32 %v4139_v22, %v1865_v7 }
 0x1ec   :  { %v1929_v14 = vmul.f32 %v1917_v21, %v1880_v1 }
 0x1ee   :  { %1941 = vadd.xlane.f32.xlu0 %v1929_v14 }
 0x1f2   :  { %1943 = vadd.xlane.f32.xlu0 %v1930_v16 }
 0x205   :  { %v977_v43 = vpop.xlane.xlu1 %976 }
 0x206   :  { %v1000_v34 = vadd.f32 %v999_v48, %v977_v43 }
 0x208   :  { %v1001_v40 = vadd.f32 %v1000_v34, %v979_v37 }
 0x209   :  { %v981_v20 = vpop.xlane.xlu1 %980 }
 0x20a   :  { %v1002_v38 = vadd.f32 %v1001_v40, %v981_v20 }
 0x20d   :  { %v983_v18 = vpop.xlane.xlu1 %982 }
 0x20e   :  { %v1003_v24 = vadd.f32 %v1002_v38, %v983_v18 }
 0x211   :  { %v985_v61 = vpop.xlane.xlu1 %984 }
 0x212   :  { %v1004_v44 = vadd.f32 %v1003_v24, %v985_v61 }
 0x215   :  { %v987_v56 = vpop.xlane.xlu1 %986 }
 0x216   :  { %v1005_v22 = vadd.f32 %v1004_v44, %v987_v56 }
 0x219   :  { %v989_v62 = vpop.xlane.xlu1 %988 }
 0x21a   :  { %v1006_v46 = vadd.f32 %v1005_v22, %v989_v62 }
 0x21c   :  { %v1007_v57 = vrot.slane %v1006_v46, 4 }
 0x21d   :  { %v1118_v45 = vpop.xlane.xlu1 %1117 }
 0x21e   :  { %v1008_v41 = vadd.f32 %v1007_v57, %v1006_v46  ;;  %1119 = vst.msk [vmem:[#allocation14] sm:$0x1] %vm1013_vm15, %v1118_v45 }
 0x21f   :  { %2348 = shalt.err (!%p2345_p6)
}
 0x220   :  { %1977 = dma.vmem_to_hbm [thread:$0]  %s1975_s5, 16, %s4224_s10, [#allocation15]   ;;  %v1009_v35 = vrot.slane %v1008_v41, 2 }
 0x221   :  { %s2421_s1 = smov [#allocation13]  }
 0x222   :  { %v1010_v15 = vadd.f32 %v1009_v35, %v1008_v41  ;;  %s1964_s14 = sshll.u32 %s2421_s1, 4  ;;  %s1965_s14 = int_to_ptr.vmem [resolvable:$true] %s1964_s14 }
 0x223   :  { %s2357_s15 = scalar_lea.vmem %s1965_s14, 16  ;;  %s2361_s3 = scalar_lea.vmem %s1965_s14, 32 }
 0x224   :  { %v1011_v8 = vrot.slane %v1010_v15, 1  ;;  %p2358_p7 = scmp.ne.s32.totalorder %s1965_s14, %s2357_s15  ;;  %p2362_p8 = scmp.lt.s32.totalorder %s1965_s14, %s1965_s14 }
 0x225   :  { %p2363_p9 = scmp.lt.s32.totalorder %s2361_s3, %s2357_s15 }
 0x226   :  { %v1012_v3 = vadd.f32 %v1011_v8, %v1010_v15 }
 0x227   :  { %p2364_p10 = por %p2363_p9, %p2362_p8 }
 0x228   :  { %1014 = vst.msk [vmem:[#allocation13] sm:$0x1] %vm1013_vm15, %v1012_v3 }
 0x229   :  { %p2365_p11 = pnand %p2364_p10, %p2358_p7 }
 0x22b   :  { %2368 = shalt.err (!%p2365_p11)
}
 0x22c   :  { %1967 = dma.vmem_to_hbm [thread:$0]  %s1965_s14, 16, %s4223_s9, [#allocation4]  }
 0x22d   :  { %s2422_s10 = smov [#allocation16]  }
 0x22e   :  { %s1984_s8 = sshll.u32 %s2422_s10, 4  ;;  %s1985_s8 = int_to_ptr.vmem [resolvable:$true] %s1984_s8 }
 0x22f   :  { %s2377_s9 = scalar_lea.vmem %s1985_s8, 16  ;;  %s2381_s18 = scalar_lea.vmem %s1985_s8, 32 }
 0x230   :  { %p2378_p12 = scmp.ne.s32.totalorder %s1985_s8, %s2377_s9  ;;  %p2382_p13 = scmp.lt.s32.totalorder %s1985_s8, %s1985_s8 }
 0x231   :  { %p2383_p0 = scmp.lt.s32.totalorder %s2381_s18, %s2377_s9 }
 0x233   :  { %p2384_p1 = por %p2383_p0, %p2382_p13 }
 0x235   :  { %p2385_p2 = pnand %p2384_p1, %p2378_p12 }
 0x259   :  { %v1932_v23 = vpop.xlane.xlu0 %1931 }
 0x25d   :  { %v1934_v32 = vpop.xlane.xlu0 %1933 }
 0x25e   :  { %v1945_v10 = vadd.f32 %v1934_v32, %v1932_v23 }
 0x261   :  { %v1936_v50 = vpop.xlane.xlu0 %1935 }
 0x262   :  { %v1946_v60 = vadd.f32 %v1945_v10, %v1936_v50 }
 0x266   :  { %v1938_v53 = vpop.xlane.xlu0 %1937 }
 0x267   :  { %v1947_v12 = vadd.f32 %v1946_v60, %v1938_v53 }
 0x273   :  { %v1940_v33 = vpop.xlane.xlu0 %1939 }
 0x274   :  { %v1948_v30 = vadd.f32 %v1947_v12, %v1940_v33 }
 0x277   :  { %v1942_v0 = vpop.xlane.xlu0 %1941 }
 0x278   :  { %v1949_v5 = vadd.f32 %v1948_v30, %v1942_v0 }
 0x27b   :  { %v1944_v42 = vpop.xlane.xlu0 %1943 }
 0x27c   :  { %v1950_v47 = vadd.f32 %v1949_v5, %v1944_v42 }
 0x27e   :  { %v1951_v52 = vrot.slane %v1950_v47, 4 }
 0x280   :  { %v1952_v25 = vadd.f32 %v1951_v52, %v1950_v47 }
 0x282   :  { %v1953_v9 = vrot.slane %v1952_v25, 2 }
 0x284   :  { %v1954_v26 = vadd.f32 %v1953_v9, %v1952_v25 }
 0x286   :  { %v1955_v63 = vrot.slane %v1954_v26, 1 }
 0x288   :  { %v1956_v49 = vadd.f32 %v1955_v63, %v1954_v26 }
 0x28a   :  { %1957 = vst.msk [vmem:[#allocation16] sm:$0x1] %vm1013_vm15, %v1956_v49 }
 0x28b   :  { %2388 = shalt.err (!%p2385_p2)
}
 0x28c   :  { %1987 = dma.vmem_to_hbm [thread:$0]  %s1985_s8, 16, %s4225_s11, [#allocation15]  }
 0x28d   :  { %2405 = dma.done.wait [#allocation4], 16  }
 0x28e   :  { %2406 = vsyncadd [#allocation4], 4294967280 }
 0x28f   :  { %2407 = dma.done.wait [#allocation15], 32  }
 0x290   :  { %2408 = vsyncadd [#allocation15], 4294967264 }
 0x291   :  { %1997 = vsyncpa [#allocation3], 1 }
 0x292   :  { %1998 = vsyncpa [#allocation6], 1 }
 0x293   :  { %1999 = vsyncpa [#allocation9], 1 }
 0x294   :  { %2000 = vsyncpa [#allocation12], 1 }
 0x295   :  { %2001 = vsyncpa [#allocation4], 1 }
 0x296   :  { %2002 = vsyncpa [#allocation15], 1 }

</bundles_post_ra>
